<compile_context>
chip_gen: v5e
topology: v5e:2x2
jax: 0.10.0
libtpu: 0.0.40
codegen_flags: <defaults>
</compile_context>

<pallas_src>
import math

import jax
import jax.numpy as jnp
from jax import lax
from jax.experimental import pallas as pl
from jax.experimental.pallas import tpu as pltpu


def encdec_kernel(src_ref, trg_ref,
                  enc_wih0_ref, enc_wbig_ref, enc_b_ref,
                  dec_wih0_ref, dec_wbig_ref, dec_b_ref,
                  proj_w_ref, proj_b_ref,
                  logits_ref,
                  enc_gx_sc, dec_gx_sc, dec_out_sc):
    H4 = enc_wih0_ref.shape[1]          # 4H
    H = H4 // 4
    L = enc_b_ref.shape[0]              # nlayers
    S = src_ref.shape[0]
    T = trg_ref.shape[0]

    # Guarantee single-pass MXU matmuls with f32 accumulation.
    dot_kw = dict(preferred_element_type=jnp.float32,
                  precision=lax.Precision.DEFAULT)

    # Hoisted layer-0 input projections (bias folded), one lane-dense matmul per
    # stack. The decoder one has no dependence on the encoder recurrence, so the
    # (single basic block) scheduler hides it under the encoder's serial steps.
    enc_gx_sc[...] = (jnp.dot(src_ref[...], enc_wih0_ref[...], **dot_kw)
                      + enc_b_ref[0])
    dec_gx_sc[...] = (jnp.dot(trg_ref[...], dec_wih0_ref[...], **dot_kw)
                      + dec_b_ref[0])

    def lstm_cell(g, c):
        # 3 EUP pushes per (layer, step): whole-vreg sigmoid + whole-vreg tanh
        # over the 4H gate vector (unused lanes are free) + tanh(c_new),
        # instead of 5 slice-wise transcendentals.
        sg = jax.nn.sigmoid(g)
        tg = jnp.tanh(g)
        # TODO(synk): the lane-offset gate slices imply XLU rotates on the serial
        # chain; removing them would need 4 separate (H,H) matmuls (4x MXU pushes).
        i_g = sg[:, 0 * H:1 * H]
        f_g = sg[:, 1 * H:2 * H]
        g_g = tg[:, 2 * H:3 * H]
        o_g = sg[:, 3 * H:4 * H]
        c_new = f_g * c + i_g * g_g
        h_new = o_g * jnp.tanh(c_new)
        return h_new, c_new

    def run_stack(gx_sc, length, wbig_ref, b_ref, init_states, out_sc=None):
        """Wavefront-interleaved L-layer LSTM stack.

        Wavefront step s runs layer l at timestep t = s - l, so all layers'
        recurrent + inter-layer-input matmuls of one wavefront step are L
        independent (1,H)@(H,L*4H) MXU pushes (pipelined back-to-back) and the
        layers' EUP/VPU chains overlap. Returns per-layer final (h, c).
        """
        h = [hc[0] for hc in init_states]
        c = [hc[1] for hc in init_states]
        finals = [None] * L
        b_hi = [b_ref[l] for l in range(1, L)]     # layer>0 biases, loaded once
        for s in range(length + L - 1):            # static, fully unrolled
            # Fused gate pre-activations for every layer this wavefront step:
            #   G[:, block m] = h_{m-1} @ W_ih[m]  (m>0)  +  h_m @ W_hh[m]
            G = jnp.dot(h[0], wbig_ref[0], **dot_kw)            # (1, L*4H)
            for l in range(1, L):
                G = G + jnp.dot(h[l], wbig_ref[l], **dot_kw)
            for l in range(L):
                t = s - l
                if t < 0 or t >= length:
                    continue                       # layer idle at this wavefront step
                g = G[:, l * H4:(l + 1) * H4]
                if l == 0:
                    g = g + gx_sc[pl.ds(t, 1), :]  # hoisted x @ W_ih[0] + b[0]
                else:
                    g = g + b_hi[l - 1]
                h[l], c[l] = lstm_cell(g, c[l])
                if t == length - 1:
                    finals[l] = (h[l], c[l])
                if out_sc is not None and l == L - 1:
                    # TODO(synk): masked 32-of-128-lane vst; harmless at this size.
                    out_sc[pl.ds(t, 1), :] = h[l]
        return finals

    zeros = jnp.zeros((1, H), jnp.float32)

    # Encoder: zero initial state; only its final (h, c) per layer is kept.
    enc_finals = run_stack(enc_gx_sc, S, enc_wbig_ref, enc_b_ref,
                           [(zeros, zeros)] * L)

    # Decoder: initial state = encoder final (h, c), layer by layer; the top
    # layer's outputs are stored for the projection.
    run_stack(dec_gx_sc, T, dec_wbig_ref, dec_b_ref, enc_finals,
              out_sc=dec_out_sc)

    # Projection: logits = dec_out @ W_proj + b_proj (vocab padded to a
    # 128-multiple so this store is an unmasked, lane-dense vst).
    logits_ref[...] = (jnp.dot(dec_out_sc[...], proj_w_ref[...], **dot_kw)
                       + proj_b_ref[...])


def _fuse_gates(w):
    """(L, 4, In, H) -> (L, In, 4H) with gate order i|f|g|o on lanes."""
    L, g, i, h = w.shape
    return jnp.transpose(w, (0, 2, 1, 3)).reshape(L, i, g * h)


def _fuse_bias(b):
    """(L, 4, 1, H) -> (L, 1, 4H)."""
    L, g, _, h = b.shape
    return b.reshape(L, g * h)[:, None, :]


def _wavefront_weight(wih_f, whh_f):
    """Build W_big[L, H, L*4H] for the wavefront-fused recurrent matmuls.

    Row block l (= W_big[l]) has W_hh[l] in column block l (recurrent path) and
    W_ih[l+1] in column block l+1 (that layer's input path), so
    sum_l h_l @ W_big[l] yields every layer's gate pre-activation at once
    (layer 0's input contribution comes from the hoisted sequence projection).
    """
    L, H, H4 = whh_f.shape
    W = jnp.zeros((L, H, L * H4), jnp.float32)
    for l in range(L):
        W = W.at[l, :, l * H4:(l + 1) * H4].set(whh_f[l])
        if l + 1 < L:
            W = W.at[l, :, (l + 1) * H4:(l + 2) * H4].set(wih_f[l + 1])
    return W


def enc_dec_forward(src_words, trg_words, params):
    # Embedding lookups (gathers) stay in plain JAX (glue).
    src_emb = params["src_embedding"][src_words]    # (S, E)
    trg_emb = params["trg_embedding"][trg_words]    # (T, E)
    S, E = src_emb.shape
    T = trg_emb.shape[0]
    H = params["enc_whh"].shape[-1]
    V = params["proj_w"].shape[-1]
    assert E == H, "kernel assumes emb_size == hidden_size"

    # Fuse the 4 gate matrices so gates are lane slices of one dot result.
    enc_wih = _fuse_gates(params["enc_wih"])        # (L, H, 4H)
    enc_whh = _fuse_gates(params["enc_whh"])        # (L, H, 4H)
    enc_b = _fuse_bias(params["enc_b"])             # (L, 1, 4H)
    dec_wih = _fuse_gates(params["dec_wih"])
    dec_whh = _fuse_gates(params["dec_whh"])
    dec_b = _fuse_bias(params["dec_b"])

    # Block weights for the wavefront-interleaved recurrence.
    enc_wbig = _wavefront_weight(enc_wih, enc_whh)  # (L, H, L*4H)
    dec_wbig = _wavefront_weight(dec_wih, dec_whh)

    # Pad the vocab dim to a multiple of 128 for unmasked lane-dense output stores.
    Vp = pl.cdiv(V, 128) * 128
    proj_w = jnp.pad(params["proj_w"], ((0, 0), (0, Vp - V)))
    proj_b = jnp.pad(params["proj_b"], ((0, 0), (0, Vp - V)))

    args = (src_emb, trg_emb,
            enc_wih[0], enc_wbig, enc_b,
            dec_wih[0], dec_wbig, dec_b,
            proj_w, proj_b)

    vmem_specs = [pl.BlockSpec(memory_space=pltpu.MemorySpace.VMEM) for _ in args]

    logits_padded = pl.pallas_call(
        encdec_kernel,
        out_shape=jax.ShapeDtypeStruct((T, Vp), jnp.float32),
        in_specs=vmem_specs,
        out_specs=pl.BlockSpec(memory_space=pltpu.MemorySpace.VMEM),
        scratch_shapes=[pltpu.VMEM((S, 4 * H), jnp.float32),   # enc X@W_ih0 + b0
                        pltpu.VMEM((T, 4 * H), jnp.float32),   # dec X@W_ih0 + b0
                        pltpu.VMEM((T, H), jnp.float32)],      # dec top-layer out
        # Working set is a few hundred KiB; no vmem_limit override needed.
    )(*args)
    return logits_padded[:, :V]


def init_params(key, nwords_src, nwords_trg, emb_size, hidden_size, nlayers):
    keys = jax.random.split(key, 12)
    k = 1.0 / math.sqrt(hidden_size)

    def u(k_, shape, lo, hi):
        return jax.random.uniform(k_, shape, jnp.float32, lo, hi)

    params = {
        "src_embedding": u(keys[0], (nwords_src, emb_size), -0.25, 0.25),
        "trg_embedding": u(keys[1], (nwords_trg, emb_size), -0.25, 0.25),
        "enc_wih": u(keys[2], (nlayers, 4, emb_size, hidden_size), -k, k),
        "enc_whh": u(keys[3], (nlayers, 4, hidden_size, hidden_size), -k, k),
        # fold PyTorch's b_ih + b_hh into one bias per gate
        "enc_b": (u(keys[4], (nlayers, 4, 1, hidden_size), -k, k)
                  + u(keys[5], (nlayers, 4, 1, hidden_size), -k, k)),
        "dec_wih": u(keys[6], (nlayers, 4, emb_size, hidden_size), -k, k),
        "dec_whh": u(keys[7], (nlayers, 4, hidden_size, hidden_size), -k, k),
        "dec_b": (u(keys[8], (nlayers, 4, 1, hidden_size), -k, k)
                  + u(keys[9], (nlayers, 4, 1, hidden_size), -k, k)),
    }
    xav = math.sqrt(6.0 / (hidden_size + nwords_trg))          # xavier_uniform
    params["proj_w"] = u(keys[10], (hidden_size, nwords_trg), -xav, xav)
    params["proj_b"] = u(keys[11], (1, nwords_trg), -k, k)
    return params


def reference_forward(src_words, trg_words, params):
    """Pure-JAX reference with identical math (for correctness check)."""
    def lstm_stack(seq, wih, whh, b, init):
        nlayers = wih.shape[0]
        finals = []
        for l in range(nlayers):
            h, c = init[l]
            outs = []
            for t in range(seq.shape[0]):
                x = seq[t:t + 1]
                gi = jax.nn.sigmoid(x @ wih[l, 0] + h @ whh[l, 0] + b[l, 0])
                gf = jax.nn.sigmoid(x @ wih[l, 1] + h @ whh[l, 1] + b[l, 1])
                gg = jnp.tanh(x @ wih[l, 2] + h @ whh[l, 2] + b[l, 2])
                go = jax.nn.sigmoid(x @ wih[l, 3] + h @ whh[l, 3] + b[l, 3])
                c = gf * c + gi * gg
                h = go * jnp.tanh(c)
                outs.append(h)
            seq = jnp.concatenate(outs, axis=0)
            finals.append((h, c))
        return seq, finals

    with jax.default_matmul_precision("highest"):
        src_emb = params["src_embedding"][src_words]
        trg_emb = params["trg_embedding"][trg_words]
        H = params["enc_whh"].shape[-1]
        nlayers = params["enc_wih"].shape[0]
        zeros = jnp.zeros((1, H), jnp.float32)
        _, enc_finals = lstm_stack(src_emb, params["enc_wih"], params["enc_whh"],
                                   params["enc_b"], [(zeros, zeros)] * nlayers)
        dec_seq, _ = lstm_stack(trg_emb, params["dec_wih"], params["dec_whh"],
                                params["dec_b"], enc_finals)
        return dec_seq @ params["proj_w"] + params["proj_b"]


if __name__ == "__main__":
    # Small shapes consistent with the module's forward (batch dim is 1 in the model).
    nwords_src, nwords_trg = 48, 64
    emb_size = hidden_size = 32
    nlayers = 2
    src_len, trg_len = 10, 8

    key = jax.random.PRNGKey(0)
    kp, ks, kt = jax.random.split(key, 3)
    params = init_params(kp, nwords_src, nwords_trg, emb_size, hidden_size, nlayers)
    src_words = jax.random.randint(ks, (src_len,), 0, nwords_src, dtype=jnp.int32)
    trg_words = jax.random.randint(kt, (trg_len,), 0, nwords_trg, dtype=jnp.int32)

    logits = enc_dec_forward(src_words, trg_words, params)
    jax.block_until_ready(logits)
    assert logits.shape == (trg_len, nwords_trg), logits.shape

    ref = reference_forward(src_words, trg_words, params)
    if not bool(jnp.allclose(logits, ref, atol=5e-3, rtol=5e-3)):
        raise AssertionError("Pallas kernel output mismatches JAX reference")

    print("KERNEL_OK")
</pallas_src>

<mosaic_0001>
module attributes {stable_mosaic.version = 11 : i64} {
  func.func @encdec_kernel(%arg0: memref<10x32xf32, #tpu.memory_space<vmem>>, %arg1: memref<8x32xf32, #tpu.memory_space<vmem>>, %arg2: memref<32x128xf32, #tpu.memory_space<vmem>>, %arg3: memref<2x32x256xf32, #tpu.memory_space<vmem>>, %arg4: memref<2x1x128xf32, #tpu.memory_space<vmem>>, %arg5: memref<32x128xf32, #tpu.memory_space<vmem>>, %arg6: memref<2x32x256xf32, #tpu.memory_space<vmem>>, %arg7: memref<2x1x128xf32, #tpu.memory_space<vmem>>, %arg8: memref<32x128xf32, #tpu.memory_space<vmem>>, %arg9: memref<1x128xf32, #tpu.memory_space<vmem>>, %arg10: memref<8x128xf32, #tpu.memory_space<vmem>>, %arg11: memref<10x128xf32, #tpu.memory_space<vmem>>, %arg12: memref<8x128xf32, #tpu.memory_space<vmem>>, %arg13: memref<8x32xf32, #tpu.memory_space<vmem>>) attributes {dimension_semantics = [], scalar_prefetch = 0 : i64, scratch_operands = 3 : i64, tpu.core_type = #tpu.core_type<tc>} {
    %c0 = arith.constant 0 : index
    %c0_0 = arith.constant 0 : index
    %0 = vector.load %arg0[%c0, %c0_0] : memref<10x32xf32, #tpu.memory_space<vmem>>, vector<10x32xf32>
    %c0_1 = arith.constant 0 : index
    %c0_2 = arith.constant 0 : index
    %1 = vector.load %arg2[%c0_1, %c0_2] : memref<32x128xf32, #tpu.memory_space<vmem>>, vector<32x128xf32>
    %cst = arith.constant dense<0.000000e+00> : vector<10x128xf32>
    %2 = tpu.matmul %0, %1, %cst {dimension_numbers = #tpu.dot_dimension_numbers<[1], [0], [0], [1], [0, 0, 1, 1], [], []>} : vector<10x32xf32>, vector<32x128xf32>, vector<10x128xf32> -> vector<10x128xf32>
    %c0_3 = arith.constant 0 : index
    %c0_4 = arith.constant 0 : index
    %c0_5 = arith.constant 0 : index
    %3 = vector.load %arg4[%c0_3, %c0_4, %c0_5] : memref<2x1x128xf32, #tpu.memory_space<vmem>>, vector<1x1x128xf32>
    %4 = vector.shape_cast %3 : vector<1x1x128xf32> to vector<1x128xf32>
    %5 = vector.broadcast %4 : vector<1x128xf32> to vector<10x128xf32>
    %6 = arith.addf %2, %5 : vector<10x128xf32>
    %c0_6 = arith.constant 0 : index
    %c0_7 = arith.constant 0 : index
    %7 = vector.load %arg11[%c0_6, %c0_7] : memref<10x128xf32, #tpu.memory_space<vmem>>, vector<10x128xf32>
    tpu.vector_store %arg11[%c0_6, %c0_7], %6 {strides = array<i32>} : memref<10x128xf32, #tpu.memory_space<vmem>>, vector<10x128xf32>,
    %c0_8 = arith.constant 0 : index
    %c0_9 = arith.constant 0 : index
    %8 = vector.load %arg1[%c0_8, %c0_9] : memref<8x32xf32, #tpu.memory_space<vmem>>, vector<8x32xf32>
    %c0_10 = arith.constant 0 : index
    %c0_11 = arith.constant 0 : index
    %9 = vector.load %arg5[%c0_10, %c0_11] : memref<32x128xf32, #tpu.memory_space<vmem>>, vector<32x128xf32>
    %cst_12 = arith.constant dense<0.000000e+00> : vector<8x128xf32>
    %10 = tpu.matmul %8, %9, %cst_12 {dimension_numbers = #tpu.dot_dimension_numbers<[1], [0], [0], [1], [0, 0, 1, 1], [], []>} : vector<8x32xf32>, vector<32x128xf32>, vector<8x128xf32> -> vector<8x128xf32>
    %c0_13 = arith.constant 0 : index
    %c0_14 = arith.constant 0 : index
    %c0_15 = arith.constant 0 : index
    %11 = vector.load %arg7[%c0_13, %c0_14, %c0_15] : memref<2x1x128xf32, #tpu.memory_space<vmem>>, vector<1x1x128xf32>
    %12 = vector.shape_cast %11 : vector<1x1x128xf32> to vector<1x128xf32>
    %13 = vector.broadcast %12 : vector<1x128xf32> to vector<8x128xf32>
    %14 = arith.addf %10, %13 : vector<8x128xf32>
    %c0_16 = arith.constant 0 : index
    %c0_17 = arith.constant 0 : index
    %15 = vector.load %arg12[%c0_16, %c0_17] : memref<8x128xf32, #tpu.memory_space<vmem>>, vector<8x128xf32>
    tpu.vector_store %arg12[%c0_16, %c0_17], %14 {strides = array<i32>} : memref<8x128xf32, #tpu.memory_space<vmem>>, vector<8x128xf32>,
    %cst_18 = arith.constant 0.000000e+00 : f32
    %16 = vector.broadcast %cst_18 : f32 to vector<1x32xf32>
    %c1 = arith.constant 1 : index
    %c0_19 = arith.constant 0 : index
    %c0_20 = arith.constant 0 : index
    %17 = vector.load %arg4[%c1, %c0_19, %c0_20] : memref<2x1x128xf32, #tpu.memory_space<vmem>>, vector<1x1x128xf32>
    %18 = vector.shape_cast %17 : vector<1x1x128xf32> to vector<1x128xf32>
    %c0_21 = arith.constant 0 : index
    %c0_22 = arith.constant 0 : index
    %c0_23 = arith.constant 0 : index
    %19 = vector.load %arg3[%c0_21, %c0_22, %c0_23] : memref<2x32x256xf32, #tpu.memory_space<vmem>>, vector<1x32x256xf32>
    %20 = vector.shape_cast %19 : vector<1x32x256xf32> to vector<32x256xf32>
    %cst_24 = arith.constant dense<0.000000e+00> : vector<1x256xf32>
    %21 = tpu.matmul %16, %20, %cst_24 {dimension_numbers = #tpu.dot_dimension_numbers<[1], [0], [0], [1], [0, 0, 1, 1], [], []>} : vector<1x32xf32>, vector<32x256xf32>, vector<1x256xf32> -> vector<1x256xf32>
    %c1_25 = arith.constant 1 : index
    %c0_26 = arith.constant 0 : index
    %c0_27 = arith.constant 0 : index
    %22 = vector.load %arg3[%c1_25, %c0_26, %c0_27] : memref<2x32x256xf32, #tpu.memory_space<vmem>>, vector<1x32x256xf32>
    %23 = vector.shape_cast %22 : vector<1x32x256xf32> to vector<32x256xf32>
    %cst_28 = arith.constant dense<0.000000e+00> : vector<1x256xf32>
    %24 = tpu.matmul %16, %23, %cst_28 {dimension_numbers = #tpu.dot_dimension_numbers<[1], [0], [0], [1], [0, 0, 1, 1], [], []>} : vector<1x32xf32>, vector<32x256xf32>, vector<1x256xf32> -> vector<1x256xf32>
    %25 = arith.addf %21, %24 : vector<1x256xf32>
    %26 = vector.extract_strided_slice %25 {offsets = [0, 0], sizes = [1, 128], strides = [1, 1]} : vector<1x256xf32> to vector<1x128xf32>
    %c0_29 = arith.constant 0 : index
    %c0_30 = arith.constant 0 : index
    %27 = vector.load %arg11[%c0_29, %c0_30] : memref<10x128xf32, #tpu.memory_space<vmem>>, vector<1x128xf32>
    %28 = arith.addf %26, %27 : vector<1x128xf32>
    %29 = arith.negf %28 : vector<1x128xf32>
    %30 = math.exp %29 : vector<1x128xf32>
    %cst_31 = arith.constant 1.000000e+00 : f32
    %31 = vector.broadcast %cst_31 : f32 to vector<1x128xf32>
    %32 = arith.addf %31, %30 : vector<1x128xf32>
    %33 = arith.divf %31, %32 : vector<1x128xf32>
    %34 = math.tanh %28 : vector<1x128xf32>
    %35 = vector.extract_strided_slice %33 {offsets = [0, 0], sizes = [1, 32], strides = [1, 1]} : vector<1x128xf32> to vector<1x32xf32>
    %36 = vector.extract_strided_slice %33 {offsets = [0, 32], sizes = [1, 32], strides = [1, 1]} : vector<1x128xf32> to vector<1x32xf32>
    %37 = vector.extract_strided_slice %34 {offsets = [0, 64], sizes = [1, 32], strides = [1, 1]} : vector<1x128xf32> to vector<1x32xf32>
    %38 = vector.extract_strided_slice %33 {offsets = [0, 96], sizes = [1, 32], strides = [1, 1]} : vector<1x128xf32> to vector<1x32xf32>
    %39 = arith.mulf %36, %16 : vector<1x32xf32>
    %40 = arith.mulf %35, %37 : vector<1x32xf32>
    %41 = arith.addf %39, %40 : vector<1x32xf32>
    %42 = math.tanh %41 : vector<1x32xf32>
    %43 = arith.mulf %38, %42 : vector<1x32xf32>
    %c0_32 = arith.constant 0 : index
    %c0_33 = arith.constant 0 : index
    %c0_34 = arith.constant 0 : index
    %44 = vector.load %arg3[%c0_32, %c0_33, %c0_34] : memref<2x32x256xf32, #tpu.memory_space<vmem>>, vector<1x32x256xf32>
    %45 = vector.shape_cast %44 : vector<1x32x256xf32> to vector<32x256xf32>
    %cst_35 = arith.constant dense<0.000000e+00> : vector<1x256xf32>
    %46 = tpu.matmul %43, %45, %cst_35 {dimension_numbers = #tpu.dot_dimension_numbers<[1], [0], [0], [1], [0, 0, 1, 1], [], []>} : vector<1x32xf32>, vector<32x256xf32>, vector<1x256xf32> -> vector<1x256xf32>
    %c1_36 = arith.constant 1 : index
    %c0_37 = arith.constant 0 : index
    %c0_38 = arith.constant 0 : index
    %47 = vector.load %arg3[%c1_36, %c0_37, %c0_38] : memref<2x32x256xf32, #tpu.memory_space<vmem>>, vector<1x32x256xf32>
    %48 = vector.shape_cast %47 : vector<1x32x256xf32> to vector<32x256xf32>
    %cst_39 = arith.constant dense<0.000000e+00> : vector<1x256xf32>
    %49 = tpu.matmul %16, %48, %cst_39 {dimension_numbers = #tpu.dot_dimension_numbers<[1], [0], [0], [1], [0, 0, 1, 1], [], []>} : vector<1x32xf32>, vector<32x256xf32>, vector<1x256xf32> -> vector<1x256xf32>
    %50 = arith.addf %46, %49 : vector<1x256xf32>
    %51 = vector.extract_strided_slice %50 {offsets = [0, 0], sizes = [1, 128], strides = [1, 1]} : vector<1x256xf32> to vector<1x128xf32>
    %c1_40 = arith.constant 1 : index
    %c0_41 = arith.constant 0 : index
    %52 = vector.load %arg11[%c1_40, %c0_41] : memref<10x128xf32, #tpu.memory_space<vmem>>, vector<1x128xf32>
    %53 = arith.addf %51, %52 : vector<1x128xf32>
    %54 = arith.negf %53 : vector<1x128xf32>
    %55 = math.exp %54 : vector<1x128xf32>
    %cst_42 = arith.constant 1.000000e+00 : f32
    %56 = vector.broadcast %cst_42 : f32 to vector<1x128xf32>
    %57 = arith.addf %56, %55 : vector<1x128xf32>
    %58 = arith.divf %56, %57 : vector<1x128xf32>
    %59 = math.tanh %53 : vector<1x128xf32>
    %60 = vector.extract_strided_slice %58 {offsets = [0, 0], sizes = [1, 32], strides = [1, 1]} : vector<1x128xf32> to vector<1x32xf32>
    %61 = vector.extract_strided_slice %58 {offsets = [0, 32], sizes = [1, 32], strides = [1, 1]} : vector<1x128xf32> to vector<1x32xf32>
    %62 = vector.extract_strided_slice %59 {offsets = [0, 64], sizes = [1, 32], strides = [1, 1]} : vector<1x128xf32> to vector<1x32xf32>
    %63 = vector.extract_strided_slice %58 {offsets = [0, 96], sizes = [1, 32], strides = [1, 1]} : vector<1x128xf32> to vector<1x32xf32>
    %64 = arith.mulf %61, %41 : vector<1x32xf32>
    %65 = arith.mulf %60, %62 : vector<1x32xf32>
    %66 = arith.addf %64, %65 : vector<1x32xf32>
    %67 = math.tanh %66 : vector<1x32xf32>
    %68 = arith.mulf %63, %67 : vector<1x32xf32>
    %69 = vector.extract_strided_slice %50 {offsets = [0, 128], sizes = [1, 128], strides = [1, 1]} : vector<1x256xf32> to vector<1x128xf32>
    %70 = arith.addf %69, %18 : vector<1x128xf32>
    %71 = arith.negf %70 : vector<1x128xf32>
    %72 = math.exp %71 : vector<1x128xf32>
    %cst_43 = arith.constant 1.000000e+00 : f32
    %73 = vector.broadcast %cst_43 : f32 to vector<1x128xf32>
    %74 = arith.addf %73, %72 : vector<1x128xf32>
    %75 = arith.divf %73, %74 : vector<1x128xf32>
    %76 = math.tanh %70 : vector<1x128xf32>
    %77 = vector.extract_strided_slice %75 {offsets = [0, 0], sizes = [1, 32], strides = [1, 1]} : vector<1x128xf32> to vector<1x32xf32>
    %78 = vector.extract_strided_slice %75 {offsets = [0, 32], sizes = [1, 32], strides = [1, 1]} : vector<1x128xf32> to vector<1x32xf32>
    %79 = vector.extract_strided_slice %76 {offsets = [0, 64], sizes = [1, 32], strides = [1, 1]} : vector<1x128xf32> to vector<1x32xf32>
    %80 = vector.extract_strided_slice %75 {offsets = [0, 96], sizes = [1, 32], strides = [1, 1]} : vector<1x128xf32> to vector<1x32xf32>
    %81 = arith.mulf %78, %16 : vector<1x32xf32>
    %82 = arith.mulf %77, %79 : vector<1x32xf32>
    %83 = arith.addf %81, %82 : vector<1x32xf32>
    %84 = math.tanh %83 : vector<1x32xf32>
    %85 = arith.mulf %80, %84 : vector<1x32xf32>
    %c0_44 = arith.constant 0 : index
    %c0_45 = arith.constant 0 : index
    %c0_46 = arith.constant 0 : index
    %86 = vector.load %arg3[%c0_44, %c0_45, %c0_46] : memref<2x32x256xf32, #tpu.memory_space<vmem>>, vector<1x32x256xf32>
    %87 = vector.shape_cast %86 : vector<1x32x256xf32> to vector<32x256xf32>
    %cst_47 = arith.constant dense<0.000000e+00> : vector<1x256xf32>
    %88 = tpu.matmul %68, %87, %cst_47 {dimension_numbers = #tpu.dot_dimension_numbers<[1], [0], [0], [1], [0, 0, 1, 1], [], []>} : vector<1x32xf32>, vector<32x256xf32>, vector<1x256xf32> -> vector<1x256xf32>
    %c1_48 = arith.constant 1 : index
    %c0_49 = arith.constant 0 : index
    %c0_50 = arith.constant 0 : index
    %89 = vector.load %arg3[%c1_48, %c0_49, %c0_50] : memref<2x32x256xf32, #tpu.memory_space<vmem>>, vector<1x32x256xf32>
    %90 = vector.shape_cast %89 : vector<1x32x256xf32> to vector<32x256xf32>
    %cst_51 = arith.constant dense<0.000000e+00> : vector<1x256xf32>
    %91 = tpu.matmul %85, %90, %cst_51 {dimension_numbers = #tpu.dot_dimension_numbers<[1], [0], [0], [1], [0, 0, 1, 1], [], []>} : vector<1x32xf32>, vector<32x256xf32>, vector<1x256xf32> -> vector<1x256xf32>
    %92 = arith.addf %88, %91 : vector<1x256xf32>
    %93 = vector.extract_strided_slice %92 {offsets = [0, 0], sizes = [1, 128], strides = [1, 1]} : vector<1x256xf32> to vector<1x128xf32>
    %c2 = arith.constant 2 : index
    %c0_52 = arith.constant 0 : index
    %94 = vector.load %arg11[%c2, %c0_52] : memref<10x128xf32, #tpu.memory_space<vmem>>, vector<1x128xf32>
    %95 = arith.addf %93, %94 : vector<1x128xf32>
    %96 = arith.negf %95 : vector<1x128xf32>
    %97 = math.exp %96 : vector<1x128xf32>
    %cst_53 = arith.constant 1.000000e+00 : f32
    %98 = vector.broadcast %cst_53 : f32 to vector<1x128xf32>
    %99 = arith.addf %98, %97 : vector<1x128xf32>
    %100 = arith.divf %98, %99 : vector<1x128xf32>
    %101 = math.tanh %95 : vector<1x128xf32>
    %102 = vector.extract_strided_slice %100 {offsets = [0, 0], sizes = [1, 32], strides = [1, 1]} : vector<1x128xf32> to vector<1x32xf32>
    %103 = vector.extract_strided_slice %100 {offsets = [0, 32], sizes = [1, 32], strides = [1, 1]} : vector<1x128xf32> to vector<1x32xf32>
    %104 = vector.extract_strided_slice %101 {offsets = [0, 64], sizes = [1, 32], strides = [1, 1]} : vector<1x128xf32> to vector<1x32xf32>
    %105 = vector.extract_strided_slice %100 {offsets = [0, 96], sizes = [1, 32], strides = [1, 1]} : vector<1x128xf32> to vector<1x32xf32>
    %106 = arith.mulf %103, %66 : vector<1x32xf32>
    %107 = arith.mulf %102, %104 : vector<1x32xf32>
    %108 = arith.addf %106, %107 : vector<1x32xf32>
    %109 = math.tanh %108 : vector<1x32xf32>
    %110 = arith.mulf %105, %109 : vector<1x32xf32>
    %111 = vector.extract_strided_slice %92 {offsets = [0, 128], sizes = [1, 128], strides = [1, 1]} : vector<1x256xf32> to vector<1x128xf32>
    %112 = arith.addf %111, %18 : vector<1x128xf32>
    %113 = arith.negf %112 : vector<1x128xf32>
    %114 = math.exp %113 : vector<1x128xf32>
    %cst_54 = arith.constant 1.000000e+00 : f32
    %115 = vector.broadcast %cst_54 : f32 to vector<1x128xf32>
    %116 = arith.addf %115, %114 : vector<1x128xf32>
    %117 = arith.divf %115, %116 : vector<1x128xf32>
    %118 = math.tanh %112 : vector<1x128xf32>
    %119 = vector.extract_strided_slice %117 {offsets = [0, 0], sizes = [1, 32], strides = [1, 1]} : vector<1x128xf32> to vector<1x32xf32>
    %120 = vector.extract_strided_slice %117 {offsets = [0, 32], sizes = [1, 32], strides = [1, 1]} : vector<1x128xf32> to vector<1x32xf32>
    %121 = vector.extract_strided_slice %118 {offsets = [0, 64], sizes = [1, 32], strides = [1, 1]} : vector<1x128xf32> to vector<1x32xf32>
    %122 = vector.extract_strided_slice %117 {offsets = [0, 96], sizes = [1, 32], strides = [1, 1]} : vector<1x128xf32> to vector<1x32xf32>
    %123 = arith.mulf %120, %83 : vector<1x32xf32>
    %124 = arith.mulf %119, %121 : vector<1x32xf32>
    %125 = arith.addf %123, %124 : vector<1x32xf32>
    %126 = math.tanh %125 : vector<1x32xf32>
    %127 = arith.mulf %122, %126 : vector<1x32xf32>
    %c0_55 = arith.constant 0 : index
    %c0_56 = arith.constant 0 : index
    %c0_57 = arith.constant 0 : index
    %128 = vector.load %arg3[%c0_55, %c0_56, %c0_57] : memref<2x32x256xf32, #tpu.memory_space<vmem>>, vector<1x32x256xf32>
    %129 = vector.shape_cast %128 : vector<1x32x256xf32> to vector<32x256xf32>
    %cst_58 = arith.constant dense<0.000000e+00> : vector<1x256xf32>
    %130 = tpu.matmul %110, %129, %cst_58 {dimension_numbers = #tpu.dot_dimension_numbers<[1], [0], [0], [1], [0, 0, 1, 1], [], []>} : vector<1x32xf32>, vector<32x256xf32>, vector<1x256xf32> -> vector<1x256xf32>
    %c1_59 = arith.constant 1 : index
    %c0_60 = arith.constant 0 : index
    %c0_61 = arith.constant 0 : index
    %131 = vector.load %arg3[%c1_59, %c0_60, %c0_61] : memref<2x32x256xf32, #tpu.memory_space<vmem>>, vector<1x32x256xf32>
    %132 = vector.shape_cast %131 : vector<1x32x256xf32> to vector<32x256xf32>
    %cst_62 = arith.constant dense<0.000000e+00> : vector<1x256xf32>
    %133 = tpu.matmul %127, %132, %cst_62 {dimension_numbers = #tpu.dot_dimension_numbers<[1], [0], [0], [1], [0, 0, 1, 1], [], []>} : vector<1x32xf32>, vector<32x256xf32>, vector<1x256xf32> -> vector<1x256xf32>
    %134 = arith.addf %130, %133 : vector<1x256xf32>
    %135 = vector.extract_strided_slice %134 {offsets = [0, 0], sizes = [1, 128], strides = [1, 1]} : vector<1x256xf32> to vector<1x128xf32>
    %c3 = arith.constant 3 : index
    %c0_63 = arith.constant 0 : index
    %136 = vector.load %arg11[%c3, %c0_63] : memref<10x128xf32, #tpu.memory_space<vmem>>, vector<1x128xf32>
    %137 = arith.addf %135, %136 : vector<1x128xf32>
    %138 = arith.negf %137 : vector<1x128xf32>
    %139 = math.exp %138 : vector<1x128xf32>
    %cst_64 = arith.constant 1.000000e+00 : f32
    %140 = vector.broadcast %cst_64 : f32 to vector<1x128xf32>
    %141 = arith.addf %140, %139 : vector<1x128xf32>
    %142 = arith.divf %140, %141 : vector<1x128xf32>
    %143 = math.tanh %137 : vector<1x128xf32>
    %144 = vector.extract_strided_slice %142 {offsets = [0, 0], sizes = [1, 32], strides = [1, 1]} : vector<1x128xf32> to vector<1x32xf32>
    %145 = vector.extract_strided_slice %142 {offsets = [0, 32], sizes = [1, 32], strides = [1, 1]} : vector<1x128xf32> to vector<1x32xf32>
    %146 = vector.extract_strided_slice %143 {offsets = [0, 64], sizes = [1, 32], strides = [1, 1]} : vector<1x128xf32> to vector<1x32xf32>
    %147 = vector.extract_strided_slice %142 {offsets = [0, 96], sizes = [1, 32], strides = [1, 1]} : vector<1x128xf32> to vector<1x32xf32>
    %148 = arith.mulf %145, %108 : vector<1x32xf32>
    %149 = arith.mulf %144, %146 : vector<1x32xf32>
    %150 = arith.addf %148, %149 : vector<1x32xf32>
    %151 = math.tanh %150 : vector<1x32xf32>
    %152 = arith.mulf %147, %151 : vector<1x32xf32>
    %153 = vector.extract_strided_slice %134 {offsets = [0, 128], sizes = [1, 128], strides = [1, 1]} : vector<1x256xf32> to vector<1x128xf32>
    %154 = arith.addf %153, %18 : vector<1x128xf32>
    %155 = arith.negf %154 : vector<1x128xf32>
    %156 = math.exp %155 : vector<1x128xf32>
    %cst_65 = arith.constant 1.000000e+00 : f32
    %157 = vector.broadcast %cst_65 : f32 to vector<1x128xf32>
    %158 = arith.addf %157, %156 : vector<1x128xf32>
    %159 = arith.divf %157, %158 : vector<1x128xf32>
    %160 = math.tanh %154 : vector<1x128xf32>
    %161 = vector.extract_strided_slice %159 {offsets = [0, 0], sizes = [1, 32], strides = [1, 1]} : vector<1x128xf32> to vector<1x32xf32>
    %162 = vector.extract_strided_slice %159 {offsets = [0, 32], sizes = [1, 32], strides = [1, 1]} : vector<1x128xf32> to vector<1x32xf32>
    %163 = vector.extract_strided_slice %160 {offsets = [0, 64], sizes = [1, 32], strides = [1, 1]} : vector<1x128xf32> to vector<1x32xf32>
    %164 = vector.extract_strided_slice %159 {offsets = [0, 96], sizes = [1, 32], strides = [1, 1]} : vector<1x128xf32> to vector<1x32xf32>
    %165 = arith.mulf %162, %125 : vector<1x32xf32>
    %166 = arith.mulf %161, %163 : vector<1x32xf32>
    %167 = arith.addf %165, %166 : vector<1x32xf32>
    %168 = math.tanh %167 : vector<1x32xf32>
    %169 = arith.mulf %164, %168 : vector<1x32xf32>
    %c0_66 = arith.constant 0 : index
    %c0_67 = arith.constant 0 : index
    %c0_68 = arith.constant 0 : index
    %170 = vector.load %arg3[%c0_66, %c0_67, %c0_68] : memref<2x32x256xf32, #tpu.memory_space<vmem>>, vector<1x32x256xf32>
    %171 = vector.shape_cast %170 : vector<1x32x256xf32> to vector<32x256xf32>
    %cst_69 = arith.constant dense<0.000000e+00> : vector<1x256xf32>
    %172 = tpu.matmul %152, %171, %cst_69 {dimension_numbers = #tpu.dot_dimension_numbers<[1], [0], [0], [1], [0, 0, 1, 1], [], []>} : vector<1x32xf32>, vector<32x256xf32>, vector<1x256xf32> -> vector<1x256xf32>
    %c1_70 = arith.constant 1 : index
    %c0_71 = arith.constant 0 : index
    %c0_72 = arith.constant 0 : index
    %173 = vector.load %arg3[%c1_70, %c0_71, %c0_72] : memref<2x32x256xf32, #tpu.memory_space<vmem>>, vector<1x32x256xf32>
    %174 = vector.shape_cast %173 : vector<1x32x256xf32> to vector<32x256xf32>
    %cst_73 = arith.constant dense<0.000000e+00> : vector<1x256xf32>
    %175 = tpu.matmul %169, %174, %cst_73 {dimension_numbers = #tpu.dot_dimension_numbers<[1], [0], [0], [1], [0, 0, 1, 1], [], []>} : vector<1x32xf32>, vector<32x256xf32>, vector<1x256xf32> -> vector<1x256xf32>
    %176 = arith.addf %172, %175 : vector<1x256xf32>
    %177 = vector.extract_strided_slice %176 {offsets = [0, 0], sizes = [1, 128], strides = [1, 1]} : vector<1x256xf32> to vector<1x128xf32>
    %c4 = arith.constant 4 : index
    %c0_74 = arith.constant 0 : index
    %178 = vector.load %arg11[%c4, %c0_74] : memref<10x128xf32, #tpu.memory_space<vmem>>, vector<1x128xf32>
    %179 = arith.addf %177, %178 : vector<1x128xf32>
    %180 = arith.negf %179 : vector<1x128xf32>
    %181 = math.exp %180 : vector<1x128xf32>
    %cst_75 = arith.constant 1.000000e+00 : f32
    %182 = vector.broadcast %cst_75 : f32 to vector<1x128xf32>
    %183 = arith.addf %182, %181 : vector<1x128xf32>
    %184 = arith.divf %182, %183 : vector<1x128xf32>
    %185 = math.tanh %179 : vector<1x128xf32>
    %186 = vector.extract_strided_slice %184 {offsets = [0, 0], sizes = [1, 32], strides = [1, 1]} : vector<1x128xf32> to vector<1x32xf32>
    %187 = vector.extract_strided_slice %184 {offsets = [0, 32], sizes = [1, 32], strides = [1, 1]} : vector<1x128xf32> to vector<1x32xf32>
    %188 = vector.extract_strided_slice %185 {offsets = [0, 64], sizes = [1, 32], strides = [1, 1]} : vector<1x128xf32> to vector<1x32xf32>
    %189 = vector.extract_strided_slice %184 {offsets = [0, 96], sizes = [1, 32], strides = [1, 1]} : vector<1x128xf32> to vector<1x32xf32>
    %190 = arith.mulf %187, %150 : vector<1x32xf32>
    %191 = arith.mulf %186, %188 : vector<1x32xf32>
    %192 = arith.addf %190, %191 : vector<1x32xf32>
    %193 = math.tanh %192 : vector<1x32xf32>
    %194 = arith.mulf %189, %193 : vector<1x32xf32>
    %195 = vector.extract_strided_slice %176 {offsets = [0, 128], sizes = [1, 128], strides = [1, 1]} : vector<1x256xf32> to vector<1x128xf32>
    %196 = arith.addf %195, %18 : vector<1x128xf32>
    %197 = arith.negf %196 : vector<1x128xf32>
    %198 = math.exp %197 : vector<1x128xf32>
    %cst_76 = arith.constant 1.000000e+00 : f32
    %199 = vector.broadcast %cst_76 : f32 to vector<1x128xf32>
    %200 = arith.addf %199, %198 : vector<1x128xf32>
    %201 = arith.divf %199, %200 : vector<1x128xf32>
    %202 = math.tanh %196 : vector<1x128xf32>
    %203 = vector.extract_strided_slice %201 {offsets = [0, 0], sizes = [1, 32], strides = [1, 1]} : vector<1x128xf32> to vector<1x32xf32>
    %204 = vector.extract_strided_slice %201 {offsets = [0, 32], sizes = [1, 32], strides = [1, 1]} : vector<1x128xf32> to vector<1x32xf32>
    %205 = vector.extract_strided_slice %202 {offsets = [0, 64], sizes = [1, 32], strides = [1, 1]} : vector<1x128xf32> to vector<1x32xf32>
    %206 = vector.extract_strided_slice %201 {offsets = [0, 96], sizes = [1, 32], strides = [1, 1]} : vector<1x128xf32> to vector<1x32xf32>
    %207 = arith.mulf %204, %167 : vector<1x32xf32>
    %208 = arith.mulf %203, %205 : vector<1x32xf32>
    %209 = arith.addf %207, %208 : vector<1x32xf32>
    %210 = math.tanh %209 : vector<1x32xf32>
    %211 = arith.mulf %206, %210 : vector<1x32xf32>
    %c0_77 = arith.constant 0 : index
    %c0_78 = arith.constant 0 : index
    %c0_79 = arith.constant 0 : index
    %212 = vector.load %arg3[%c0_77, %c0_78, %c0_79] : memref<2x32x256xf32, #tpu.memory_space<vmem>>, vector<1x32x256xf32>
    %213 = vector.shape_cast %212 : vector<1x32x256xf32> to vector<32x256xf32>
    %cst_80 = arith.constant dense<0.000000e+00> : vector<1x256xf32>
    %214 = tpu.matmul %194, %213, %cst_80 {dimension_numbers = #tpu.dot_dimension_numbers<[1], [0], [0], [1], [0, 0, 1, 1], [], []>} : vector<1x32xf32>, vector<32x256xf32>, vector<1x256xf32> -> vector<1x256xf32>
    %c1_81 = arith.constant 1 : index
    %c0_82 = arith.constant 0 : index
    %c0_83 = arith.constant 0 : index
    %215 = vector.load %arg3[%c1_81, %c0_82, %c0_83] : memref<2x32x256xf32, #tpu.memory_space<vmem>>, vector<1x32x256xf32>
    %216 = vector.shape_cast %215 : vector<1x32x256xf32> to vector<32x256xf32>
    %cst_84 = arith.constant dense<0.000000e+00> : vector<1x256xf32>
    %217 = tpu.matmul %211, %216, %cst_84 {dimension_numbers = #tpu.dot_dimension_numbers<[1], [0], [0], [1], [0, 0, 1, 1], [], []>} : vector<1x32xf32>, vector<32x256xf32>, vector<1x256xf32> -> vector<1x256xf32>
    %218 = arith.addf %214, %217 : vector<1x256xf32>
    %219 = vector.extract_strided_slice %218 {offsets = [0, 0], sizes = [1, 128], strides = [1, 1]} : vector<1x256xf32> to vector<1x128xf32>
    %c5 = arith.constant 5 : index
    %c0_85 = arith.constant 0 : index
    %220 = vector.load %arg11[%c5, %c0_85] : memref<10x128xf32, #tpu.memory_space<vmem>>, vector<1x128xf32>
    %221 = arith.addf %219, %220 : vector<1x128xf32>
    %222 = arith.negf %221 : vector<1x128xf32>
    %223 = math.exp %222 : vector<1x128xf32>
    %cst_86 = arith.constant 1.000000e+00 : f32
    %224 = vector.broadcast %cst_86 : f32 to vector<1x128xf32>
    %225 = arith.addf %224, %223 : vector<1x128xf32>
    %226 = arith.divf %224, %225 : vector<1x128xf32>
    %227 = math.tanh %221 : vector<1x128xf32>
    %228 = vector.extract_strided_slice %226 {offsets = [0, 0], sizes = [1, 32], strides = [1, 1]} : vector<1x128xf32> to vector<1x32xf32>
    %229 = vector.extract_strided_slice %226 {offsets = [0, 32], sizes = [1, 32], strides = [1, 1]} : vector<1x128xf32> to vector<1x32xf32>
    %230 = vector.extract_strided_slice %227 {offsets = [0, 64], sizes = [1, 32], strides = [1, 1]} : vector<1x128xf32> to vector<1x32xf32>
    %231 = vector.extract_strided_slice %226 {offsets = [0, 96], sizes = [1, 32], strides = [1, 1]} : vector<1x128xf32> to vector<1x32xf32>
    %232 = arith.mulf %229, %192 : vector<1x32xf32>
    %233 = arith.mulf %228, %230 : vector<1x32xf32>
    %234 = arith.addf %232, %233 : vector<1x32xf32>
    %235 = math.tanh %234 : vector<1x32xf32>
    %236 = arith.mulf %231, %235 : vector<1x32xf32>
    %237 = vector.extract_strided_slice %218 {offsets = [0, 128], sizes = [1, 128], strides = [1, 1]} : vector<1x256xf32> to vector<1x128xf32>
    %238 = arith.addf %237, %18 : vector<1x128xf32>
    %239 = arith.negf %238 : vector<1x128xf32>
    %240 = math.exp %239 : vector<1x128xf32>
    %cst_87 = arith.constant 1.000000e+00 : f32
    %241 = vector.broadcast %cst_87 : f32 to vector<1x128xf32>
    %242 = arith.addf %241, %240 : vector<1x128xf32>
    %243 = arith.divf %241, %242 : vector<1x128xf32>
    %244 = math.tanh %238 : vector<1x128xf32>
    %245 = vector.extract_strided_slice %243 {offsets = [0, 0], sizes = [1, 32], strides = [1, 1]} : vector<1x128xf32> to vector<1x32xf32>
    %246 = vector.extract_strided_slice %243 {offsets = [0, 32], sizes = [1, 32], strides = [1, 1]} : vector<1x128xf32> to vector<1x32xf32>
    %247 = vector.extract_strided_slice %244 {offsets = [0, 64], sizes = [1, 32], strides = [1, 1]} : vector<1x128xf32> to vector<1x32xf32>
    %248 = vector.extract_strided_slice %243 {offsets = [0, 96], sizes = [1, 32], strides = [1, 1]} : vector<1x128xf32> to vector<1x32xf32>
    %249 = arith.mulf %246, %209 : vector<1x32xf32>
    %250 = arith.mulf %245, %247 : vector<1x32xf32>
    %251 = arith.addf %249, %250 : vector<1x32xf32>
    %252 = math.tanh %251 : vector<1x32xf32>
    %253 = arith.mulf %248, %252 : vector<1x32xf32>
    %c0_88 = arith.constant 0 : index
    %c0_89 = arith.constant 0 : index
    %c0_90 = arith.constant 0 : index
    %254 = vector.load %arg3[%c0_88, %c0_89, %c0_90] : memref<2x32x256xf32, #tpu.memory_space<vmem>>, vector<1x32x256xf32>
    %255 = vector.shape_cast %254 : vector<1x32x256xf32> to vector<32x256xf32>
    %cst_91 = arith.constant dense<0.000000e+00> : vector<1x256xf32>
    %256 = tpu.matmul %236, %255, %cst_91 {dimension_numbers = #tpu.dot_dimension_numbers<[1], [0], [0], [1], [0, 0, 1, 1], [], []>} : vector<1x32xf32>, vector<32x256xf32>, vector<1x256xf32> -> vector<1x256xf32>
    %c1_92 = arith.constant 1 : index
    %c0_93 = arith.constant 0 : index
    %c0_94 = arith.constant 0 : index
    %257 = vector.load %arg3[%c1_92, %c0_93, %c0_94] : memref<2x32x256xf32, #tpu.memory_space<vmem>>, vector<1x32x256xf32>
    %258 = vector.shape_cast %257 : vector<1x32x256xf32> to vector<32x256xf32>
    %cst_95 = arith.constant dense<0.000000e+00> : vector<1x256xf32>
    %259 = tpu.matmul %253, %258, %cst_95 {dimension_numbers = #tpu.dot_dimension_numbers<[1], [0], [0], [1], [0, 0, 1, 1], [], []>} : vector<1x32xf32>, vector<32x256xf32>, vector<1x256xf32> -> vector<1x256xf32>
    %260 = arith.addf %256, %259 : vector<1x256xf32>
    %261 = vector.extract_strided_slice %260 {offsets = [0, 0], sizes = [1, 128], strides = [1, 1]} : vector<1x256xf32> to vector<1x128xf32>
    %c6 = arith.constant 6 : index
    %c0_96 = arith.constant 0 : index
    %262 = vector.load %arg11[%c6, %c0_96] : memref<10x128xf32, #tpu.memory_space<vmem>>, vector<1x128xf32>
    %263 = arith.addf %261, %262 : vector<1x128xf32>
    %264 = arith.negf %263 : vector<1x128xf32>
    %265 = math.exp %264 : vector<1x128xf32>
    %cst_97 = arith.constant 1.000000e+00 : f32
    %266 = vector.broadcast %cst_97 : f32 to vector<1x128xf32>
    %267 = arith.addf %266, %265 : vector<1x128xf32>
    %268 = arith.divf %266, %267 : vector<1x128xf32>
    %269 = math.tanh %263 : vector<1x128xf32>
    %270 = vector.extract_strided_slice %268 {offsets = [0, 0], sizes = [1, 32], strides = [1, 1]} : vector<1x128xf32> to vector<1x32xf32>
    %271 = vector.extract_strided_slice %268 {offsets = [0, 32], sizes = [1, 32], strides = [1, 1]} : vector<1x128xf32> to vector<1x32xf32>
    %272 = vector.extract_strided_slice %269 {offsets = [0, 64], sizes = [1, 32], strides = [1, 1]} : vector<1x128xf32> to vector<1x32xf32>
    %273 = vector.extract_strided_slice %268 {offsets = [0, 96], sizes = [1, 32], strides = [1, 1]} : vector<1x128xf32> to vector<1x32xf32>
    %274 = arith.mulf %271, %234 : vector<1x32xf32>
    %275 = arith.mulf %270, %272 : vector<1x32xf32>
    %276 = arith.addf %274, %275 : vector<1x32xf32>
    %277 = math.tanh %276 : vector<1x32xf32>
    %278 = arith.mulf %273, %277 : vector<1x32xf32>
    %279 = vector.extract_strided_slice %260 {offsets = [0, 128], sizes = [1, 128], strides = [1, 1]} : vector<1x256xf32> to vector<1x128xf32>
    %280 = arith.addf %279, %18 : vector<1x128xf32>
    %281 = arith.negf %280 : vector<1x128xf32>
    %282 = math.exp %281 : vector<1x128xf32>
    %cst_98 = arith.constant 1.000000e+00 : f32
    %283 = vector.broadcast %cst_98 : f32 to vector<1x128xf32>
    %284 = arith.addf %283, %282 : vector<1x128xf32>
    %285 = arith.divf %283, %284 : vector<1x128xf32>
    %286 = math.tanh %280 : vector<1x128xf32>
    %287 = vector.extract_strided_slice %285 {offsets = [0, 0], sizes = [1, 32], strides = [1, 1]} : vector<1x128xf32> to vector<1x32xf32>
    %288 = vector.extract_strided_slice %285 {offsets = [0, 32], sizes = [1, 32], strides = [1, 1]} : vector<1x128xf32> to vector<1x32xf32>
    %289 = vector.extract_strided_slice %286 {offsets = [0, 64], sizes = [1, 32], strides = [1, 1]} : vector<1x128xf32> to vector<1x32xf32>
    %290 = vector.extract_strided_slice %285 {offsets = [0, 96], sizes = [1, 32], strides = [1, 1]} : vector<1x128xf32> to vector<1x32xf32>
    %291 = arith.mulf %288, %251 : vector<1x32xf32>
    %292 = arith.mulf %287, %289 : vector<1x32xf32>
    %293 = arith.addf %291, %292 : vector<1x32xf32>
    %294 = math.tanh %293 : vector<1x32xf32>
    %295 = arith.mulf %290, %294 : vector<1x32xf32>
    %c0_99 = arith.constant 0 : index
    %c0_100 = arith.constant 0 : index
    %c0_101 = arith.constant 0 : index
    %296 = vector.load %arg3[%c0_99, %c0_100, %c0_101] : memref<2x32x256xf32, #tpu.memory_space<vmem>>, vector<1x32x256xf32>
    %297 = vector.shape_cast %296 : vector<1x32x256xf32> to vector<32x256xf32>
    %cst_102 = arith.constant dense<0.000000e+00> : vector<1x256xf32>
    %298 = tpu.matmul %278, %297, %cst_102 {dimension_numbers = #tpu.dot_dimension_numbers<[1], [0], [0], [1], [0, 0, 1, 1], [], []>} : vector<1x32xf32>, vector<32x256xf32>, vector<1x256xf32> -> vector<1x256xf32>
    %c1_103 = arith.constant 1 : index
    %c0_104 = arith.constant 0 : index
    %c0_105 = arith.constant 0 : index
    %299 = vector.load %arg3[%c1_103, %c0_104, %c0_105] : memref<2x32x256xf32, #tpu.memory_space<vmem>>, vector<1x32x256xf32>
    %300 = vector.shape_cast %299 : vector<1x32x256xf32> to vector<32x256xf32>
    %cst_106 = arith.constant dense<0.000000e+00> : vector<1x256xf32>
    %301 = tpu.matmul %295, %300, %cst_106 {dimension_numbers = #tpu.dot_dimension_numbers<[1], [0], [0], [1], [0, 0, 1, 1], [], []>} : vector<1x32xf32>, vector<32x256xf32>, vector<1x256xf32> -> vector<1x256xf32>
    %302 = arith.addf %298, %301 : vector<1x256xf32>
    %303 = vector.extract_strided_slice %302 {offsets = [0, 0], sizes = [1, 128], strides = [1, 1]} : vector<1x256xf32> to vector<1x128xf32>
    %c7 = arith.constant 7 : index
    %c0_107 = arith.constant 0 : index
    %304 = vector.load %arg11[%c7, %c0_107] : memref<10x128xf32, #tpu.memory_space<vmem>>, vector<1x128xf32>
    %305 = arith.addf %303, %304 : vector<1x128xf32>
    %306 = arith.negf %305 : vector<1x128xf32>
    %307 = math.exp %306 : vector<1x128xf32>
    %cst_108 = arith.constant 1.000000e+00 : f32
    %308 = vector.broadcast %cst_108 : f32 to vector<1x128xf32>
    %309 = arith.addf %308, %307 : vector<1x128xf32>
    %310 = arith.divf %308, %309 : vector<1x128xf32>
    %311 = math.tanh %305 : vector<1x128xf32>
    %312 = vector.extract_strided_slice %310 {offsets = [0, 0], sizes = [1, 32], strides = [1, 1]} : vector<1x128xf32> to vector<1x32xf32>
    %313 = vector.extract_strided_slice %310 {offsets = [0, 32], sizes = [1, 32], strides = [1, 1]} : vector<1x128xf32> to vector<1x32xf32>
    %314 = vector.extract_strided_slice %311 {offsets = [0, 64], sizes = [1, 32], strides = [1, 1]} : vector<1x128xf32> to vector<1x32xf32>
    %315 = vector.extract_strided_slice %310 {offsets = [0, 96], sizes = [1, 32], strides = [1, 1]} : vector<1x128xf32> to vector<1x32xf32>
    %316 = arith.mulf %313, %276 : vector<1x32xf32>
    %317 = arith.mulf %312, %314 : vector<1x32xf32>
    %318 = arith.addf %316, %317 : vector<1x32xf32>
    %319 = math.tanh %318 : vector<1x32xf32>
    %320 = arith.mulf %315, %319 : vector<1x32xf32>
    %321 = vector.extract_strided_slice %302 {offsets = [0, 128], sizes = [1, 128], strides = [1, 1]} : vector<1x256xf32> to vector<1x128xf32>
    %322 = arith.addf %321, %18 : vector<1x128xf32>
    %323 = arith.negf %322 : vector<1x128xf32>
    %324 = math.exp %323 : vector<1x128xf32>
    %cst_109 = arith.constant 1.000000e+00 : f32
    %325 = vector.broadcast %cst_109 : f32 to vector<1x128xf32>
    %326 = arith.addf %325, %324 : vector<1x128xf32>
    %327 = arith.divf %325, %326 : vector<1x128xf32>
    %328 = math.tanh %322 : vector<1x128xf32>
    %329 = vector.extract_strided_slice %327 {offsets = [0, 0], sizes = [1, 32], strides = [1, 1]} : vector<1x128xf32> to vector<1x32xf32>
    %330 = vector.extract_strided_slice %327 {offsets = [0, 32], sizes = [1, 32], strides = [1, 1]} : vector<1x128xf32> to vector<1x32xf32>
    %331 = vector.extract_strided_slice %328 {offsets = [0, 64], sizes = [1, 32], strides = [1, 1]} : vector<1x128xf32> to vector<1x32xf32>
    %332 = vector.extract_strided_slice %327 {offsets = [0, 96], sizes = [1, 32], strides = [1, 1]} : vector<1x128xf32> to vector<1x32xf32>
    %333 = arith.mulf %330, %293 : vector<1x32xf32>
    %334 = arith.mulf %329, %331 : vector<1x32xf32>
    %335 = arith.addf %333, %334 : vector<1x32xf32>
    %336 = math.tanh %335 : vector<1x32xf32>
    %337 = arith.mulf %332, %336 : vector<1x32xf32>
    %c0_110 = arith.constant 0 : index
    %c0_111 = arith.constant 0 : index
    %c0_112 = arith.constant 0 : index
    %338 = vector.load %arg3[%c0_110, %c0_111, %c0_112] : memref<2x32x256xf32, #tpu.memory_space<vmem>>, vector<1x32x256xf32>
    %339 = vector.shape_cast %338 : vector<1x32x256xf32> to vector<32x256xf32>
    %cst_113 = arith.constant dense<0.000000e+00> : vector<1x256xf32>
    %340 = tpu.matmul %320, %339, %cst_113 {dimension_numbers = #tpu.dot_dimension_numbers<[1], [0], [0], [1], [0, 0, 1, 1], [], []>} : vector<1x32xf32>, vector<32x256xf32>, vector<1x256xf32> -> vector<1x256xf32>
    %c1_114 = arith.constant 1 : index
    %c0_115 = arith.constant 0 : index
    %c0_116 = arith.constant 0 : index
    %341 = vector.load %arg3[%c1_114, %c0_115, %c0_116] : memref<2x32x256xf32, #tpu.memory_space<vmem>>, vector<1x32x256xf32>
    %342 = vector.shape_cast %341 : vector<1x32x256xf32> to vector<32x256xf32>
    %cst_117 = arith.constant dense<0.000000e+00> : vector<1x256xf32>
    %343 = tpu.matmul %337, %342, %cst_117 {dimension_numbers = #tpu.dot_dimension_numbers<[1], [0], [0], [1], [0, 0, 1, 1], [], []>} : vector<1x32xf32>, vector<32x256xf32>, vector<1x256xf32> -> vector<1x256xf32>
    %344 = arith.addf %340, %343 : vector<1x256xf32>
    %345 = vector.extract_strided_slice %344 {offsets = [0, 0], sizes = [1, 128], strides = [1, 1]} : vector<1x256xf32> to vector<1x128xf32>
    %c8 = arith.constant 8 : index
    %c0_118 = arith.constant 0 : index
    %346 = vector.load %arg11[%c8, %c0_118] : memref<10x128xf32, #tpu.memory_space<vmem>>, vector<1x128xf32>
    %347 = arith.addf %345, %346 : vector<1x128xf32>
    %348 = arith.negf %347 : vector<1x128xf32>
    %349 = math.exp %348 : vector<1x128xf32>
    %cst_119 = arith.constant 1.000000e+00 : f32
    %350 = vector.broadcast %cst_119 : f32 to vector<1x128xf32>
    %351 = arith.addf %350, %349 : vector<1x128xf32>
    %352 = arith.divf %350, %351 : vector<1x128xf32>
    %353 = math.tanh %347 : vector<1x128xf32>
    %354 = vector.extract_strided_slice %352 {offsets = [0, 0], sizes = [1, 32], strides = [1, 1]} : vector<1x128xf32> to vector<1x32xf32>
    %355 = vector.extract_strided_slice %352 {offsets = [0, 32], sizes = [1, 32], strides = [1, 1]} : vector<1x128xf32> to vector<1x32xf32>
    %356 = vector.extract_strided_slice %353 {offsets = [0, 64], sizes = [1, 32], strides = [1, 1]} : vector<1x128xf32> to vector<1x32xf32>
    %357 = vector.extract_strided_slice %352 {offsets = [0, 96], sizes = [1, 32], strides = [1, 1]} : vector<1x128xf32> to vector<1x32xf32>
    %358 = arith.mulf %355, %318 : vector<1x32xf32>
    %359 = arith.mulf %354, %356 : vector<1x32xf32>
    %360 = arith.addf %358, %359 : vector<1x32xf32>
    %361 = math.tanh %360 : vector<1x32xf32>
    %362 = arith.mulf %357, %361 : vector<1x32xf32>
    %363 = vector.extract_strided_slice %344 {offsets = [0, 128], sizes = [1, 128], strides = [1, 1]} : vector<1x256xf32> to vector<1x128xf32>
    %364 = arith.addf %363, %18 : vector<1x128xf32>
    %365 = arith.negf %364 : vector<1x128xf32>
    %366 = math.exp %365 : vector<1x128xf32>
    %cst_120 = arith.constant 1.000000e+00 : f32
    %367 = vector.broadcast %cst_120 : f32 to vector<1x128xf32>
    %368 = arith.addf %367, %366 : vector<1x128xf32>
    %369 = arith.divf %367, %368 : vector<1x128xf32>
    %370 = math.tanh %364 : vector<1x128xf32>
    %371 = vector.extract_strided_slice %369 {offsets = [0, 0], sizes = [1, 32], strides = [1, 1]} : vector<1x128xf32> to vector<1x32xf32>
    %372 = vector.extract_strided_slice %369 {offsets = [0, 32], sizes = [1, 32], strides = [1, 1]} : vector<1x128xf32> to vector<1x32xf32>
    %373 = vector.extract_strided_slice %370 {offsets = [0, 64], sizes = [1, 32], strides = [1, 1]} : vector<1x128xf32> to vector<1x32xf32>
    %374 = vector.extract_strided_slice %369 {offsets = [0, 96], sizes = [1, 32], strides = [1, 1]} : vector<1x128xf32> to vector<1x32xf32>
    %375 = arith.mulf %372, %335 : vector<1x32xf32>
    %376 = arith.mulf %371, %373 : vector<1x32xf32>
    %377 = arith.addf %375, %376 : vector<1x32xf32>
    %378 = math.tanh %377 : vector<1x32xf32>
    %379 = arith.mulf %374, %378 : vector<1x32xf32>
    %c0_121 = arith.constant 0 : index
    %c0_122 = arith.constant 0 : index
    %c0_123 = arith.constant 0 : index
    %380 = vector.load %arg3[%c0_121, %c0_122, %c0_123] : memref<2x32x256xf32, #tpu.memory_space<vmem>>, vector<1x32x256xf32>
    %381 = vector.shape_cast %380 : vector<1x32x256xf32> to vector<32x256xf32>
    %cst_124 = arith.constant dense<0.000000e+00> : vector<1x256xf32>
    %382 = tpu.matmul %362, %381, %cst_124 {dimension_numbers = #tpu.dot_dimension_numbers<[1], [0], [0], [1], [0, 0, 1, 1], [], []>} : vector<1x32xf32>, vector<32x256xf32>, vector<1x256xf32> -> vector<1x256xf32>
    %c1_125 = arith.constant 1 : index
    %c0_126 = arith.constant 0 : index
    %c0_127 = arith.constant 0 : index
    %383 = vector.load %arg3[%c1_125, %c0_126, %c0_127] : memref<2x32x256xf32, #tpu.memory_space<vmem>>, vector<1x32x256xf32>
    %384 = vector.shape_cast %383 : vector<1x32x256xf32> to vector<32x256xf32>
    %cst_128 = arith.constant dense<0.000000e+00> : vector<1x256xf32>
    %385 = tpu.matmul %379, %384, %cst_128 {dimension_numbers = #tpu.dot_dimension_numbers<[1], [0], [0], [1], [0, 0, 1, 1], [], []>} : vector<1x32xf32>, vector<32x256xf32>, vector<1x256xf32> -> vector<1x256xf32>
    %386 = arith.addf %382, %385 : vector<1x256xf32>
    %387 = vector.extract_strided_slice %386 {offsets = [0, 0], sizes = [1, 128], strides = [1, 1]} : vector<1x256xf32> to vector<1x128xf32>
    %c9 = arith.constant 9 : index
    %c0_129 = arith.constant 0 : index
    %388 = vector.load %arg11[%c9, %c0_129] : memref<10x128xf32, #tpu.memory_space<vmem>>, vector<1x128xf32>
    %389 = arith.addf %387, %388 : vector<1x128xf32>
    %390 = arith.negf %389 : vector<1x128xf32>
    %391 = math.exp %390 : vector<1x128xf32>
    %cst_130 = arith.constant 1.000000e+00 : f32
    %392 = vector.broadcast %cst_130 : f32 to vector<1x128xf32>
    %393 = arith.addf %392, %391 : vector<1x128xf32>
    %394 = arith.divf %392, %393 : vector<1x128xf32>
    %395 = math.tanh %389 : vector<1x128xf32>
    %396 = vector.extract_strided_slice %394 {offsets = [0, 0], sizes = [1, 32], strides = [1, 1]} : vector<1x128xf32> to vector<1x32xf32>
    %397 = vector.extract_strided_slice %394 {offsets = [0, 32], sizes = [1, 32], strides = [1, 1]} : vector<1x128xf32> to vector<1x32xf32>
    %398 = vector.extract_strided_slice %395 {offsets = [0, 64], sizes = [1, 32], strides = [1, 1]} : vector<1x128xf32> to vector<1x32xf32>
    %399 = vector.extract_strided_slice %394 {offsets = [0, 96], sizes = [1, 32], strides = [1, 1]} : vector<1x128xf32> to vector<1x32xf32>
    %400 = arith.mulf %397, %360 : vector<1x32xf32>
    %401 = arith.mulf %396, %398 : vector<1x32xf32>
    %402 = arith.addf %400, %401 : vector<1x32xf32>
    %403 = math.tanh %402 : vector<1x32xf32>
    %404 = arith.mulf %399, %403 : vector<1x32xf32>
    %405 = vector.extract_strided_slice %386 {offsets = [0, 128], sizes = [1, 128], strides = [1, 1]} : vector<1x256xf32> to vector<1x128xf32>
    %406 = arith.addf %405, %18 : vector<1x128xf32>
    %407 = arith.negf %406 : vector<1x128xf32>
    %408 = math.exp %407 : vector<1x128xf32>
    %cst_131 = arith.constant 1.000000e+00 : f32
    %409 = vector.broadcast %cst_131 : f32 to vector<1x128xf32>
    %410 = arith.addf %409, %408 : vector<1x128xf32>
    %411 = arith.divf %409, %410 : vector<1x128xf32>
    %412 = math.tanh %406 : vector<1x128xf32>
    %413 = vector.extract_strided_slice %411 {offsets = [0, 0], sizes = [1, 32], strides = [1, 1]} : vector<1x128xf32> to vector<1x32xf32>
    %414 = vector.extract_strided_slice %411 {offsets = [0, 32], sizes = [1, 32], strides = [1, 1]} : vector<1x128xf32> to vector<1x32xf32>
    %415 = vector.extract_strided_slice %412 {offsets = [0, 64], sizes = [1, 32], strides = [1, 1]} : vector<1x128xf32> to vector<1x32xf32>
    %416 = vector.extract_strided_slice %411 {offsets = [0, 96], sizes = [1, 32], strides = [1, 1]} : vector<1x128xf32> to vector<1x32xf32>
    %417 = arith.mulf %414, %377 : vector<1x32xf32>
    %418 = arith.mulf %413, %415 : vector<1x32xf32>
    %419 = arith.addf %417, %418 : vector<1x32xf32>
    %420 = math.tanh %419 : vector<1x32xf32>
    %421 = arith.mulf %416, %420 : vector<1x32xf32>
    %c0_132 = arith.constant 0 : index
    %c0_133 = arith.constant 0 : index
    %c0_134 = arith.constant 0 : index
    %422 = vector.load %arg3[%c0_132, %c0_133, %c0_134] : memref<2x32x256xf32, #tpu.memory_space<vmem>>, vector<1x32x256xf32>
    %423 = vector.shape_cast %422 : vector<1x32x256xf32> to vector<32x256xf32>
    %cst_135 = arith.constant dense<0.000000e+00> : vector<1x256xf32>
    %424 = tpu.matmul %404, %423, %cst_135 {dimension_numbers = #tpu.dot_dimension_numbers<[1], [0], [0], [1], [0, 0, 1, 1], [], []>} : vector<1x32xf32>, vector<32x256xf32>, vector<1x256xf32> -> vector<1x256xf32>
    %c1_136 = arith.constant 1 : index
    %c0_137 = arith.constant 0 : index
    %c0_138 = arith.constant 0 : index
    %425 = vector.load %arg3[%c1_136, %c0_137, %c0_138] : memref<2x32x256xf32, #tpu.memory_space<vmem>>, vector<1x32x256xf32>
    %426 = vector.shape_cast %425 : vector<1x32x256xf32> to vector<32x256xf32>
    %cst_139 = arith.constant dense<0.000000e+00> : vector<1x256xf32>
    %427 = tpu.matmul %421, %426, %cst_139 {dimension_numbers = #tpu.dot_dimension_numbers<[1], [0], [0], [1], [0, 0, 1, 1], [], []>} : vector<1x32xf32>, vector<32x256xf32>, vector<1x256xf32> -> vector<1x256xf32>
    %428 = arith.addf %424, %427 : vector<1x256xf32>
    %429 = vector.extract_strided_slice %428 {offsets = [0, 128], sizes = [1, 128], strides = [1, 1]} : vector<1x256xf32> to vector<1x128xf32>
    %430 = arith.addf %429, %18 : vector<1x128xf32>
    %431 = arith.negf %430 : vector<1x128xf32>
    %432 = math.exp %431 : vector<1x128xf32>
    %cst_140 = arith.constant 1.000000e+00 : f32
    %433 = vector.broadcast %cst_140 : f32 to vector<1x128xf32>
    %434 = arith.addf %433, %432 : vector<1x128xf32>
    %435 = arith.divf %433, %434 : vector<1x128xf32>
    %436 = math.tanh %430 : vector<1x128xf32>
    %437 = vector.extract_strided_slice %435 {offsets = [0, 0], sizes = [1, 32], strides = [1, 1]} : vector<1x128xf32> to vector<1x32xf32>
    %438 = vector.extract_strided_slice %435 {offsets = [0, 32], sizes = [1, 32], strides = [1, 1]} : vector<1x128xf32> to vector<1x32xf32>
    %439 = vector.extract_strided_slice %436 {offsets = [0, 64], sizes = [1, 32], strides = [1, 1]} : vector<1x128xf32> to vector<1x32xf32>
    %440 = vector.extract_strided_slice %435 {offsets = [0, 96], sizes = [1, 32], strides = [1, 1]} : vector<1x128xf32> to vector<1x32xf32>
    %441 = arith.mulf %438, %419 : vector<1x32xf32>
    %442 = arith.mulf %437, %439 : vector<1x32xf32>
    %443 = arith.addf %441, %442 : vector<1x32xf32>
    %444 = math.tanh %443 : vector<1x32xf32>
    %445 = arith.mulf %440, %444 : vector<1x32xf32>
    %c1_141 = arith.constant 1 : index
    %c0_142 = arith.constant 0 : index
    %c0_143 = arith.constant 0 : index
    %446 = vector.load %arg7[%c1_141, %c0_142, %c0_143] : memref<2x1x128xf32, #tpu.memory_space<vmem>>, vector<1x1x128xf32>
    %447 = vector.shape_cast %446 : vector<1x1x128xf32> to vector<1x128xf32>
    %c0_144 = arith.constant 0 : index
    %c0_145 = arith.constant 0 : index
    %c0_146 = arith.constant 0 : index
    %448 = vector.load %arg6[%c0_144, %c0_145, %c0_146] : memref<2x32x256xf32, #tpu.memory_space<vmem>>, vector<1x32x256xf32>
    %449 = vector.shape_cast %448 : vector<1x32x256xf32> to vector<32x256xf32>
    %cst_147 = arith.constant dense<0.000000e+00> : vector<1x256xf32>
    %450 = tpu.matmul %404, %449, %cst_147 {dimension_numbers = #tpu.dot_dimension_numbers<[1], [0], [0], [1], [0, 0, 1, 1], [], []>} : vector<1x32xf32>, vector<32x256xf32>, vector<1x256xf32> -> vector<1x256xf32>
    %c1_148 = arith.constant 1 : index
    %c0_149 = arith.constant 0 : index
    %c0_150 = arith.constant 0 : index
    %451 = vector.load %arg6[%c1_148, %c0_149, %c0_150] : memref<2x32x256xf32, #tpu.memory_space<vmem>>, vector<1x32x256xf32>
    %452 = vector.shape_cast %451 : vector<1x32x256xf32> to vector<32x256xf32>
    %cst_151 = arith.constant dense<0.000000e+00> : vector<1x256xf32>
    %453 = tpu.matmul %445, %452, %cst_151 {dimension_numbers = #tpu.dot_dimension_numbers<[1], [0], [0], [1], [0, 0, 1, 1], [], []>} : vector<1x32xf32>, vector<32x256xf32>, vector<1x256xf32> -> vector<1x256xf32>
    %454 = arith.addf %450, %453 : vector<1x256xf32>
    %455 = vector.extract_strided_slice %454 {offsets = [0, 0], sizes = [1, 128], strides = [1, 1]} : vector<1x256xf32> to vector<1x128xf32>
    %c0_152 = arith.constant 0 : index
    %c0_153 = arith.constant 0 : index
    %456 = vector.load %arg12[%c0_152, %c0_153] : memref<8x128xf32, #tpu.memory_space<vmem>>, vector<1x128xf32>
    %457 = arith.addf %455, %456 : vector<1x128xf32>
    %458 = arith.negf %457 : vector<1x128xf32>
    %459 = math.exp %458 : vector<1x128xf32>
    %cst_154 = arith.constant 1.000000e+00 : f32
    %460 = vector.broadcast %cst_154 : f32 to vector<1x128xf32>
    %461 = arith.addf %460, %459 : vector<1x128xf32>
    %462 = arith.divf %460, %461 : vector<1x128xf32>
    %463 = math.tanh %457 : vector<1x128xf32>
    %464 = vector.extract_strided_slice %462 {offsets = [0, 0], sizes = [1, 32], strides = [1, 1]} : vector<1x128xf32> to vector<1x32xf32>
    %465 = vector.extract_strided_slice %462 {offsets = [0, 32], sizes = [1, 32], strides = [1, 1]} : vector<1x128xf32> to vector<1x32xf32>
    %466 = vector.extract_strided_slice %463 {offsets = [0, 64], sizes = [1, 32], strides = [1, 1]} : vector<1x128xf32> to vector<1x32xf32>
    %467 = vector.extract_strided_slice %462 {offsets = [0, 96], sizes = [1, 32], strides = [1, 1]} : vector<1x128xf32> to vector<1x32xf32>
    %468 = arith.mulf %465, %402 : vector<1x32xf32>
    %469 = arith.mulf %464, %466 : vector<1x32xf32>
    %470 = arith.addf %468, %469 : vector<1x32xf32>
    %471 = math.tanh %470 : vector<1x32xf32>
    %472 = arith.mulf %467, %471 : vector<1x32xf32>
    %c0_155 = arith.constant 0 : index
    %c0_156 = arith.constant 0 : index
    %c0_157 = arith.constant 0 : index
    %473 = vector.load %arg6[%c0_155, %c0_156, %c0_157] : memref<2x32x256xf32, #tpu.memory_space<vmem>>, vector<1x32x256xf32>
    %474 = vector.shape_cast %473 : vector<1x32x256xf32> to vector<32x256xf32>
    %cst_158 = arith.constant dense<0.000000e+00> : vector<1x256xf32>
    %475 = tpu.matmul %472, %474, %cst_158 {dimension_numbers = #tpu.dot_dimension_numbers<[1], [0], [0], [1], [0, 0, 1, 1], [], []>} : vector<1x32xf32>, vector<32x256xf32>, vector<1x256xf32> -> vector<1x256xf32>
    %c1_159 = arith.constant 1 : index
    %c0_160 = arith.constant 0 : index
    %c0_161 = arith.constant 0 : index
    %476 = vector.load %arg6[%c1_159, %c0_160, %c0_161] : memref<2x32x256xf32, #tpu.memory_space<vmem>>, vector<1x32x256xf32>
    %477 = vector.shape_cast %476 : vector<1x32x256xf32> to vector<32x256xf32>
    %cst_162 = arith.constant dense<0.000000e+00> : vector<1x256xf32>
    %478 = tpu.matmul %445, %477, %cst_162 {dimension_numbers = #tpu.dot_dimension_numbers<[1], [0], [0], [1], [0, 0, 1, 1], [], []>} : vector<1x32xf32>, vector<32x256xf32>, vector<1x256xf32> -> vector<1x256xf32>
    %479 = arith.addf %475, %478 : vector<1x256xf32>
    %480 = vector.extract_strided_slice %479 {offsets = [0, 0], sizes = [1, 128], strides = [1, 1]} : vector<1x256xf32> to vector<1x128xf32>
    %c1_163 = arith.constant 1 : index
    %c0_164 = arith.constant 0 : index
    %481 = vector.load %arg12[%c1_163, %c0_164] : memref<8x128xf32, #tpu.memory_space<vmem>>, vector<1x128xf32>
    %482 = arith.addf %480, %481 : vector<1x128xf32>
    %483 = arith.negf %482 : vector<1x128xf32>
    %484 = math.exp %483 : vector<1x128xf32>
    %cst_165 = arith.constant 1.000000e+00 : f32
    %485 = vector.broadcast %cst_165 : f32 to vector<1x128xf32>
    %486 = arith.addf %485, %484 : vector<1x128xf32>
    %487 = arith.divf %485, %486 : vector<1x128xf32>
    %488 = math.tanh %482 : vector<1x128xf32>
    %489 = vector.extract_strided_slice %487 {offsets = [0, 0], sizes = [1, 32], strides = [1, 1]} : vector<1x128xf32> to vector<1x32xf32>
    %490 = vector.extract_strided_slice %487 {offsets = [0, 32], sizes = [1, 32], strides = [1, 1]} : vector<1x128xf32> to vector<1x32xf32>
    %491 = vector.extract_strided_slice %488 {offsets = [0, 64], sizes = [1, 32], strides = [1, 1]} : vector<1x128xf32> to vector<1x32xf32>
    %492 = vector.extract_strided_slice %487 {offsets = [0, 96], sizes = [1, 32], strides = [1, 1]} : vector<1x128xf32> to vector<1x32xf32>
    %493 = arith.mulf %490, %470 : vector<1x32xf32>
    %494 = arith.mulf %489, %491 : vector<1x32xf32>
    %495 = arith.addf %493, %494 : vector<1x32xf32>
    %496 = math.tanh %495 : vector<1x32xf32>
    %497 = arith.mulf %492, %496 : vector<1x32xf32>
    %498 = vector.extract_strided_slice %479 {offsets = [0, 128], sizes = [1, 128], strides = [1, 1]} : vector<1x256xf32> to vector<1x128xf32>
    %499 = arith.addf %498, %447 : vector<1x128xf32>
    %500 = arith.negf %499 : vector<1x128xf32>
    %501 = math.exp %500 : vector<1x128xf32>
    %cst_166 = arith.constant 1.000000e+00 : f32
    %502 = vector.broadcast %cst_166 : f32 to vector<1x128xf32>
    %503 = arith.addf %502, %501 : vector<1x128xf32>
    %504 = arith.divf %502, %503 : vector<1x128xf32>
    %505 = math.tanh %499 : vector<1x128xf32>
    %506 = vector.extract_strided_slice %504 {offsets = [0, 0], sizes = [1, 32], strides = [1, 1]} : vector<1x128xf32> to vector<1x32xf32>
    %507 = vector.extract_strided_slice %504 {offsets = [0, 32], sizes = [1, 32], strides = [1, 1]} : vector<1x128xf32> to vector<1x32xf32>
    %508 = vector.extract_strided_slice %505 {offsets = [0, 64], sizes = [1, 32], strides = [1, 1]} : vector<1x128xf32> to vector<1x32xf32>
    %509 = vector.extract_strided_slice %504 {offsets = [0, 96], sizes = [1, 32], strides = [1, 1]} : vector<1x128xf32> to vector<1x32xf32>
    %510 = arith.mulf %507, %443 : vector<1x32xf32>
    %511 = arith.mulf %506, %508 : vector<1x32xf32>
    %512 = arith.addf %510, %511 : vector<1x32xf32>
    %513 = math.tanh %512 : vector<1x32xf32>
    %514 = arith.mulf %509, %513 : vector<1x32xf32>
    %c0_167 = arith.constant 0 : index
    %c0_168 = arith.constant 0 : index
    %515 = vector.load %arg13[%c0_167, %c0_168] : memref<8x32xf32, #tpu.memory_space<vmem>>, vector<1x32xf32>
    tpu.vector_store %arg13[%c0_167, %c0_168], %514 {strides = array<i32>} : memref<8x32xf32, #tpu.memory_space<vmem>>, vector<1x32xf32>,
    %c0_169 = arith.constant 0 : index
    %c0_170 = arith.constant 0 : index
    %c0_171 = arith.constant 0 : index
    %516 = vector.load %arg6[%c0_169, %c0_170, %c0_171] : memref<2x32x256xf32, #tpu.memory_space<vmem>>, vector<1x32x256xf32>
    %517 = vector.shape_cast %516 : vector<1x32x256xf32> to vector<32x256xf32>
    %cst_172 = arith.constant dense<0.000000e+00> : vector<1x256xf32>
    %518 = tpu.matmul %497, %517, %cst_172 {dimension_numbers = #tpu.dot_dimension_numbers<[1], [0], [0], [1], [0, 0, 1, 1], [], []>} : vector<1x32xf32>, vector<32x256xf32>, vector<1x256xf32> -> vector<1x256xf32>
    %c1_173 = arith.constant 1 : index
    %c0_174 = arith.constant 0 : index
    %c0_175 = arith.constant 0 : index
    %519 = vector.load %arg6[%c1_173, %c0_174, %c0_175] : memref<2x32x256xf32, #tpu.memory_space<vmem>>, vector<1x32x256xf32>
    %520 = vector.shape_cast %519 : vector<1x32x256xf32> to vector<32x256xf32>
    %cst_176 = arith.constant dense<0.000000e+00> : vector<1x256xf32>
    %521 = tpu.matmul %514, %520, %cst_176 {dimension_numbers = #tpu.dot_dimension_numbers<[1], [0], [0], [1], [0, 0, 1, 1], [], []>} : vector<1x32xf32>, vector<32x256xf32>, vector<1x256xf32> -> vector<1x256xf32>
    %522 = arith.addf %518, %521 : vector<1x256xf32>
    %523 = vector.extract_strided_slice %522 {offsets = [0, 0], sizes = [1, 128], strides = [1, 1]} : vector<1x256xf32> to vector<1x128xf32>
    %c2_177 = arith.constant 2 : index
    %c0_178 = arith.constant 0 : index
    %524 = vector.load %arg12[%c2_177, %c0_178] : memref<8x128xf32, #tpu.memory_space<vmem>>, vector<1x128xf32>
    %525 = arith.addf %523, %524 : vector<1x128xf32>
    %526 = arith.negf %525 : vector<1x128xf32>
    %527 = math.exp %526 : vector<1x128xf32>
    %cst_179 = arith.constant 1.000000e+00 : f32
    %528 = vector.broadcast %cst_179 : f32 to vector<1x128xf32>
    %529 = arith.addf %528, %527 : vector<1x128xf32>
    %530 = arith.divf %528, %529 : vector<1x128xf32>
    %531 = math.tanh %525 : vector<1x128xf32>
    %532 = vector.extract_strided_slice %530 {offsets = [0, 0], sizes = [1, 32], strides = [1, 1]} : vector<1x128xf32> to vector<1x32xf32>
    %533 = vector.extract_strided_slice %530 {offsets = [0, 32], sizes = [1, 32], strides = [1, 1]} : vector<1x128xf32> to vector<1x32xf32>
    %534 = vector.extract_strided_slice %531 {offsets = [0, 64], sizes = [1, 32], strides = [1, 1]} : vector<1x128xf32> to vector<1x32xf32>
    %535 = vector.extract_strided_slice %530 {offsets = [0, 96], sizes = [1, 32], strides = [1, 1]} : vector<1x128xf32> to vector<1x32xf32>
    %536 = arith.mulf %533, %495 : vector<1x32xf32>
    %537 = arith.mulf %532, %534 : vector<1x32xf32>
    %538 = arith.addf %536, %537 : vector<1x32xf32>
    %539 = math.tanh %538 : vector<1x32xf32>
    %540 = arith.mulf %535, %539 : vector<1x32xf32>
    %541 = vector.extract_strided_slice %522 {offsets = [0, 128], sizes = [1, 128], strides = [1, 1]} : vector<1x256xf32> to vector<1x128xf32>
    %542 = arith.addf %541, %447 : vector<1x128xf32>
    %543 = arith.negf %542 : vector<1x128xf32>
    %544 = math.exp %543 : vector<1x128xf32>
    %cst_180 = arith.constant 1.000000e+00 : f32
    %545 = vector.broadcast %cst_180 : f32 to vector<1x128xf32>
    %546 = arith.addf %545, %544 : vector<1x128xf32>
    %547 = arith.divf %545, %546 : vector<1x128xf32>
    %548 = math.tanh %542 : vector<1x128xf32>
    %549 = vector.extract_strided_slice %547 {offsets = [0, 0], sizes = [1, 32], strides = [1, 1]} : vector<1x128xf32> to vector<1x32xf32>
    %550 = vector.extract_strided_slice %547 {offsets = [0, 32], sizes = [1, 32], strides = [1, 1]} : vector<1x128xf32> to vector<1x32xf32>
    %551 = vector.extract_strided_slice %548 {offsets = [0, 64], sizes = [1, 32], strides = [1, 1]} : vector<1x128xf32> to vector<1x32xf32>
    %552 = vector.extract_strided_slice %547 {offsets = [0, 96], sizes = [1, 32], strides = [1, 1]} : vector<1x128xf32> to vector<1x32xf32>
    %553 = arith.mulf %550, %512 : vector<1x32xf32>
    %554 = arith.mulf %549, %551 : vector<1x32xf32>
    %555 = arith.addf %553, %554 : vector<1x32xf32>
    %556 = math.tanh %555 : vector<1x32xf32>
    %557 = arith.mulf %552, %556 : vector<1x32xf32>
    %c1_181 = arith.constant 1 : index
    %c0_182 = arith.constant 0 : index
    %558 = vector.load %arg13[%c1_181, %c0_182] : memref<8x32xf32, #tpu.memory_space<vmem>>, vector<1x32xf32>
    tpu.vector_store %arg13[%c1_181, %c0_182], %557 {strides = array<i32>} : memref<8x32xf32, #tpu.memory_space<vmem>>, vector<1x32xf32>,
    %c0_183 = arith.constant 0 : index
    %c0_184 = arith.constant 0 : index
    %c0_185 = arith.constant 0 : index
    %559 = vector.load %arg6[%c0_183, %c0_184, %c0_185] : memref<2x32x256xf32, #tpu.memory_space<vmem>>, vector<1x32x256xf32>
    %560 = vector.shape_cast %559 : vector<1x32x256xf32> to vector<32x256xf32>
    %cst_186 = arith.constant dense<0.000000e+00> : vector<1x256xf32>
    %561 = tpu.matmul %540, %560, %cst_186 {dimension_numbers = #tpu.dot_dimension_numbers<[1], [0], [0], [1], [0, 0, 1, 1], [], []>} : vector<1x32xf32>, vector<32x256xf32>, vector<1x256xf32> -> vector<1x256xf32>
    %c1_187 = arith.constant 1 : index
    %c0_188 = arith.constant 0 : index
    %c0_189 = arith.constant 0 : index
    %562 = vector.load %arg6[%c1_187, %c0_188, %c0_189] : memref<2x32x256xf32, #tpu.memory_space<vmem>>, vector<1x32x256xf32>
    %563 = vector.shape_cast %562 : vector<1x32x256xf32> to vector<32x256xf32>
    %cst_190 = arith.constant dense<0.000000e+00> : vector<1x256xf32>
    %564 = tpu.matmul %557, %563, %cst_190 {dimension_numbers = #tpu.dot_dimension_numbers<[1], [0], [0], [1], [0, 0, 1, 1], [], []>} : vector<1x32xf32>, vector<32x256xf32>, vector<1x256xf32> -> vector<1x256xf32>
    %565 = arith.addf %561, %564 : vector<1x256xf32>
    %566 = vector.extract_strided_slice %565 {offsets = [0, 0], sizes = [1, 128], strides = [1, 1]} : vector<1x256xf32> to vector<1x128xf32>
    %c3_191 = arith.constant 3 : index
    %c0_192 = arith.constant 0 : index
    %567 = vector.load %arg12[%c3_191, %c0_192] : memref<8x128xf32, #tpu.memory_space<vmem>>, vector<1x128xf32>
    %568 = arith.addf %566, %567 : vector<1x128xf32>
    %569 = arith.negf %568 : vector<1x128xf32>
    %570 = math.exp %569 : vector<1x128xf32>
    %cst_193 = arith.constant 1.000000e+00 : f32
    %571 = vector.broadcast %cst_193 : f32 to vector<1x128xf32>
    %572 = arith.addf %571, %570 : vector<1x128xf32>
    %573 = arith.divf %571, %572 : vector<1x128xf32>
    %574 = math.tanh %568 : vector<1x128xf32>
    %575 = vector.extract_strided_slice %573 {offsets = [0, 0], sizes = [1, 32], strides = [1, 1]} : vector<1x128xf32> to vector<1x32xf32>
    %576 = vector.extract_strided_slice %573 {offsets = [0, 32], sizes = [1, 32], strides = [1, 1]} : vector<1x128xf32> to vector<1x32xf32>
    %577 = vector.extract_strided_slice %574 {offsets = [0, 64], sizes = [1, 32], strides = [1, 1]} : vector<1x128xf32> to vector<1x32xf32>
    %578 = vector.extract_strided_slice %573 {offsets = [0, 96], sizes = [1, 32], strides = [1, 1]} : vector<1x128xf32> to vector<1x32xf32>
    %579 = arith.mulf %576, %538 : vector<1x32xf32>
    %580 = arith.mulf %575, %577 : vector<1x32xf32>
    %581 = arith.addf %579, %580 : vector<1x32xf32>
    %582 = math.tanh %581 : vector<1x32xf32>
    %583 = arith.mulf %578, %582 : vector<1x32xf32>
    %584 = vector.extract_strided_slice %565 {offsets = [0, 128], sizes = [1, 128], strides = [1, 1]} : vector<1x256xf32> to vector<1x128xf32>
    %585 = arith.addf %584, %447 : vector<1x128xf32>
    %586 = arith.negf %585 : vector<1x128xf32>
    %587 = math.exp %586 : vector<1x128xf32>
    %cst_194 = arith.constant 1.000000e+00 : f32
    %588 = vector.broadcast %cst_194 : f32 to vector<1x128xf32>
    %589 = arith.addf %588, %587 : vector<1x128xf32>
    %590 = arith.divf %588, %589 : vector<1x128xf32>
    %591 = math.tanh %585 : vector<1x128xf32>
    %592 = vector.extract_strided_slice %590 {offsets = [0, 0], sizes = [1, 32], strides = [1, 1]} : vector<1x128xf32> to vector<1x32xf32>
    %593 = vector.extract_strided_slice %590 {offsets = [0, 32], sizes = [1, 32], strides = [1, 1]} : vector<1x128xf32> to vector<1x32xf32>
    %594 = vector.extract_strided_slice %591 {offsets = [0, 64], sizes = [1, 32], strides = [1, 1]} : vector<1x128xf32> to vector<1x32xf32>
    %595 = vector.extract_strided_slice %590 {offsets = [0, 96], sizes = [1, 32], strides = [1, 1]} : vector<1x128xf32> to vector<1x32xf32>
    %596 = arith.mulf %593, %555 : vector<1x32xf32>
    %597 = arith.mulf %592, %594 : vector<1x32xf32>
    %598 = arith.addf %596, %597 : vector<1x32xf32>
    %599 = math.tanh %598 : vector<1x32xf32>
    %600 = arith.mulf %595, %599 : vector<1x32xf32>
    %c2_195 = arith.constant 2 : index
    %c0_196 = arith.constant 0 : index
    %601 = vector.load %arg13[%c2_195, %c0_196] : memref<8x32xf32, #tpu.memory_space<vmem>>, vector<1x32xf32>
    tpu.vector_store %arg13[%c2_195, %c0_196], %600 {strides = array<i32>} : memref<8x32xf32, #tpu.memory_space<vmem>>, vector<1x32xf32>,
    %c0_197 = arith.constant 0 : index
    %c0_198 = arith.constant 0 : index
    %c0_199 = arith.constant 0 : index
    %602 = vector.load %arg6[%c0_197, %c0_198, %c0_199] : memref<2x32x256xf32, #tpu.memory_space<vmem>>, vector<1x32x256xf32>
    %603 = vector.shape_cast %602 : vector<1x32x256xf32> to vector<32x256xf32>
    %cst_200 = arith.constant dense<0.000000e+00> : vector<1x256xf32>
    %604 = tpu.matmul %583, %603, %cst_200 {dimension_numbers = #tpu.dot_dimension_numbers<[1], [0], [0], [1], [0, 0, 1, 1], [], []>} : vector<1x32xf32>, vector<32x256xf32>, vector<1x256xf32> -> vector<1x256xf32>
    %c1_201 = arith.constant 1 : index
    %c0_202 = arith.constant 0 : index
    %c0_203 = arith.constant 0 : index
    %605 = vector.load %arg6[%c1_201, %c0_202, %c0_203] : memref<2x32x256xf32, #tpu.memory_space<vmem>>, vector<1x32x256xf32>
    %606 = vector.shape_cast %605 : vector<1x32x256xf32> to vector<32x256xf32>
    %cst_204 = arith.constant dense<0.000000e+00> : vector<1x256xf32>
    %607 = tpu.matmul %600, %606, %cst_204 {dimension_numbers = #tpu.dot_dimension_numbers<[1], [0], [0], [1], [0, 0, 1, 1], [], []>} : vector<1x32xf32>, vector<32x256xf32>, vector<1x256xf32> -> vector<1x256xf32>
    %608 = arith.addf %604, %607 : vector<1x256xf32>
    %609 = vector.extract_strided_slice %608 {offsets = [0, 0], sizes = [1, 128], strides = [1, 1]} : vector<1x256xf32> to vector<1x128xf32>
    %c4_205 = arith.constant 4 : index
    %c0_206 = arith.constant 0 : index
    %610 = vector.load %arg12[%c4_205, %c0_206] : memref<8x128xf32, #tpu.memory_space<vmem>>, vector<1x128xf32>
    %611 = arith.addf %609, %610 : vector<1x128xf32>
    %612 = arith.negf %611 : vector<1x128xf32>
    %613 = math.exp %612 : vector<1x128xf32>
    %cst_207 = arith.constant 1.000000e+00 : f32
    %614 = vector.broadcast %cst_207 : f32 to vector<1x128xf32>
    %615 = arith.addf %614, %613 : vector<1x128xf32>
    %616 = arith.divf %614, %615 : vector<1x128xf32>
    %617 = math.tanh %611 : vector<1x128xf32>
    %618 = vector.extract_strided_slice %616 {offsets = [0, 0], sizes = [1, 32], strides = [1, 1]} : vector<1x128xf32> to vector<1x32xf32>
    %619 = vector.extract_strided_slice %616 {offsets = [0, 32], sizes = [1, 32], strides = [1, 1]} : vector<1x128xf32> to vector<1x32xf32>
    %620 = vector.extract_strided_slice %617 {offsets = [0, 64], sizes = [1, 32], strides = [1, 1]} : vector<1x128xf32> to vector<1x32xf32>
    %621 = vector.extract_strided_slice %616 {offsets = [0, 96], sizes = [1, 32], strides = [1, 1]} : vector<1x128xf32> to vector<1x32xf32>
    %622 = arith.mulf %619, %581 : vector<1x32xf32>
    %623 = arith.mulf %618, %620 : vector<1x32xf32>
    %624 = arith.addf %622, %623 : vector<1x32xf32>
    %625 = math.tanh %624 : vector<1x32xf32>
    %626 = arith.mulf %621, %625 : vector<1x32xf32>
    %627 = vector.extract_strided_slice %608 {offsets = [0, 128], sizes = [1, 128], strides = [1, 1]} : vector<1x256xf32> to vector<1x128xf32>
    %628 = arith.addf %627, %447 : vector<1x128xf32>
    %629 = arith.negf %628 : vector<1x128xf32>
    %630 = math.exp %629 : vector<1x128xf32>
    %cst_208 = arith.constant 1.000000e+00 : f32
    %631 = vector.broadcast %cst_208 : f32 to vector<1x128xf32>
    %632 = arith.addf %631, %630 : vector<1x128xf32>
    %633 = arith.divf %631, %632 : vector<1x128xf32>
    %634 = math.tanh %628 : vector<1x128xf32>
    %635 = vector.extract_strided_slice %633 {offsets = [0, 0], sizes = [1, 32], strides = [1, 1]} : vector<1x128xf32> to vector<1x32xf32>
    %636 = vector.extract_strided_slice %633 {offsets = [0, 32], sizes = [1, 32], strides = [1, 1]} : vector<1x128xf32> to vector<1x32xf32>
    %637 = vector.extract_strided_slice %634 {offsets = [0, 64], sizes = [1, 32], strides = [1, 1]} : vector<1x128xf32> to vector<1x32xf32>
    %638 = vector.extract_strided_slice %633 {offsets = [0, 96], sizes = [1, 32], strides = [1, 1]} : vector<1x128xf32> to vector<1x32xf32>
    %639 = arith.mulf %636, %598 : vector<1x32xf32>
    %640 = arith.mulf %635, %637 : vector<1x32xf32>
    %641 = arith.addf %639, %640 : vector<1x32xf32>
    %642 = math.tanh %641 : vector<1x32xf32>
    %643 = arith.mulf %638, %642 : vector<1x32xf32>
    %c3_209 = arith.constant 3 : index
    %c0_210 = arith.constant 0 : index
    %644 = vector.load %arg13[%c3_209, %c0_210] : memref<8x32xf32, #tpu.memory_space<vmem>>, vector<1x32xf32>
    tpu.vector_store %arg13[%c3_209, %c0_210], %643 {strides = array<i32>} : memref<8x32xf32, #tpu.memory_space<vmem>>, vector<1x32xf32>,
    %c0_211 = arith.constant 0 : index
    %c0_212 = arith.constant 0 : index
    %c0_213 = arith.constant 0 : index
    %645 = vector.load %arg6[%c0_211, %c0_212, %c0_213] : memref<2x32x256xf32, #tpu.memory_space<vmem>>, vector<1x32x256xf32>
    %646 = vector.shape_cast %645 : vector<1x32x256xf32> to vector<32x256xf32>
    %cst_214 = arith.constant dense<0.000000e+00> : vector<1x256xf32>
    %647 = tpu.matmul %626, %646, %cst_214 {dimension_numbers = #tpu.dot_dimension_numbers<[1], [0], [0], [1], [0, 0, 1, 1], [], []>} : vector<1x32xf32>, vector<32x256xf32>, vector<1x256xf32> -> vector<1x256xf32>
    %c1_215 = arith.constant 1 : index
    %c0_216 = arith.constant 0 : index
    %c0_217 = arith.constant 0 : index
    %648 = vector.load %arg6[%c1_215, %c0_216, %c0_217] : memref<2x32x256xf32, #tpu.memory_space<vmem>>, vector<1x32x256xf32>
    %649 = vector.shape_cast %648 : vector<1x32x256xf32> to vector<32x256xf32>
    %cst_218 = arith.constant dense<0.000000e+00> : vector<1x256xf32>
    %650 = tpu.matmul %643, %649, %cst_218 {dimension_numbers = #tpu.dot_dimension_numbers<[1], [0], [0], [1], [0, 0, 1, 1], [], []>} : vector<1x32xf32>, vector<32x256xf32>, vector<1x256xf32> -> vector<1x256xf32>
    %651 = arith.addf %647, %650 : vector<1x256xf32>
    %652 = vector.extract_strided_slice %651 {offsets = [0, 0], sizes = [1, 128], strides = [1, 1]} : vector<1x256xf32> to vector<1x128xf32>
    %c5_219 = arith.constant 5 : index
    %c0_220 = arith.constant 0 : index
    %653 = vector.load %arg12[%c5_219, %c0_220] : memref<8x128xf32, #tpu.memory_space<vmem>>, vector<1x128xf32>
    %654 = arith.addf %652, %653 : vector<1x128xf32>
    %655 = arith.negf %654 : vector<1x128xf32>
    %656 = math.exp %655 : vector<1x128xf32>
    %cst_221 = arith.constant 1.000000e+00 : f32
    %657 = vector.broadcast %cst_221 : f32 to vector<1x128xf32>
    %658 = arith.addf %657, %656 : vector<1x128xf32>
    %659 = arith.divf %657, %658 : vector<1x128xf32>
    %660 = math.tanh %654 : vector<1x128xf32>
    %661 = vector.extract_strided_slice %659 {offsets = [0, 0], sizes = [1, 32], strides = [1, 1]} : vector<1x128xf32> to vector<1x32xf32>
    %662 = vector.extract_strided_slice %659 {offsets = [0, 32], sizes = [1, 32], strides = [1, 1]} : vector<1x128xf32> to vector<1x32xf32>
    %663 = vector.extract_strided_slice %660 {offsets = [0, 64], sizes = [1, 32], strides = [1, 1]} : vector<1x128xf32> to vector<1x32xf32>
    %664 = vector.extract_strided_slice %659 {offsets = [0, 96], sizes = [1, 32], strides = [1, 1]} : vector<1x128xf32> to vector<1x32xf32>
    %665 = arith.mulf %662, %624 : vector<1x32xf32>
    %666 = arith.mulf %661, %663 : vector<1x32xf32>
    %667 = arith.addf %665, %666 : vector<1x32xf32>
    %668 = math.tanh %667 : vector<1x32xf32>
    %669 = arith.mulf %664, %668 : vector<1x32xf32>
    %670 = vector.extract_strided_slice %651 {offsets = [0, 128], sizes = [1, 128], strides = [1, 1]} : vector<1x256xf32> to vector<1x128xf32>
    %671 = arith.addf %670, %447 : vector<1x128xf32>
    %672 = arith.negf %671 : vector<1x128xf32>
    %673 = math.exp %672 : vector<1x128xf32>
    %cst_222 = arith.constant 1.000000e+00 : f32
    %674 = vector.broadcast %cst_222 : f32 to vector<1x128xf32>
    %675 = arith.addf %674, %673 : vector<1x128xf32>
    %676 = arith.divf %674, %675 : vector<1x128xf32>
    %677 = math.tanh %671 : vector<1x128xf32>
    %678 = vector.extract_strided_slice %676 {offsets = [0, 0], sizes = [1, 32], strides = [1, 1]} : vector<1x128xf32> to vector<1x32xf32>
    %679 = vector.extract_strided_slice %676 {offsets = [0, 32], sizes = [1, 32], strides = [1, 1]} : vector<1x128xf32> to vector<1x32xf32>
    %680 = vector.extract_strided_slice %677 {offsets = [0, 64], sizes = [1, 32], strides = [1, 1]} : vector<1x128xf32> to vector<1x32xf32>
    %681 = vector.extract_strided_slice %676 {offsets = [0, 96], sizes = [1, 32], strides = [1, 1]} : vector<1x128xf32> to vector<1x32xf32>
    %682 = arith.mulf %679, %641 : vector<1x32xf32>
    %683 = arith.mulf %678, %680 : vector<1x32xf32>
    %684 = arith.addf %682, %683 : vector<1x32xf32>
    %685 = math.tanh %684 : vector<1x32xf32>
    %686 = arith.mulf %681, %685 : vector<1x32xf32>
    %c4_223 = arith.constant 4 : index
    %c0_224 = arith.constant 0 : index
    %687 = vector.load %arg13[%c4_223, %c0_224] : memref<8x32xf32, #tpu.memory_space<vmem>>, vector<1x32xf32>
    tpu.vector_store %arg13[%c4_223, %c0_224], %686 {strides = array<i32>} : memref<8x32xf32, #tpu.memory_space<vmem>>, vector<1x32xf32>,
    %c0_225 = arith.constant 0 : index
    %c0_226 = arith.constant 0 : index
    %c0_227 = arith.constant 0 : index
    %688 = vector.load %arg6[%c0_225, %c0_226, %c0_227] : memref<2x32x256xf32, #tpu.memory_space<vmem>>, vector<1x32x256xf32>
    %689 = vector.shape_cast %688 : vector<1x32x256xf32> to vector<32x256xf32>
    %cst_228 = arith.constant dense<0.000000e+00> : vector<1x256xf32>
    %690 = tpu.matmul %669, %689, %cst_228 {dimension_numbers = #tpu.dot_dimension_numbers<[1], [0], [0], [1], [0, 0, 1, 1], [], []>} : vector<1x32xf32>, vector<32x256xf32>, vector<1x256xf32> -> vector<1x256xf32>
    %c1_229 = arith.constant 1 : index
    %c0_230 = arith.constant 0 : index
    %c0_231 = arith.constant 0 : index
    %691 = vector.load %arg6[%c1_229, %c0_230, %c0_231] : memref<2x32x256xf32, #tpu.memory_space<vmem>>, vector<1x32x256xf32>
    %692 = vector.shape_cast %691 : vector<1x32x256xf32> to vector<32x256xf32>
    %cst_232 = arith.constant dense<0.000000e+00> : vector<1x256xf32>
    %693 = tpu.matmul %686, %692, %cst_232 {dimension_numbers = #tpu.dot_dimension_numbers<[1], [0], [0], [1], [0, 0, 1, 1], [], []>} : vector<1x32xf32>, vector<32x256xf32>, vector<1x256xf32> -> vector<1x256xf32>
    %694 = arith.addf %690, %693 : vector<1x256xf32>
    %695 = vector.extract_strided_slice %694 {offsets = [0, 0], sizes = [1, 128], strides = [1, 1]} : vector<1x256xf32> to vector<1x128xf32>
    %c6_233 = arith.constant 6 : index
    %c0_234 = arith.constant 0 : index
    %696 = vector.load %arg12[%c6_233, %c0_234] : memref<8x128xf32, #tpu.memory_space<vmem>>, vector<1x128xf32>
    %697 = arith.addf %695, %696 : vector<1x128xf32>
    %698 = arith.negf %697 : vector<1x128xf32>
    %699 = math.exp %698 : vector<1x128xf32>
    %cst_235 = arith.constant 1.000000e+00 : f32
    %700 = vector.broadcast %cst_235 : f32 to vector<1x128xf32>
    %701 = arith.addf %700, %699 : vector<1x128xf32>
    %702 = arith.divf %700, %701 : vector<1x128xf32>
    %703 = math.tanh %697 : vector<1x128xf32>
    %704 = vector.extract_strided_slice %702 {offsets = [0, 0], sizes = [1, 32], strides = [1, 1]} : vector<1x128xf32> to vector<1x32xf32>
    %705 = vector.extract_strided_slice %702 {offsets = [0, 32], sizes = [1, 32], strides = [1, 1]} : vector<1x128xf32> to vector<1x32xf32>
    %706 = vector.extract_strided_slice %703 {offsets = [0, 64], sizes = [1, 32], strides = [1, 1]} : vector<1x128xf32> to vector<1x32xf32>
    %707 = vector.extract_strided_slice %702 {offsets = [0, 96], sizes = [1, 32], strides = [1, 1]} : vector<1x128xf32> to vector<1x32xf32>
    %708 = arith.mulf %705, %667 : vector<1x32xf32>
    %709 = arith.mulf %704, %706 : vector<1x32xf32>
    %710 = arith.addf %708, %709 : vector<1x32xf32>
    %711 = math.tanh %710 : vector<1x32xf32>
    %712 = arith.mulf %707, %711 : vector<1x32xf32>
    %713 = vector.extract_strided_slice %694 {offsets = [0, 128], sizes = [1, 128], strides = [1, 1]} : vector<1x256xf32> to vector<1x128xf32>
    %714 = arith.addf %713, %447 : vector<1x128xf32>
    %715 = arith.negf %714 : vector<1x128xf32>
    %716 = math.exp %715 : vector<1x128xf32>
    %cst_236 = arith.constant 1.000000e+00 : f32
    %717 = vector.broadcast %cst_236 : f32 to vector<1x128xf32>
    %718 = arith.addf %717, %716 : vector<1x128xf32>
    %719 = arith.divf %717, %718 : vector<1x128xf32>
    %720 = math.tanh %714 : vector<1x128xf32>
    %721 = vector.extract_strided_slice %719 {offsets = [0, 0], sizes = [1, 32], strides = [1, 1]} : vector<1x128xf32> to vector<1x32xf32>
    %722 = vector.extract_strided_slice %719 {offsets = [0, 32], sizes = [1, 32], strides = [1, 1]} : vector<1x128xf32> to vector<1x32xf32>
    %723 = vector.extract_strided_slice %720 {offsets = [0, 64], sizes = [1, 32], strides = [1, 1]} : vector<1x128xf32> to vector<1x32xf32>
    %724 = vector.extract_strided_slice %719 {offsets = [0, 96], sizes = [1, 32], strides = [1, 1]} : vector<1x128xf32> to vector<1x32xf32>
    %725 = arith.mulf %722, %684 : vector<1x32xf32>
    %726 = arith.mulf %721, %723 : vector<1x32xf32>
    %727 = arith.addf %725, %726 : vector<1x32xf32>
    %728 = math.tanh %727 : vector<1x32xf32>
    %729 = arith.mulf %724, %728 : vector<1x32xf32>
    %c5_237 = arith.constant 5 : index
    %c0_238 = arith.constant 0 : index
    %730 = vector.load %arg13[%c5_237, %c0_238] : memref<8x32xf32, #tpu.memory_space<vmem>>, vector<1x32xf32>
    tpu.vector_store %arg13[%c5_237, %c0_238], %729 {strides = array<i32>} : memref<8x32xf32, #tpu.memory_space<vmem>>, vector<1x32xf32>,
    %c0_239 = arith.constant 0 : index
    %c0_240 = arith.constant 0 : index
    %c0_241 = arith.constant 0 : index
    %731 = vector.load %arg6[%c0_239, %c0_240, %c0_241] : memref<2x32x256xf32, #tpu.memory_space<vmem>>, vector<1x32x256xf32>
    %732 = vector.shape_cast %731 : vector<1x32x256xf32> to vector<32x256xf32>
    %cst_242 = arith.constant dense<0.000000e+00> : vector<1x256xf32>
    %733 = tpu.matmul %712, %732, %cst_242 {dimension_numbers = #tpu.dot_dimension_numbers<[1], [0], [0], [1], [0, 0, 1, 1], [], []>} : vector<1x32xf32>, vector<32x256xf32>, vector<1x256xf32> -> vector<1x256xf32>
    %c1_243 = arith.constant 1 : index
    %c0_244 = arith.constant 0 : index
    %c0_245 = arith.constant 0 : index
    %734 = vector.load %arg6[%c1_243, %c0_244, %c0_245] : memref<2x32x256xf32, #tpu.memory_space<vmem>>, vector<1x32x256xf32>
    %735 = vector.shape_cast %734 : vector<1x32x256xf32> to vector<32x256xf32>
    %cst_246 = arith.constant dense<0.000000e+00> : vector<1x256xf32>
    %736 = tpu.matmul %729, %735, %cst_246 {dimension_numbers = #tpu.dot_dimension_numbers<[1], [0], [0], [1], [0, 0, 1, 1], [], []>} : vector<1x32xf32>, vector<32x256xf32>, vector<1x256xf32> -> vector<1x256xf32>
    %737 = arith.addf %733, %736 : vector<1x256xf32>
    %738 = vector.extract_strided_slice %737 {offsets = [0, 0], sizes = [1, 128], strides = [1, 1]} : vector<1x256xf32> to vector<1x128xf32>
    %c7_247 = arith.constant 7 : index
    %c0_248 = arith.constant 0 : index
    %739 = vector.load %arg12[%c7_247, %c0_248] : memref<8x128xf32, #tpu.memory_space<vmem>>, vector<1x128xf32>
    %740 = arith.addf %738, %739 : vector<1x128xf32>
    %741 = arith.negf %740 : vector<1x128xf32>
    %742 = math.exp %741 : vector<1x128xf32>
    %cst_249 = arith.constant 1.000000e+00 : f32
    %743 = vector.broadcast %cst_249 : f32 to vector<1x128xf32>
    %744 = arith.addf %743, %742 : vector<1x128xf32>
    %745 = arith.divf %743, %744 : vector<1x128xf32>
    %746 = math.tanh %740 : vector<1x128xf32>
    %747 = vector.extract_strided_slice %745 {offsets = [0, 0], sizes = [1, 32], strides = [1, 1]} : vector<1x128xf32> to vector<1x32xf32>
    %748 = vector.extract_strided_slice %745 {offsets = [0, 32], sizes = [1, 32], strides = [1, 1]} : vector<1x128xf32> to vector<1x32xf32>
    %749 = vector.extract_strided_slice %746 {offsets = [0, 64], sizes = [1, 32], strides = [1, 1]} : vector<1x128xf32> to vector<1x32xf32>
    %750 = vector.extract_strided_slice %745 {offsets = [0, 96], sizes = [1, 32], strides = [1, 1]} : vector<1x128xf32> to vector<1x32xf32>
    %751 = arith.mulf %748, %710 : vector<1x32xf32>
    %752 = arith.mulf %747, %749 : vector<1x32xf32>
    %753 = arith.addf %751, %752 : vector<1x32xf32>
    %754 = math.tanh %753 : vector<1x32xf32>
    %755 = arith.mulf %750, %754 : vector<1x32xf32>
    %756 = vector.extract_strided_slice %737 {offsets = [0, 128], sizes = [1, 128], strides = [1, 1]} : vector<1x256xf32> to vector<1x128xf32>
    %757 = arith.addf %756, %447 : vector<1x128xf32>
    %758 = arith.negf %757 : vector<1x128xf32>
    %759 = math.exp %758 : vector<1x128xf32>
    %cst_250 = arith.constant 1.000000e+00 : f32
    %760 = vector.broadcast %cst_250 : f32 to vector<1x128xf32>
    %761 = arith.addf %760, %759 : vector<1x128xf32>
    %762 = arith.divf %760, %761 : vector<1x128xf32>
    %763 = math.tanh %757 : vector<1x128xf32>
    %764 = vector.extract_strided_slice %762 {offsets = [0, 0], sizes = [1, 32], strides = [1, 1]} : vector<1x128xf32> to vector<1x32xf32>
    %765 = vector.extract_strided_slice %762 {offsets = [0, 32], sizes = [1, 32], strides = [1, 1]} : vector<1x128xf32> to vector<1x32xf32>
    %766 = vector.extract_strided_slice %763 {offsets = [0, 64], sizes = [1, 32], strides = [1, 1]} : vector<1x128xf32> to vector<1x32xf32>
    %767 = vector.extract_strided_slice %762 {offsets = [0, 96], sizes = [1, 32], strides = [1, 1]} : vector<1x128xf32> to vector<1x32xf32>
    %768 = arith.mulf %765, %727 : vector<1x32xf32>
    %769 = arith.mulf %764, %766 : vector<1x32xf32>
    %770 = arith.addf %768, %769 : vector<1x32xf32>
    %771 = math.tanh %770 : vector<1x32xf32>
    %772 = arith.mulf %767, %771 : vector<1x32xf32>
    %c6_251 = arith.constant 6 : index
    %c0_252 = arith.constant 0 : index
    %773 = vector.load %arg13[%c6_251, %c0_252] : memref<8x32xf32, #tpu.memory_space<vmem>>, vector<1x32xf32>
    tpu.vector_store %arg13[%c6_251, %c0_252], %772 {strides = array<i32>} : memref<8x32xf32, #tpu.memory_space<vmem>>, vector<1x32xf32>,
    %c0_253 = arith.constant 0 : index
    %c0_254 = arith.constant 0 : index
    %c0_255 = arith.constant 0 : index
    %774 = vector.load %arg6[%c0_253, %c0_254, %c0_255] : memref<2x32x256xf32, #tpu.memory_space<vmem>>, vector<1x32x256xf32>
    %775 = vector.shape_cast %774 : vector<1x32x256xf32> to vector<32x256xf32>
    %cst_256 = arith.constant dense<0.000000e+00> : vector<1x256xf32>
    %776 = tpu.matmul %755, %775, %cst_256 {dimension_numbers = #tpu.dot_dimension_numbers<[1], [0], [0], [1], [0, 0, 1, 1], [], []>} : vector<1x32xf32>, vector<32x256xf32>, vector<1x256xf32> -> vector<1x256xf32>
    %c1_257 = arith.constant 1 : index
    %c0_258 = arith.constant 0 : index
    %c0_259 = arith.constant 0 : index
    %777 = vector.load %arg6[%c1_257, %c0_258, %c0_259] : memref<2x32x256xf32, #tpu.memory_space<vmem>>, vector<1x32x256xf32>
    %778 = vector.shape_cast %777 : vector<1x32x256xf32> to vector<32x256xf32>
    %cst_260 = arith.constant dense<0.000000e+00> : vector<1x256xf32>
    %779 = tpu.matmul %772, %778, %cst_260 {dimension_numbers = #tpu.dot_dimension_numbers<[1], [0], [0], [1], [0, 0, 1, 1], [], []>} : vector<1x32xf32>, vector<32x256xf32>, vector<1x256xf32> -> vector<1x256xf32>
    %780 = arith.addf %776, %779 : vector<1x256xf32>
    %781 = vector.extract_strided_slice %780 {offsets = [0, 128], sizes = [1, 128], strides = [1, 1]} : vector<1x256xf32> to vector<1x128xf32>
    %782 = arith.addf %781, %447 : vector<1x128xf32>
    %783 = arith.negf %782 : vector<1x128xf32>
    %784 = math.exp %783 : vector<1x128xf32>
    %cst_261 = arith.constant 1.000000e+00 : f32
    %785 = vector.broadcast %cst_261 : f32 to vector<1x128xf32>
    %786 = arith.addf %785, %784 : vector<1x128xf32>
    %787 = arith.divf %785, %786 : vector<1x128xf32>
    %788 = math.tanh %782 : vector<1x128xf32>
    %789 = vector.extract_strided_slice %787 {offsets = [0, 0], sizes = [1, 32], strides = [1, 1]} : vector<1x128xf32> to vector<1x32xf32>
    %790 = vector.extract_strided_slice %787 {offsets = [0, 32], sizes = [1, 32], strides = [1, 1]} : vector<1x128xf32> to vector<1x32xf32>
    %791 = vector.extract_strided_slice %788 {offsets = [0, 64], sizes = [1, 32], strides = [1, 1]} : vector<1x128xf32> to vector<1x32xf32>
    %792 = vector.extract_strided_slice %787 {offsets = [0, 96], sizes = [1, 32], strides = [1, 1]} : vector<1x128xf32> to vector<1x32xf32>
    %793 = arith.mulf %790, %770 : vector<1x32xf32>
    %794 = arith.mulf %789, %791 : vector<1x32xf32>
    %795 = arith.addf %793, %794 : vector<1x32xf32>
    %796 = math.tanh %795 : vector<1x32xf32>
    %797 = arith.mulf %792, %796 : vector<1x32xf32>
    %c7_262 = arith.constant 7 : index
    %c0_263 = arith.constant 0 : index
    %798 = vector.load %arg13[%c7_262, %c0_263] : memref<8x32xf32, #tpu.memory_space<vmem>>, vector<1x32xf32>
    tpu.vector_store %arg13[%c7_262, %c0_263], %797 {strides = array<i32>} : memref<8x32xf32, #tpu.memory_space<vmem>>, vector<1x32xf32>,
    %c0_264 = arith.constant 0 : index
    %c0_265 = arith.constant 0 : index
    %799 = vector.load %arg13[%c0_264, %c0_265] : memref<8x32xf32, #tpu.memory_space<vmem>>, vector<8x32xf32>
    %c0_266 = arith.constant 0 : index
    %c0_267 = arith.constant 0 : index
    %800 = vector.load %arg8[%c0_266, %c0_267] : memref<32x128xf32, #tpu.memory_space<vmem>>, vector<32x128xf32>
    %cst_268 = arith.constant dense<0.000000e+00> : vector<8x128xf32>
    %801 = tpu.matmul %799, %800, %cst_268 {dimension_numbers = #tpu.dot_dimension_numbers<[1], [0], [0], [1], [0, 0, 1, 1], [], []>} : vector<8x32xf32>, vector<32x128xf32>, vector<8x128xf32> -> vector<8x128xf32>
    %c0_269 = arith.constant 0 : index
    %c0_270 = arith.constant 0 : index
    %802 = vector.load %arg9[%c0_269, %c0_270] : memref<1x128xf32, #tpu.memory_space<vmem>>, vector<1x128xf32>
    %803 = vector.broadcast %802 : vector<1x128xf32> to vector<8x128xf32>
    %804 = arith.addf %801, %803 : vector<8x128xf32>
    %c0_271 = arith.constant 0 : index
    %c0_272 = arith.constant 0 : index
    %805 = vector.load %arg10[%c0_271, %c0_272] : memref<8x128xf32, #tpu.memory_space<vmem>>, vector<8x128xf32>
    tpu.vector_store %arg10[%c0_271, %c0_272], %804 {strides = array<i32>} : memref<8x128xf32, #tpu.memory_space<vmem>>, vector<8x128xf32>,
    return
  }
}

</mosaic_0001>

<bundles_post_ra>
// kernel: tpu_custom_call.1
= control target key start
LH: loop header
LB: loop body
LE: loop exit
PB: predicated region body
PF: predicated region fallthrough
CT: control target
= control target key end

     0   :  { %15 = vsyncpa [#allocation6], 0  ;;  %s4871_s0 = inlined_call_operand.hbm [shape: f32[10,32], index: 0, kind: input, shape index: {}]   ;;  %s4872_s1 = inlined_call_operand.hbm [shape: f32[8,32], index: 1, kind: input, shape index: {}]   ;;  %s4873_s2 = inlined_call_operand.hbm [shape: f32[32,128], index: 2, kind: input, shape index: {}]   ;;  %s4874_s3 = inlined_call_operand.hbm [shape: f32[2,32,256], index: 3, kind: input, shape index: {}]   ;;  %s4875_s4 = inlined_call_operand.vmem [shape: f32[2,1,128], index: 4, kind: input, shape index: {}]   ;;  %s4876_s5 = inlined_call_operand.hbm [shape: f32[32,128], index: 5, kind: input, shape index: {}]   ;;  %s4877_s6 = inlined_call_operand.hbm [shape: f32[2,32,256], index: 6, kind: input, shape index: {}]   ;;  %s4878_s7 = inlined_call_operand.vmem [shape: f32[2,1,128], index: 7, kind: input, shape index: {}]   ;;  %s4879_s8 = inlined_call_operand.hbm [shape: f32[32,128], index: 8, kind: input, shape index: {}]   ;;  %s4880_s9 = inlined_call_operand.vmem [shape: f32[1,128], index: 9, kind: input, shape index: {}]   ;;  %s4881_s10 = inlined_call_operand.hbm [shape: f32[8,128], index: 10, kind: output, shape index: {}]  }
   0x1   :  { %16 = vsyncpa [#allocation9], 0 }
   0x2   :  { %17 = vsyncpa [#allocation12], 0 }
   0x3   :  { %18 = vsyncpa [#allocation15], 0  ;;  %s38_s15 = sshll.u32 %s4872_s1, 4  ;;  %s39_s15 = int_to_ptr.hbm [resolvable:$true] %s38_s15 }
   0x4   :  { %19 = vsyncpa [#allocation7], 0  ;;  %s4032_s16 = smov [#allocation8]   ;;  %s61_s20 = sshll.u32 %s4874_s3, 4  ;;  %s62_s20 = int_to_ptr.hbm [resolvable:$true] %s61_s20 }
   0x5   :  { %s40_s17 = sshll.u32 %s4032_s16, 4  ;;  %s4033_s21 = smov [#allocation11]   ;;  %s41_s17 = int_to_ptr.vmem [resolvable:$true] %s40_s17 }
   0x6   :  { %43 = dma.hbm_to_vmem [thread:$0]  %s39_s15, 128, %s41_s17, [#allocation9]  }
   0x7   :  { %s63_s22 = sshll.u32 %s4033_s21, 4  ;;  %s4034_s23 = smov 256   ;;  %s64_s22 = int_to_ptr.vmem [resolvable:$true] %s63_s22 }
   0x8   :  { %s4035_s24 = smov 16   ;;  %s89_s1 = sshll.u32 %s4877_s6, 4  ;;  %s90_s1 = int_to_ptr.hbm [resolvable:$true] %s89_s1 }
   0x9   :  { %69 = dma.hbm_to_vmem [thread:$0]  %s62_s20, 2048, %s64_s22, [#allocation12], %s4034_s23, %s4034_s23, %s4035_s24  }
   0xa   :  { %s4036_s27 = smov [#allocation14]   ;;  %s24_s3 = sshll.u32 %s4871_s0, 4  ;;  %s25_s3 = int_to_ptr.hbm [resolvable:$true] %s24_s3 }
   0xb   :  { %s91_s28 = sshll.u32 %s4036_s27, 4  ;;  %s4037_s11 = smov [#allocation5]   ;;  %s92_s28 = int_to_ptr.vmem [resolvable:$true] %s91_s28 }
   0xc   :  { %97 = dma.hbm_to_vmem [thread:$0]  %s90_s1, 2048, %s92_s28, [#allocation15], %s4034_s23, %s4034_s23, %s4035_s24  }
   0xd   :  { %s26_s12 = sshll.u32 %s4037_s11, 4  ;;  %s4038_s13 = smov 128   ;;  %s27_s12 = int_to_ptr.vmem [resolvable:$true] %s26_s12 }
   0xe   :  { %s4039_s14 = smov 8   ;;  %s48_s6 = sshll.u32 %s4873_s2, 4  ;;  %s49_s6 = int_to_ptr.hbm [resolvable:$true] %s48_s6 }
   0xf   :  { %32 = dma.hbm_to_vmem [thread:$0]  %s25_s3, 256, %s27_s12, [#allocation6], %s4038_s13, %s4038_s13, %s4039_s14  }
  0x10   :  { %s4040_s17 = smov [#allocation10]   ;;  %s76_s0 = sshll.u32 %s4876_s5, 4  ;;  %s77_s0 = int_to_ptr.hbm [resolvable:$true] %s76_s0 }
  0x11   :  { %s50_s18 = sshll.u32 %s4040_s17, 4  ;;  %s4041_s21 = smov [#allocation13]   ;;  %s51_s18 = int_to_ptr.vmem [resolvable:$true] %s50_s18 }
  0x12   :  { %56 = dma.hbm_to_vmem [thread:$0]  %s49_s6, 512, %s51_s18, [#allocation9], %s4038_s13, %s4038_s13, %s4039_s14  }
  0x13   :  { %s78_s22 = sshll.u32 %s4041_s21, 4  ;;  %s104_s25 = sshll.u32 %s4879_s8, 4  ;;  %s79_s22 = int_to_ptr.vmem [resolvable:$true] %s78_s22  ;;  %s105_s25 = int_to_ptr.hbm [resolvable:$true] %s104_s25 }
  0x14   :  { %84 = dma.hbm_to_vmem [thread:$0]  %s77_s0, 512, %s79_s22, [#allocation12], %s4038_s13, %s4038_s13, %s4039_s14  }
  0x15   :  { %s4042_s2 = smov [#allocation16]  }
  0x16   :  { %s106_s26 = sshll.u32 %s4042_s2, 4  ;;  %s107_s26 = int_to_ptr.vmem [resolvable:$true] %s106_s26 }
  0x17   :  { %112 = dma.hbm_to_vmem [thread:$0]  %s105_s25, 512, %s107_s26, [#allocation15], %s4038_s13, %s4038_s13, %s4039_s14  }
  0x18   :  { %4022 = dma.done.wait [#allocation6], 256  }
  0x19   :  { %4023 = vsyncadd [#allocation6], 4294967040 }
  0x1a   :  { %4024 = dma.done.wait [#allocation9], 640  }
  0x1b   :  { %4025 = vsyncadd [#allocation9], 4294966656 }
  0x1c   :  { %4026 = dma.done.wait [#allocation12], 2560  }
  0x1d   :  { %4027 = vsyncadd [#allocation12], 4294964736 }
  0x1e   :  { %4028 = dma.done.wait [#allocation15], 2560  }
  0x1f   :  { %4029 = vsyncadd [#allocation15], 4294964736  ;;  %v148_v0 = vld [vmem:[#allocation10 + $0x18] sm:$0xff]  ;;  %v147_v2 = vld [vmem:[#allocation10 + $0x10] sm:$0xff]  ;;  %vm153_vm0 = vcmask 261120   ;;  %v4043_v16 = vmov 0.0  }
  0x20   :  { %v189_v1 = vld [vmem:[#allocation13 + $0x18] sm:$0xff]  ;;  %172 = vmatpush.msra.mxu0 %v148_v0  ;;  %v188_v3 = vld [vmem:[#allocation13 + $0x10] sm:$0xff]  ;;  %v146_v5 = vld [vmem:[#allocation10 + $0x8] sm:$0xff]  ;;  %s4044_s28 = smov 64   ;;  %s4045_s29 = smov 32  }
  0x21   :  { %209 = vmatpush.msra.mxu1 %v189_v1  ;;  %v4123_v4 = vld [vmem:[#allocation11 + $0x70] sm:$0xff]  ;;  %v187_v6 = vld [vmem:[#allocation13 + $0x8] sm:$0xff]  ;;  %v4126_v7 = vld [vmem:[#allocation11 + $0x60] sm:$0xff]  ;;  %s4046_s6 = smov [#allocation17]   ;;  %s3384_s20 = sshll.u32 %s4881_s10, 4  ;;  %s3385_s20 = int_to_ptr.hbm [resolvable:$true] %s3384_s20 }
  0x22   :  { %252 = vmatpush.msra.mxu2 %v4123_v4  ;;  %173 = vmatpush.msra.mxu0 %v147_v2  ;;  %v4128_v8 = vld [vmem:[#allocation11 + $0x50] sm:$0xff]  ;;  %v145_v9 = vld [vmem:[#allocation10] sm:$0xff]  ;;  %v143_v11 = vld [vmem:[#allocation5] sm:$0xff]  ;;  %s3382_s17 = sshll.u32 %s4046_s6, 4  ;;  %s3383_s17 = int_to_ptr.vmem [resolvable:$true] %s3382_s17 }
  0x23   :  { %210 = vmatpush.msra.mxu1 %v188_v3  ;;  %v186_v10 = vld [vmem:[#allocation13] sm:$0xff]  ;;  %v185_v12 = vld [vmem:[#allocation8] sm:$0xff]  ;;  %v4131_v13 = vld [vmem:[#allocation11 + $0x30] sm:$0xff] }
  0x24   :  { %253 = vmatpush.msra.mxu2 %v4126_v7  ;;  %174 = vmatpush.msra.mxu0 %v146_v5  ;;  %v4134_v14 = vld [vmem:[#allocation11 + $0x40] sm:$0xff]  ;;  %v4143_v17 = vld [vmem:[#allocation11 + $0x10] sm:$0xff]  ;;  %v4170_v19 = vld [vmem:[%s4875_s4] ss:$0 sm:$0xff] }
  0x25   :  { %211 = vmatpush.msra.mxu1 %v187_v6  ;;  %v4138_v15 = vld [vmem:[#allocation11 + $0x20] sm:$0xff]  ;;  %v3522_v20 = vld [vmem:[%s4878_s7] ss:$0 sm:$0xff]  ;;  %v4185_v50 = vld [vmem:[#allocation11 + $0x78] sm:$0xff] }
  0x26   :  { %254 = vmatpush.msra.mxu2 %v4128_v8  ;;  %175 = vmatpush.msra.mxu0 %v145_v9  ;;  %v4148_v18 = vld [vmem:[#allocation11] sm:$0xff]  ;;  %v4187_v51 = vld [vmem:[#allocation11 + $0x68] sm:$0xff]  ;;  %v4191_v52 = vld [vmem:[#allocation11 + $0x58] sm:$0xff] }
  0x27   :  { %212 = vmatpush.msra.mxu1 %v186_v10  ;;  %3397 = vmatmul.msk.f32.vlgmr.msra.gmra.mxu0 %vm153_vm0, %v143_v11  ;;  %v4195_v53 = vld [vmem:[#allocation11 + $0x48] sm:$0xff]  ;;  %v4199_v54 = vld [vmem:[#allocation11 + $0x38] sm:$0xff] }
  0x28   :  { %3399 = vmatmul.msk.f32.vlgmr.msra.gmra.mxu1 %vm153_vm0, %v185_v12  ;;  %255 = vmatpush.msra.mxu2 %v4134_v14  ;;  %v4204_v55 = vld [vmem:[#allocation11 + $0x28] sm:$0xff]  ;;  %v4208_v56 = vld [vmem:[#allocation11 + $0x18] sm:$0xff] }
  0x29   :  { %292 = vmatpush.msrb.mxu1 %v4131_v13  ;;  %256 = vmatmul.f32.vlgmr.msra.gmra.mxu2 %v4043_v16  ;;  %v4212_v57 = vld [vmem:[#allocation11 + $0x8] sm:$0xff] }
  0x2a   :  { %478 = vmatpush.msrb.mxu0 %v4123_v4  ;;  %356 = vmatpush.msrb.mxu2 %v4131_v13  ;;  %v4237_v5 = vld [vmem:[%s4875_s4 + $0x1] sm:$0x1] }
  0x2b   :  { %293 = vmatpush.msrb.mxu1 %v4138_v15  ;;  %272 = vmatpush.msra.mxu3 %v4185_v50 }
  0x2c   :  { %479 = vmatpush.msrb.mxu0 %v4126_v7  ;;  %357 = vmatpush.msrb.mxu2 %v4138_v15 }
  0x2d   :  { %294 = vmatpush.msrb.mxu1 %v4143_v17  ;;  %273 = vmatpush.msra.mxu3 %v4187_v51 }
  0x2e   :  { %480 = vmatpush.msrb.mxu0 %v4128_v8  ;;  %358 = vmatpush.msrb.mxu2 %v4143_v17 }
  0x2f   :  { %295 = vmatpush.msrb.mxu1 %v4148_v18  ;;  %274 = vmatpush.msra.mxu3 %v4191_v52 }
  0x30   :  { %296 = vmatmul.f32.vlgmr.msrb.gmra.mxu1 %v4043_v16  ;;  %481 = vmatpush.msrb.mxu0 %v4134_v14 }
  0x31   :  { %359 = vmatpush.msrb.mxu2 %v4148_v18  ;;  %498 = vmatpush.msra.mxu1 %v4185_v50 }
  0x32   :  { %645 = vmatpush.msra.mxu0 %v4123_v4  ;;  %275 = vmatpush.msra.mxu3 %v4195_v53 }
  0x33   :  { %523 = vmatpush.msra.mxu2 %v4131_v13  ;;  %499 = vmatpush.msra.mxu1 %v4187_v51 }
  0x34   :  { %646 = vmatpush.msra.mxu0 %v4126_v7  ;;  %276 = vmatmul.f32.vlgmr.msra.gmra.mxu3 %v4043_v16 }
  0x35   :  { %524 = vmatpush.msra.mxu2 %v4138_v15  ;;  %500 = vmatpush.msra.mxu1 %v4191_v52 }
  0x36   :  { %647 = vmatpush.msra.mxu0 %v4128_v8  ;;  %376 = vmatpush.msrb.mxu3 %v4199_v54 }
  0x37   :  { %525 = vmatpush.msra.mxu2 %v4143_v17  ;;  %501 = vmatpush.msra.mxu1 %v4195_v53 }
  0x38   :  { %648 = vmatpush.msra.mxu0 %v4134_v14  ;;  %377 = vmatpush.msrb.mxu3 %v4204_v55 }
  0x39   :  { %526 = vmatpush.msra.mxu2 %v4148_v18  ;;  %665 = vmatpush.msrb.mxu1 %v4185_v50 }
  0x3a   :  { %378 = vmatpush.msrb.mxu3 %v4208_v56 }
  0x3b   :  { %666 = vmatpush.msrb.mxu1 %v4187_v51 }
  0x3c   :  { %379 = vmatpush.msrb.mxu3 %v4212_v57 }
  0x3d   :  { %667 = vmatpush.msrb.mxu1 %v4191_v52 }
  0x3e   :  { %543 = vmatpush.msra.mxu3 %v4199_v54 }
  0x3f   :  { %668 = vmatpush.msrb.mxu1 %v4195_v53 }
  0x40   :  { %544 = vmatpush.msra.mxu3 %v4204_v55 }
  0x42   :  { %545 = vmatpush.msra.mxu3 %v4208_v56 }
  0x44   :  { %546 = vmatpush.msra.mxu3 %v4212_v57 }
  0xa4   :  { %v177_v21 = vpop.f32.mrf.mxu0 }
  0xa5   :  { %v214_v22 = vpop.f32.mrf.mxu1  ;;  %v178_v23 = vadd.f32 %v4170_v19, %v177_v21 }
  0xa6   :  { %v215_v24 = vadd.f32 %v3522_v20, %v214_v22 }
  0xa7   :  { %183 = vst [vmem:[#allocation2] sm:$0xff] %v178_v23 }
  0xa8   :  { %217 = vst [vmem:[#allocation3] sm:$0xff] %v215_v24 }
  0xac   :  { %v4176_v25 = vpop.f32.mrf.mxu2 }
  0xad   :  { %v297_v26 = vpop.f32.mrf.mxu1 }
  0xae   :  { %v298_v27 = vadd.f32 %v297_v26, %v4176_v25  ;;  %v300_v28 = vld [vmem:[#allocation2] sm:$0x1]  ;;  %v384_v0 = vld [vmem:[#allocation2 + $0x1] sm:$0x1] }
  0xb0   :  { %v301_v29 = vadd.f32 %v300_v28, %v298_v27 }
  0xb2   :  { %3524 = vtanh.f32 %v301_v29  ;;  %v3401_v31 = vmul.f32 -1.442695, %v301_v29 }
  0xb4   :  { %3526 = vpow2.f32 %v3401_v31 }
  0xb7   :  { %v277_v61 = vpop.f32.mrf.mxu3 }
  0xb8   :  { %v3525_v30 = vpop.eup %3524 }
  0xb9   :  { %324 = vrot.lane.b32.xlu0 %v3525_v30, %s4044_s28 }
  0xba   :  { %v3527_v32 = vpop.eup %3526 }
  0xbb   :  { %v305_v33 = vadd.f32 1.0, %v3527_v32 }
  0xbd   :  { %3528 = vrcp.f32 %v305_v33  ;;  %v317_v39 = vand.u32 2147483648, %v305_v33  ;;  %vm311_vm2 = vweird.f32 %v305_v33  ;;  %v315_v40 = vand.u32 2147483647, %v305_v33 }
  0xbf   :  { %v318_v42 = vor.u32 1.1754944e-38, %v317_v39  ;;  %vm316_vm4 = vcmp.eq.f32.partialorder %v315_v40, 8.507059e+37 }
  0xc3   :  { %v3529_v34 = vpop.eup %3528 }
  0xc4   :  { %v307_v35 = vmul.f32 %v3529_v34, %v305_v33  ;;  %vm312_vm1 = vweird.f32 %v3529_v34 }
  0xc5   :  { %vm313_vm3 = vmor %vm311_vm2, %vm312_vm1 }
  0xc6   :  { %v308_v36 = vsub.f32 1.0, %v307_v35 }
  0xc8   :  { %v309_v37 = vmul.f32 %v3529_v34, %v308_v36 }
  0xca   :  { %v310_v38 = vadd.f32 %v3529_v34, %v309_v37 }
  0xcc   :  { %v314_v41 = vsel %vm313_vm3, %v3529_v34, %v310_v38 }
  0xcd   :  { %v319_v44 = vsel %vm316_vm4, %v318_v42, %v314_v41 }
  0xce   :  { %v322_v46 = vmul.f32 0.0, %v319_v44 }
 0x12b   :  { %v325_v43 = vpop.permute.xlu0 %324 }
 0x12c   :  { %v327_v45 = vmul.f32 %v325_v43, %v319_v44 }
 0x12e   :  { %329 = vrot.lane.b32.xlu0 %v327_v45, %s4045_s29 }
 0x1a0   :  { %v330_v47 = vpop.permute.xlu0 %329 }
 0x1a1   :  { %v4181_v48 = vadd.f32 %v330_v47, %v322_v46 }
 0x1a3   :  { %3530 = vtanh.f32 %v4181_v48 }
 0x1a9   :  { %v3531_v49 = vpop.eup %3530 }
 0x1aa   :  { %335 = vrot.lane.b32.xlu1 %v3531_v49, %s4044_s28 }
 0x21c   :  { %v336_v58 = vpop.permute.xlu1 %335 }
 0x21d   :  { %v338_v59 = vmul.f32 %v336_v58, %v319_v44 }
 0x21f   :  { %340 = vrot.lane.b32.xlu1 %v338_v59, %s4045_s29 }
 0x291   :  { %v341_v60 = vpop.permute.xlu1 %340 }
 0x292   :  { %3402 = vmatmul.msk.f32.vlgmr.msrb.gmra.mxu2 %vm153_vm0, %v341_v60  ;;  %3403 = vmatmul.msk.f32.vlgmr.msrb.gmra.mxu3 %vm153_vm0, %v341_v60 }
 0x293   :  { %710 = vmatpush.msrb.mxu3 %v4199_v54  ;;  %690 = vmatpush.msrb.mxu2 %v4131_v13 }
 0x295   :  { %711 = vmatpush.msrb.mxu3 %v4204_v55  ;;  %691 = vmatpush.msrb.mxu2 %v4138_v15 }
 0x297   :  { %712 = vmatpush.msrb.mxu3 %v4208_v56  ;;  %692 = vmatpush.msrb.mxu2 %v4143_v17 }
 0x299   :  { %713 = vmatpush.msrb.mxu3 %v4212_v57  ;;  %693 = vmatpush.msrb.mxu2 %v4148_v18 }
 0x315   :  { %v361_v62 = vpop.f32.mrf.mxu2  ;;  %v381_v1 = vpop.f32.mrf.mxu3 }
 0x316   :  { %v362_v63 = vadd.f32 %v361_v62, %v4176_v25  ;;  %v382_v3 = vadd.f32 %v381_v1, %v277_v61 }
 0x318   :  { %v385_v2 = vadd.f32 %v384_v0, %v362_v63  ;;  %v423_v6 = vadd.f32 %v4237_v5, %v382_v3  ;;  %v144_v3 = vld [vmem:[#allocation5 + $0x8] sm:$0x3] }
 0x319   :  { %3398 = vmatmul.msk.f32.gmra.mxu0 %vm153_vm0, %v144_v3 }
 0x31a   :  { %3532 = vtanh.f32 %v385_v2  ;;  %v3404_v11 = vmul.f32 -1.442695, %v385_v2  ;;  %v3405_v12 = vmul.f32 -1.442695, %v423_v6 }
 0x31b   :  { %3534 = vtanh.f32 %v423_v6 }
 0x31c   :  { %3536 = vpow2.f32 %v3404_v11 }
 0x31d   :  { %3538 = vpow2.f32 %v3405_v12 }
 0x320   :  { %v3533_v9 = vpop.eup %3532 }
 0x321   :  { %408 = vrot.lane.b32.xlu2 %v3533_v9, %s4044_s28  ;;  %v3535_v10 = vpop.eup %3534 }
 0x322   :  { %v3537_v16 = vpop.eup %3536 }
 0x323   :  { %v389_v20 = vadd.f32 1.0, %v3537_v16  ;;  %v3539_v21 = vpop.eup %3538 }
 0x324   :  { %v427_v22 = vadd.f32 1.0, %v3539_v21 }
 0x325   :  { %3540 = vrcp.f32 %v389_v20  ;;  %v401_v31 = vand.u32 2147483648, %v389_v20  ;;  %vm395_vm6 = vweird.f32 %v389_v20  ;;  %v399_v32 = vand.u32 2147483647, %v389_v20 }
 0x326   :  { %3542 = vrcp.f32 %v427_v22  ;;  %v439_v40 = vand.u32 2147483648, %v427_v22  ;;  %vm433_vm10 = vweird.f32 %v427_v22  ;;  %v437_v41 = vand.u32 2147483647, %v427_v22 }
 0x327   :  { %v402_v35 = vor.u32 1.1754944e-38, %v401_v31  ;;  %vm400_vm8 = vcmp.eq.f32.partialorder %v399_v32, 8.507059e+37 }
 0x328   :  { %v440_v43 = vor.u32 1.1754944e-38, %v439_v40  ;;  %vm438_vm12 = vcmp.eq.f32.partialorder %v437_v41, 8.507059e+37 }
 0x329   :  { %446 = vrot.lane.b32.xlu2 %v3535_v10, %s4044_s28 }
 0x32b   :  { %v3541_v23 = vpop.eup %3540 }
 0x32c   :  { %v391_v24 = vmul.f32 %v3541_v23, %v389_v20  ;;  %v3543_v26 = vpop.eup %3542  ;;  %vm396_vm5 = vweird.f32 %v3541_v23 }
 0x32d   :  { %v429_v28 = vmul.f32 %v3543_v26, %v427_v22  ;;  %vm397_vm7 = vmor %vm395_vm6, %vm396_vm5  ;;  %vm434_vm9 = vweird.f32 %v3543_v26 }
 0x32e   :  { %v392_v25 = vsub.f32 1.0, %v391_v24  ;;  %vm435_vm11 = vmor %vm433_vm10, %vm434_vm9  ;;  %v551_v24 = vld [vmem:[#allocation2 + $0x2] sm:$0x1] }
 0x32f   :  { %v430_v30 = vsub.f32 1.0, %v429_v28 }
 0x330   :  { %v393_v27 = vmul.f32 %v3541_v23, %v392_v25 }
 0x331   :  { %v431_v34 = vmul.f32 %v3543_v26, %v430_v30 }
 0x332   :  { %v394_v29 = vadd.f32 %v3541_v23, %v393_v27 }
 0x333   :  { %v432_v39 = vadd.f32 %v3543_v26, %v431_v34 }
 0x334   :  { %v398_v33 = vsel %vm397_vm7, %v3541_v23, %v394_v29 }
 0x335   :  { %v403_v37 = vsel %vm400_vm8, %v402_v35, %v398_v33  ;;  %v436_v42 = vsel %vm435_vm11, %v3543_v26, %v432_v39 }
 0x336   :  { %v441_v44 = vsel %vm438_vm12, %v440_v43, %v436_v42  ;;  %v406_v47 = vmul.f32 %v403_v37, %v4181_v48 }
 0x337   :  { %v444_v59 = vmul.f32 0.0, %v441_v44 }
 0x37b   :  { %v409_v36 = vpop.permute.xlu2 %408 }
 0x37c   :  { %v411_v38 = vmul.f32 %v409_v36, %v403_v37 }
 0x37e   :  { %413 = vrot.lane.b32.xlu0 %v411_v38, %s4045_s29 }
 0x383   :  { %v447_v45 = vpop.permute.xlu2 %446 }
 0x384   :  { %v449_v46 = vmul.f32 %v447_v45, %v441_v44 }
 0x386   :  { %451 = vrot.lane.b32.xlu1 %v449_v46, %s4045_s29 }
 0x396   :  { %v180_v10 = vpop.f32.mrf.mxu0 }
 0x397   :  { %v181_v11 = vadd.f32 %v4170_v19, %v180_v10 }
 0x399   :  { %184 = vst [vmem:[#allocation2 + $0x8] sm:$0x3] %v181_v11 }
 0x3f0   :  { %v414_v49 = vpop.permute.xlu0 %413 }
 0x3f1   :  { %v4245_v58 = vadd.f32 %v414_v49, %v406_v47 }
 0x3f3   :  { %3544 = vtanh.f32 %v4245_v58 }
 0x3f8   :  { %v452_v60 = vpop.permute.xlu1 %451 }
 0x3f9   :  { %v3545_v61 = vpop.eup %3544  ;;  %v4248_v62 = vadd.f32 %v452_v60, %v444_v59 }
 0x3fa   :  { %419 = vrot.lane.b32.xlu2 %v3545_v61, %s4044_s28 }
 0x3fb   :  { %3546 = vtanh.f32 %v4248_v62 }
 0x401   :  { %v3547_v63 = vpop.eup %3546 }
 0x402   :  { %457 = vrot.lane.b32.xlu0 %v3547_v63, %s4044_s28 }
 0x454   :  { %v420_v0 = vpop.permute.xlu2 %419 }
 0x455   :  { %v422_v1 = vmul.f32 %v420_v0, %v403_v37 }
 0x457   :  { %507 = vrot.lane.b32.xlu1 %v422_v1, %s4045_s29 }
 0x474   :  { %v458_v48 = vpop.permute.xlu0 %457 }
 0x475   :  { %v460_v2 = vmul.f32 %v458_v48, %v441_v44 }
 0x477   :  { %462 = vrot.lane.b32.xlu2 %v460_v2, %s4045_s29 }
 0x4c9   :  { %v508_v6 = vpop.permute.xlu1 %507 }
 0x4ca   :  { %3408 = vmatmul.msk.f32.vlgmr.msra.gmra.mxu2 %vm153_vm0, %v508_v6  ;;  %3409 = vmatmul.msk.f32.vlgmr.msra.gmra.mxu3 %vm153_vm0, %v508_v6 }
 0x4cb   :  { %857 = vmatpush.msra.mxu2 %v4131_v13  ;;  %877 = vmatpush.msra.mxu3 %v4199_v54 }
 0x4cd   :  { %858 = vmatpush.msra.mxu2 %v4138_v15  ;;  %878 = vmatpush.msra.mxu3 %v4204_v55 }
 0x4cf   :  { %859 = vmatpush.msra.mxu2 %v4143_v17  ;;  %879 = vmatpush.msra.mxu3 %v4208_v56 }
 0x4d1   :  { %v463_v9 = vpop.permute.xlu2 %462  ;;  %860 = vmatpush.msra.mxu2 %v4148_v18  ;;  %880 = vmatpush.msra.mxu3 %v4212_v57 }
 0x4d2   :  { %3406 = vmatmul.msk.f32.vlgmr.msrb.gmra.mxu0 %vm153_vm0, %v463_v9  ;;  %3407 = vmatmul.msk.f32.vlgmr.msra.gmra.mxu1 %vm153_vm0, %v463_v9 }
 0x4d3   :  { %812 = vmatpush.msrb.mxu0 %v4123_v4  ;;  %832 = vmatpush.msra.mxu1 %v4185_v50 }
 0x4d5   :  { %813 = vmatpush.msrb.mxu0 %v4126_v7  ;;  %833 = vmatpush.msra.mxu1 %v4187_v51 }
 0x4d7   :  { %814 = vmatpush.msrb.mxu0 %v4128_v8  ;;  %834 = vmatpush.msra.mxu1 %v4191_v52 }
 0x4d9   :  { %815 = vmatpush.msrb.mxu0 %v4134_v14  ;;  %835 = vmatpush.msra.mxu1 %v4195_v53 }
 0x54d   :  { %v528_v12 = vpop.f32.mrf.mxu2  ;;  %v548_v16 = vpop.f32.mrf.mxu3 }
 0x54f   :  { %v483_v20 = vpop.f32.mrf.mxu0  ;;  %v503_v21 = vpop.f32.mrf.mxu1 }
 0x550   :  { %v529_v22 = vadd.f32 %v528_v12, %v483_v20  ;;  %v549_v23 = vadd.f32 %v548_v16, %v503_v21 }
 0x552   :  { %v552_v25 = vadd.f32 %v551_v24, %v529_v22  ;;  %v590_v26 = vadd.f32 %v4237_v5, %v549_v23 }
 0x554   :  { %3548 = vtanh.f32 %v552_v25  ;;  %v3410_v19 = vmul.f32 -1.442695, %v552_v25  ;;  %v3411_v29 = vmul.f32 -1.442695, %v590_v26 }
 0x555   :  { %3550 = vtanh.f32 %v590_v26 }
 0x556   :  { %3552 = vpow2.f32 %v3410_v19 }
 0x557   :  { %3554 = vpow2.f32 %v3411_v29 }
 0x55a   :  { %v3549_v27 = vpop.eup %3548 }
 0x55b   :  { %v3551_v28 = vpop.eup %3550  ;;  %575 = vrot.lane.b32.xlu0 %v3549_v27, %s4044_s28 }
 0x55c   :  { %613 = vrot.lane.b32.xlu1 %v3551_v28, %s4044_s28  ;;  %v3553_v30 = vpop.eup %3552 }
 0x55d   :  { %v3555_v31 = vpop.eup %3554  ;;  %v556_v32 = vadd.f32 1.0, %v3553_v30 }
 0x55e   :  { %v594_v33 = vadd.f32 1.0, %v3555_v31  ;;  %v718_v31 = vld [vmem:[#allocation2 + $0x3] sm:$0x1] }
 0x55f   :  { %3556 = vrcp.f32 %v556_v32  ;;  %v568_v44 = vand.u32 2147483648, %v556_v32  ;;  %vm562_vm15 = vweird.f32 %v556_v32  ;;  %v566_v46 = vand.u32 2147483647, %v556_v32 }
 0x560   :  { %3558 = vrcp.f32 %v594_v33  ;;  %v606_v45 = vand.u32 2147483648, %v594_v33  ;;  %vm600_vm1 = vweird.f32 %v594_v33  ;;  %v604_v47 = vand.u32 2147483647, %v594_v33 }
 0x561   :  { %v569_v60 = vor.u32 1.1754944e-38, %v568_v44  ;;  %vm567_vm4 = vcmp.eq.f32.partialorder %v566_v46, 8.507059e+37 }
 0x562   :  { %v607_v61 = vor.u32 1.1754944e-38, %v606_v45  ;;  %vm605_vm5 = vcmp.eq.f32.partialorder %v604_v47, 8.507059e+37 }
 0x565   :  { %v3557_v34 = vpop.eup %3556 }
 0x566   :  { %v3559_v35 = vpop.eup %3558  ;;  %v558_v36 = vmul.f32 %v3557_v34, %v556_v32  ;;  %vm563_vm13 = vweird.f32 %v3557_v34 }
 0x567   :  { %v596_v37 = vmul.f32 %v3559_v35, %v594_v33  ;;  %vm601_vm14 = vweird.f32 %v3559_v35  ;;  %vm564_vm2 = vmor %vm562_vm15, %vm563_vm13 }
 0x568   :  { %v559_v38 = vsub.f32 1.0, %v558_v36  ;;  %vm602_vm3 = vmor %vm600_vm1, %vm601_vm14 }
 0x569   :  { %v597_v39 = vsub.f32 1.0, %v596_v37 }
 0x56a   :  { %v560_v40 = vmul.f32 %v3557_v34, %v559_v38 }
 0x56b   :  { %v598_v41 = vmul.f32 %v3559_v35, %v597_v39 }
 0x56c   :  { %v561_v42 = vadd.f32 %v3557_v34, %v560_v40 }
 0x56d   :  { %v599_v43 = vadd.f32 %v3559_v35, %v598_v41 }
 0x56e   :  { %v565_v49 = vsel %vm564_vm2, %v3557_v34, %v561_v42 }
 0x56f   :  { %v603_v59 = vsel %vm602_vm3, %v3559_v35, %v599_v43  ;;  %v570_v0 = vsel %vm567_vm4, %v569_v60, %v565_v49 }
 0x570   :  { %v608_v48 = vsel %vm605_vm5, %v607_v61, %v603_v59  ;;  %v573_v6 = vmul.f32 %v570_v0, %v4245_v58 }
 0x571   :  { %v611_v12 = vmul.f32 %v608_v48, %v4248_v62 }
 0x5cd   :  { %v576_v63 = vpop.permute.xlu0 %575 }
 0x5ce   :  { %v614_v1 = vpop.permute.xlu1 %613  ;;  %v578_v2 = vmul.f32 %v576_v63, %v570_v0 }
 0x5cf   :  { %v616_v3 = vmul.f32 %v614_v1, %v608_v48 }
 0x5d0   :  { %580 = vrot.lane.b32.xlu2 %v578_v2, %s4045_s29 }
 0x5d1   :  { %618 = vrot.lane.b32.xlu0 %v616_v3, %s4045_s29 }
 0x62a   :  { %v581_v9 = vpop.permute.xlu2 %580 }
 0x62b   :  { %v4283_v10 = vadd.f32 %v581_v9, %v573_v6 }
 0x62d   :  { %3560 = vtanh.f32 %v4283_v10 }
 0x633   :  { %v3561_v11 = vpop.eup %3560 }
 0x634   :  { %586 = vrot.lane.b32.xlu1 %v3561_v11, %s4044_s28 }
 0x643   :  { %v619_v16 = vpop.permute.xlu0 %618 }
 0x644   :  { %v4288_v20 = vadd.f32 %v619_v16, %v611_v12 }
 0x646   :  { %3562 = vtanh.f32 %v4288_v20 }
 0x64c   :  { %v3563_v21 = vpop.eup %3562 }
 0x64d   :  { %624 = vrot.lane.b32.xlu2 %v3563_v21, %s4044_s28 }
 0x6a6   :  { %v587_v22 = vpop.permute.xlu1 %586 }
 0x6a7   :  { %v625_v58 = vpop.permute.xlu2 %624  ;;  %v589_v23 = vmul.f32 %v587_v22, %v570_v0 }
 0x6a8   :  { %v627_v24 = vmul.f32 %v625_v58, %v608_v48 }
 0x6a9   :  { %674 = vrot.lane.b32.xlu0 %v589_v23, %s4045_s29 }
 0x6aa   :  { %629 = vrot.lane.b32.xlu1 %v627_v24, %s4045_s29 }
 0x71b   :  { %v675_v25 = vpop.permute.xlu0 %674 }
 0x71c   :  { %v630_v26 = vpop.permute.xlu1 %629  ;;  %3414 = vmatmul.msk.f32.vlgmr.msrb.gmra.mxu2 %vm153_vm0, %v675_v25  ;;  %3415 = vmatmul.msk.f32.vlgmr.msrb.gmra.mxu3 %vm153_vm0, %v675_v25 }
 0x71d   :  { %3412 = vmatmul.msk.f32.vlgmr.msra.gmra.mxu0 %vm153_vm0, %v630_v26  ;;  %3413 = vmatmul.msk.f32.vlgmr.msrb.gmra.mxu1 %vm153_vm0, %v630_v26 }
 0x71e   :  { %979 = vmatpush.msra.mxu0 %v4123_v4  ;;  %999 = vmatpush.msrb.mxu1 %v4185_v50 }
 0x71f   :  { %1024 = vmatpush.msrb.mxu2 %v4131_v13  ;;  %1044 = vmatpush.msrb.mxu3 %v4199_v54 }
 0x720   :  { %980 = vmatpush.msra.mxu0 %v4126_v7  ;;  %1000 = vmatpush.msrb.mxu1 %v4187_v51 }
 0x721   :  { %1025 = vmatpush.msrb.mxu2 %v4138_v15  ;;  %1045 = vmatpush.msrb.mxu3 %v4204_v55 }
 0x722   :  { %981 = vmatpush.msra.mxu0 %v4128_v8  ;;  %1001 = vmatpush.msrb.mxu1 %v4191_v52 }
 0x723   :  { %1026 = vmatpush.msrb.mxu2 %v4143_v17  ;;  %1046 = vmatpush.msrb.mxu3 %v4208_v56 }
 0x724   :  { %982 = vmatpush.msra.mxu0 %v4134_v14  ;;  %1002 = vmatpush.msrb.mxu1 %v4195_v53 }
 0x725   :  { %1027 = vmatpush.msrb.mxu2 %v4148_v18  ;;  %1047 = vmatpush.msrb.mxu3 %v4212_v57 }
 0x79a   :  { %v650_v62 = vpop.f32.mrf.mxu0  ;;  %v670_v27 = vpop.f32.mrf.mxu1 }
 0x79f   :  { %v695_v28 = vpop.f32.mrf.mxu2  ;;  %v715_v19 = vpop.f32.mrf.mxu3 }
 0x7a0   :  { %v696_v29 = vadd.f32 %v695_v28, %v650_v62  ;;  %v716_v30 = vadd.f32 %v715_v19, %v670_v27 }
 0x7a2   :  { %v719_v32 = vadd.f32 %v718_v31, %v696_v29  ;;  %v757_v33 = vadd.f32 %v4237_v5, %v716_v30 }
 0x7a4   :  { %3564 = vtanh.f32 %v719_v32  ;;  %v3416_v36 = vmul.f32 -1.442695, %v719_v32  ;;  %v3417_v40 = vmul.f32 -1.442695, %v757_v33 }
 0x7a5   :  { %3566 = vtanh.f32 %v757_v33 }
 0x7a6   :  { %3568 = vpow2.f32 %v3416_v36 }
 0x7aa   :  { %v3565_v34 = vpop.eup %3564 }
 0x7ab   :  { %v3567_v35 = vpop.eup %3566  ;;  %742 = vrot.lane.b32.xlu2 %v3565_v34, %s4044_s28 }
 0x7ac   :  { %780 = vrot.lane.b32.xlu0 %v3567_v35, %s4044_s28  ;;  %v3569_v37 = vpop.eup %3568 }
 0x7ad   :  { %v723_v38 = vadd.f32 1.0, %v3569_v37  ;;  %v885_v37 = vld [vmem:[#allocation2 + $0x4] sm:$0x1] }
 0x7af   :  { %3570 = vrcp.f32 %v723_v38  ;;  %v735_v47 = vand.u32 2147483648, %v723_v38  ;;  %vm729_vm7 = vweird.f32 %v723_v38  ;;  %v733_v49 = vand.u32 2147483647, %v723_v38 }
 0x7b0   :  { %3572 = vpow2.f32 %v3417_v40 }
 0x7b1   :  { %v736_v60 = vor.u32 1.1754944e-38, %v735_v47  ;;  %vm734_vm9 = vcmp.eq.f32.partialorder %v733_v49, 8.507059e+37 }
 0x7b5   :  { %v3571_v39 = vpop.eup %3570 }
 0x7b6   :  { %v725_v41 = vmul.f32 %v3571_v39, %v723_v38  ;;  %v3573_v44 = vpop.eup %3572  ;;  %vm730_vm6 = vweird.f32 %v3571_v39 }
 0x7b7   :  { %v761_v45 = vadd.f32 1.0, %v3573_v44  ;;  %vm731_vm8 = vmor %vm729_vm7, %vm730_vm6 }
 0x7b8   :  { %v726_v42 = vsub.f32 1.0, %v725_v41 }
 0x7b9   :  { %3574 = vrcp.f32 %v761_v45  ;;  %v773_v9 = vand.u32 2147483648, %v761_v45  ;;  %vm767_vm11 = vweird.f32 %v761_v45  ;;  %v771_v11 = vand.u32 2147483647, %v761_v45 }
 0x7ba   :  { %v727_v43 = vmul.f32 %v3571_v39, %v726_v42 }
 0x7bb   :  { %v774_v16 = vor.u32 1.1754944e-38, %v773_v9  ;;  %vm772_vm13 = vcmp.eq.f32.partialorder %v771_v11, 8.507059e+37 }
 0x7bc   :  { %v728_v46 = vadd.f32 %v3571_v39, %v727_v43 }
 0x7be   :  { %v732_v59 = vsel %vm731_vm8, %v3571_v39, %v728_v46 }
 0x7bf   :  { %v737_v63 = vsel %vm734_vm9, %v736_v60, %v732_v59  ;;  %v3575_v1 = vpop.eup %3574 }
 0x7c0   :  { %v763_v48 = vmul.f32 %v3575_v1, %v761_v45  ;;  %vm768_vm10 = vweird.f32 %v3575_v1  ;;  %v740_v23 = vmul.f32 %v737_v63, %v4283_v10 }
 0x7c1   :  { %vm769_vm12 = vmor %vm767_vm11, %vm768_vm10 }
 0x7c2   :  { %v764_v2 = vsub.f32 1.0, %v763_v48 }
 0x7c4   :  { %v765_v3 = vmul.f32 %v3575_v1, %v764_v2 }
 0x7c6   :  { %v766_v6 = vadd.f32 %v3575_v1, %v765_v3 }
 0x7c8   :  { %v770_v12 = vsel %vm769_vm12, %v3575_v1, %v766_v6 }
 0x7c9   :  { %v775_v22 = vsel %vm772_vm13, %v774_v16, %v770_v12 }
 0x7ca   :  { %v778_v24 = vmul.f32 %v775_v22, %v4288_v20 }
 0x805   :  { %v743_v61 = vpop.permute.xlu2 %742 }
 0x806   :  { %v745_v0 = vmul.f32 %v743_v61, %v737_v63 }
 0x808   :  { %747 = vrot.lane.b32.xlu1 %v745_v0, %s4045_s29 }
 0x81e   :  { %v781_v21 = vpop.permute.xlu0 %780 }
 0x81f   :  { %v783_v58 = vmul.f32 %v781_v21, %v775_v22 }
 0x821   :  { %785 = vrot.lane.b32.xlu2 %v783_v58, %s4045_s29 }
 0x87a   :  { %v748_v25 = vpop.permute.xlu1 %747 }
 0x87b   :  { %v786_v26 = vpop.permute.xlu2 %785  ;;  %v4321_v62 = vadd.f32 %v748_v25, %v740_v23 }
 0x87c   :  { %v4323_v27 = vadd.f32 %v786_v26, %v778_v24 }
 0x87d   :  { %3576 = vtanh.f32 %v4321_v62 }
 0x87e   :  { %3578 = vtanh.f32 %v4323_v27 }
 0x883   :  { %v3577_v28 = vpop.eup %3576 }
 0x884   :  { %v3579_v19 = vpop.eup %3578  ;;  %753 = vrot.lane.b32.xlu0 %v3577_v28, %s4044_s28 }
 0x885   :  { %791 = vrot.lane.b32.xlu1 %v3579_v19, %s4044_s28 }
 0x8f6   :  { %v754_v29 = vpop.permute.xlu0 %753 }
 0x8f7   :  { %v792_v10 = vpop.permute.xlu1 %791  ;;  %v756_v30 = vmul.f32 %v754_v29, %v737_v63 }
 0x8f8   :  { %v794_v20 = vmul.f32 %v792_v10, %v775_v22 }
 0x8f9   :  { %841 = vrot.lane.b32.xlu2 %v756_v30, %s4045_s29 }
 0x8fa   :  { %796 = vrot.lane.b32.xlu0 %v794_v20, %s4045_s29 }
 0x953   :  { %v842_v31 = vpop.permute.xlu2 %841 }
 0x954   :  { %3420 = vmatmul.msk.f32.vlgmr.msra.gmra.mxu2 %vm153_vm0, %v842_v31  ;;  %3421 = vmatmul.msk.f32.vlgmr.msra.gmra.mxu3 %vm153_vm0, %v842_v31 }
 0x955   :  { %1211 = vmatpush.msra.mxu3 %v4199_v54  ;;  %1191 = vmatpush.msra.mxu2 %v4131_v13 }
 0x957   :  { %1212 = vmatpush.msra.mxu3 %v4204_v55  ;;  %1192 = vmatpush.msra.mxu2 %v4138_v15 }
 0x959   :  { %1213 = vmatpush.msra.mxu3 %v4208_v56  ;;  %1193 = vmatpush.msra.mxu2 %v4143_v17 }
 0x95b   :  { %1214 = vmatpush.msra.mxu3 %v4212_v57  ;;  %1194 = vmatpush.msra.mxu2 %v4148_v18 }
 0x96c   :  { %v797_v32 = vpop.permute.xlu0 %796 }
 0x96d   :  { %3418 = vmatmul.msk.f32.vlgmr.msrb.gmra.mxu0 %vm153_vm0, %v797_v32  ;;  %3419 = vmatmul.msk.f32.vlgmr.msra.gmra.mxu1 %vm153_vm0, %v797_v32 }
 0x96e   :  { %1146 = vmatpush.msrb.mxu0 %v4123_v4  ;;  %1166 = vmatpush.msra.mxu1 %v4185_v50 }
 0x970   :  { %1147 = vmatpush.msrb.mxu0 %v4126_v7  ;;  %1167 = vmatpush.msra.mxu1 %v4187_v51 }
 0x972   :  { %1148 = vmatpush.msrb.mxu0 %v4128_v8  ;;  %1168 = vmatpush.msra.mxu1 %v4191_v52 }
 0x974   :  { %1149 = vmatpush.msrb.mxu0 %v4134_v14  ;;  %1169 = vmatpush.msra.mxu1 %v4195_v53 }
 0x9d7   :  { %v862_v13 = vpop.f32.mrf.mxu2  ;;  %v882_v33 = vpop.f32.mrf.mxu3 }
 0x9ea   :  { %v817_v34 = vpop.f32.mrf.mxu0  ;;  %v837_v35 = vpop.f32.mrf.mxu1 }
 0x9eb   :  { %v863_v36 = vadd.f32 %v862_v13, %v817_v34  ;;  %v883_v4 = vadd.f32 %v882_v33, %v837_v35  ;;  %v4374_v35 = vld [vmem:[#allocation11 + $0x60] sm:$0xff] }
 0x9ed   :  { %v886_v38 = vadd.f32 %v885_v37, %v863_v36  ;;  %v924_v7 = vadd.f32 %v4237_v5, %v883_v4  ;;  %v4378_v36 = vld [vmem:[#allocation11 + $0x50] sm:$0xff]  ;;  %v4382_v4 = vld [vmem:[#allocation11 + $0x40] sm:$0xff] }
 0x9ef   :  { %3580 = vtanh.f32 %v886_v38  ;;  %v3423_v14 = vmul.f32 -1.442695, %v924_v7  ;;  %v3422_v43 = vmul.f32 -1.442695, %v886_v38 }
 0x9f0   :  { %3582 = vtanh.f32 %v924_v7 }
 0x9f1   :  { %3584 = vpow2.f32 %v3423_v14 }
 0x9f5   :  { %v3581_v39 = vpop.eup %3580 }
 0x9f6   :  { %v3583_v8 = vpop.eup %3582  ;;  %909 = vrot.lane.b32.xlu1 %v3581_v39, %s4044_s28 }
 0x9f7   :  { %947 = vrot.lane.b32.xlu2 %v3583_v8, %s4044_s28  ;;  %v3585_v40 = vpop.eup %3584  ;;  %v1052_v8 = vld [vmem:[#allocation2 + $0x5] sm:$0x1] }
 0x9f8   :  { %v928_v41 = vadd.f32 1.0, %v3585_v40 }
 0x9fa   :  { %3586 = vrcp.f32 %v928_v41  ;;  %v940_v60 = vand.u32 2147483648, %v928_v41  ;;  %vm934_vm15 = vweird.f32 %v928_v41  ;;  %v938_v61 = vand.u32 2147483647, %v928_v41 }
 0x9fb   :  { %3588 = vpow2.f32 %v3422_v43 }
 0x9fc   :  { %v941_v0 = vor.u32 1.1754944e-38, %v940_v60  ;;  %vm939_vm2 = vcmp.eq.f32.partialorder %v938_v61, 8.507059e+37 }
 0xa00   :  { %v3587_v42 = vpop.eup %3586 }
 0xa01   :  { %v930_v44 = vmul.f32 %v3587_v42, %v928_v41  ;;  %v3589_v46 = vpop.eup %3588  ;;  %vm935_vm14 = vweird.f32 %v3587_v42 }
 0xa02   :  { %v890_v49 = vadd.f32 1.0, %v3589_v46  ;;  %vm936_vm1 = vmor %vm934_vm15, %vm935_vm14 }
 0xa03   :  { %v931_v45 = vsub.f32 1.0, %v930_v44 }
 0xa04   :  { %3590 = vrcp.f32 %v890_v49  ;;  %v902_v16 = vand.u32 2147483648, %v890_v49  ;;  %vm896_vm4 = vweird.f32 %v890_v49  ;;  %v900_v21 = vand.u32 2147483647, %v890_v49 }
 0xa05   :  { %v932_v47 = vmul.f32 %v3587_v42, %v931_v45 }
 0xa06   :  { %v903_v58 = vor.u32 1.1754944e-38, %v902_v16  ;;  %vm901_vm6 = vcmp.eq.f32.partialorder %v900_v21, 8.507059e+37 }
 0xa07   :  { %v933_v59 = vadd.f32 %v3587_v42, %v932_v47 }
 0xa09   :  { %v937_v63 = vsel %vm936_vm1, %v3587_v42, %v933_v59 }
 0xa0a   :  { %v942_v48 = vsel %vm939_vm2, %v941_v0, %v937_v63  ;;  %v3591_v2 = vpop.eup %3590 }
 0xa0b   :  { %v892_v6 = vmul.f32 %v3591_v2, %v890_v49  ;;  %vm897_vm3 = vweird.f32 %v3591_v2  ;;  %v945_v26 = vmul.f32 %v942_v48, %v4323_v27 }
 0xa0c   :  { %vm898_vm5 = vmor %vm896_vm4, %vm897_vm3 }
 0xa0d   :  { %v893_v9 = vsub.f32 1.0, %v892_v6 }
 0xa0f   :  { %v894_v11 = vmul.f32 %v3591_v2, %v893_v9 }
 0xa11   :  { %v895_v12 = vadd.f32 %v3591_v2, %v894_v11 }
 0xa13   :  { %v899_v22 = vsel %vm898_vm5, %v3591_v2, %v895_v12 }
 0xa14   :  { %v904_v24 = vsel %vm901_vm6, %v903_v58, %v899_v22 }
 0xa15   :  { %v907_v10 = vmul.f32 %v904_v24, %v4321_v62  ;;  %v4370_v62 = vld [vmem:[#allocation11 + $0x70] sm:$0xff] }
 0xa51   :  { %v948_v1 = vpop.permute.xlu2 %947 }
 0xa52   :  { %v950_v3 = vmul.f32 %v948_v1, %v942_v48 }
 0xa54   :  { %952 = vrot.lane.b32.xlu1 %v950_v3, %s4045_s29 }
 0xa68   :  { %v910_v23 = vpop.permute.xlu1 %909 }
 0xa69   :  { %v912_v25 = vmul.f32 %v910_v23, %v904_v24 }
 0xa6b   :  { %914 = vrot.lane.b32.xlu0 %v912_v25, %s4045_s29 }
 0xac6   :  { %v953_v28 = vpop.permute.xlu1 %952 }
 0xac7   :  { %v4357_v19 = vadd.f32 %v953_v28, %v945_v26 }
 0xac9   :  { %3592 = vtanh.f32 %v4357_v19 }
 0xacf   :  { %v3593_v29 = vpop.eup %3592 }
 0xad0   :  { %958 = vrot.lane.b32.xlu0 %v3593_v29, %s4044_s28 }
 0xadd   :  { %v915_v30 = vpop.permute.xlu0 %914 }
 0xade   :  { %v4362_v20 = vadd.f32 %v915_v30, %v907_v10 }
 0xae0   :  { %3594 = vtanh.f32 %v4362_v20 }
 0xae6   :  { %v3595_v31 = vpop.eup %3594 }
 0xae7   :  { %920 = vrot.lane.b32.xlu2 %v3595_v31, %s4044_s28 }
 0xb41   :  { %v921_v32 = vpop.permute.xlu2 %920 }
 0xb42   :  { %v959_v27 = vpop.permute.xlu0 %958  ;;  %v923_v13 = vmul.f32 %v921_v32, %v904_v24 }
 0xb43   :  { %v961_v33 = vmul.f32 %v959_v27, %v942_v48 }
 0xb44   :  { %1008 = vrot.lane.b32.xlu1 %v923_v13, %s4045_s29 }
 0xb45   :  { %963 = vrot.lane.b32.xlu2 %v961_v33, %s4045_s29 }
 0xb9f   :  { %v964_v34 = vpop.permute.xlu2 %963 }
 0xba0   :  { %3424 = vmatmul.msk.f32.vlgmr.msra.gmra.mxu0 %vm153_vm0, %v964_v34  ;;  %3425 = vmatmul.msk.f32.vlgmr.msrb.gmra.mxu1 %vm153_vm0, %v964_v34  ;;  %v4424_v34 = vld [vmem:[#allocation11 + $0x38] sm:$0xff] }
 0xba1   :  { %1313 = vmatpush.msra.mxu0 %v4370_v62  ;;  %1333 = vmatpush.msrb.mxu1 %v4185_v50  ;;  %v4388_v50 = vld [vmem:[#allocation11 + $0x30] sm:$0xff] }
 0xba3   :  { %1314 = vmatpush.msra.mxu0 %v4374_v35  ;;  %1334 = vmatpush.msrb.mxu1 %v4187_v51 }
 0xba5   :  { %1315 = vmatpush.msra.mxu0 %v4378_v36  ;;  %1335 = vmatpush.msrb.mxu1 %v4191_v52 }
 0xba7   :  { %1316 = vmatpush.msra.mxu0 %v4382_v4  ;;  %1336 = vmatpush.msrb.mxu1 %v4195_v53 }
 0xbb6   :  { %v1009_v37 = vpop.permute.xlu1 %1008 }
 0xbb7   :  { %3426 = vmatmul.msk.f32.vlgmr.msrb.gmra.mxu2 %vm153_vm0, %v1009_v37  ;;  %3427 = vmatmul.msk.f32.vlgmr.msrb.gmra.mxu3 %vm153_vm0, %v1009_v37  ;;  %v4428_v37 = vld [vmem:[#allocation11 + $0x68] sm:$0xff] }
 0xbb8   :  { %1358 = vmatpush.msrb.mxu2 %v4388_v50  ;;  %1378 = vmatpush.msrb.mxu3 %v4199_v54 }
 0xbba   :  { %1359 = vmatpush.msrb.mxu2 %v4138_v15  ;;  %1379 = vmatpush.msrb.mxu3 %v4204_v55 }
 0xbbc   :  { %1360 = vmatpush.msrb.mxu2 %v4143_v17  ;;  %1380 = vmatpush.msrb.mxu3 %v4208_v56 }
 0xbbe   :  { %1361 = vmatpush.msrb.mxu2 %v4148_v18  ;;  %1381 = vmatpush.msrb.mxu3 %v4212_v57 }
 0xc1d   :  { %v984_v51 = vpop.f32.mrf.mxu0  ;;  %v1004_v52 = vpop.f32.mrf.mxu1 }
 0xc3a   :  { %v1029_v53 = vpop.f32.mrf.mxu2  ;;  %v1049_v38 = vpop.f32.mrf.mxu3 }
 0xc3b   :  { %v1030_v7 = vadd.f32 %v1029_v53, %v984_v51  ;;  %v1050_v39 = vadd.f32 %v1049_v38, %v1004_v52  ;;  %v4431_v51 = vld [vmem:[#allocation11 + $0x20] sm:$0xff]  ;;  %v4434_v52 = vld [vmem:[#allocation11 + $0x28] sm:$0xff]  ;;  %v4438_v53 = vld [vmem:[#allocation11 + $0x58] sm:$0xff] }
 0xc3c   :  { %v4441_v38 = vld [vmem:[#allocation11 + $0x10] sm:$0xff] }
 0xc3d   :  { %v1053_v54 = vadd.f32 %v1052_v8, %v1030_v7  ;;  %v1091_v15 = vadd.f32 %v4237_v5, %v1050_v39  ;;  %v4444_v7 = vld [vmem:[#allocation11 + $0x18] sm:$0xff]  ;;  %v4448_v39 = vld [vmem:[#allocation11 + $0x48] sm:$0xff]  ;;  %v4451_v8 = vld [vmem:[#allocation11] sm:$0xff] }
 0xc3f   :  { %3596 = vtanh.f32 %v1053_v54  ;;  %v3428_v18 = vmul.f32 -1.442695, %v1053_v54  ;;  %v3429_v56 = vmul.f32 -1.442695, %v1091_v15  ;;  %v4454_v54 = vld [vmem:[#allocation11 + $0x8] sm:$0xff] }
 0xc40   :  { %3598 = vtanh.f32 %v1091_v15 }
 0xc41   :  { %3600 = vpow2.f32 %v3428_v18 }
 0xc42   :  { %3602 = vpow2.f32 %v3429_v56 }
 0xc45   :  { %v3597_v55 = vpop.eup %3596 }
 0xc46   :  { %v3599_v17 = vpop.eup %3598  ;;  %1076 = vrot.lane.b32.xlu0 %v3597_v55, %s4044_s28 }
 0xc47   :  { %1114 = vrot.lane.b32.xlu1 %v3599_v17, %s4044_s28  ;;  %v3601_v57 = vpop.eup %3600 }
 0xc48   :  { %v3603_v14 = vpop.eup %3602  ;;  %v1057_v40 = vadd.f32 1.0, %v3601_v57 }
 0xc49   :  { %v1095_v41 = vadd.f32 1.0, %v3603_v14  ;;  %v1219_v14 = vld [vmem:[#allocation2 + $0x6] sm:$0x1] }
 0xc4a   :  { %3604 = vrcp.f32 %v1057_v40  ;;  %v1069_v63 = vand.u32 2147483648, %v1057_v40  ;;  %vm1063_vm9 = vweird.f32 %v1057_v40  ;;  %v1067_v1 = vand.u32 2147483647, %v1057_v40 }
 0xc4b   :  { %3606 = vrcp.f32 %v1095_v41  ;;  %v1107_v0 = vand.u32 2147483648, %v1095_v41  ;;  %vm1101_vm10 = vweird.f32 %v1095_v41  ;;  %v1105_v48 = vand.u32 2147483647, %v1095_v41 }
 0xc4c   :  { %v1070_v6 = vor.u32 1.1754944e-38, %v1069_v63  ;;  %vm1068_vm13 = vcmp.eq.f32.partialorder %v1067_v1, 8.507059e+37 }
 0xc4d   :  { %v1108_v9 = vor.u32 1.1754944e-38, %v1107_v0  ;;  %vm1106_vm14 = vcmp.eq.f32.partialorder %v1105_v48, 8.507059e+37 }
 0xc50   :  { %v3605_v42 = vpop.eup %3604 }
 0xc51   :  { %v3607_v43 = vpop.eup %3606  ;;  %v1059_v44 = vmul.f32 %v3605_v42, %v1057_v40  ;;  %vm1064_vm7 = vweird.f32 %v3605_v42 }
 0xc52   :  { %v1097_v45 = vmul.f32 %v3607_v43, %v1095_v41  ;;  %vm1102_vm8 = vweird.f32 %v3607_v43  ;;  %vm1065_vm11 = vmor %vm1063_vm9, %vm1064_vm7 }
 0xc53   :  { %v1060_v46 = vsub.f32 1.0, %v1059_v44  ;;  %vm1103_vm12 = vmor %vm1101_vm10, %vm1102_vm8 }
 0xc54   :  { %v1098_v47 = vsub.f32 1.0, %v1097_v45 }
 0xc55   :  { %v1061_v49 = vmul.f32 %v3605_v42, %v1060_v46 }
 0xc56   :  { %v1099_v59 = vmul.f32 %v3607_v43, %v1098_v47 }
 0xc57   :  { %v1062_v60 = vadd.f32 %v3605_v42, %v1061_v49 }
 0xc58   :  { %v1100_v61 = vadd.f32 %v3607_v43, %v1099_v59 }
 0xc59   :  { %v1066_v2 = vsel %vm1065_vm11, %v3605_v42, %v1062_v60 }
 0xc5a   :  { %v1104_v3 = vsel %vm1103_vm12, %v3607_v43, %v1100_v61  ;;  %v1071_v12 = vsel %vm1068_vm13, %v1070_v6, %v1066_v2 }
 0xc5b   :  { %v1109_v21 = vsel %vm1106_vm14, %v1108_v9, %v1104_v3  ;;  %v1074_v23 = vmul.f32 %v1071_v12, %v4362_v20 }
 0xc5c   :  { %v1112_v28 = vmul.f32 %v1109_v21, %v4357_v19  ;;  %v4420_v19 = vld [vmem:[#allocation11 + $0x78] sm:$0xff] }
 0xcb8   :  { %v1077_v11 = vpop.permute.xlu0 %1076 }
 0xcb9   :  { %v1115_v16 = vpop.permute.xlu1 %1114  ;;  %v1079_v22 = vmul.f32 %v1077_v11, %v1071_v12 }
 0xcba   :  { %v1117_v58 = vmul.f32 %v1115_v16, %v1109_v21 }
 0xcbb   :  { %1081 = vrot.lane.b32.xlu2 %v1079_v22, %s4045_s29 }
 0xcbc   :  { %1119 = vrot.lane.b32.xlu0 %v1117_v58, %s4045_s29 }
 0xd15   :  { %v1082_v24 = vpop.permute.xlu2 %1081 }
 0xd16   :  { %v4404_v25 = vadd.f32 %v1082_v24, %v1074_v23 }
 0xd18   :  { %3608 = vtanh.f32 %v4404_v25 }
 0xd1e   :  { %v3609_v26 = vpop.eup %3608 }
 0xd1f   :  { %1087 = vrot.lane.b32.xlu1 %v3609_v26, %s4044_s28 }
 0xd2e   :  { %v1120_v29 = vpop.permute.xlu0 %1119 }
 0xd2f   :  { %v4409_v10 = vadd.f32 %v1120_v29, %v1112_v28 }
 0xd31   :  { %3610 = vtanh.f32 %v4409_v10 }
 0xd37   :  { %v3611_v30 = vpop.eup %3610 }
 0xd38   :  { %1125 = vrot.lane.b32.xlu2 %v3611_v30, %s4044_s28 }
 0xd91   :  { %v1088_v31 = vpop.permute.xlu1 %1087 }
 0xd92   :  { %v1126_v20 = vpop.permute.xlu2 %1125  ;;  %v1090_v32 = vmul.f32 %v1088_v31, %v1071_v12 }
 0xd93   :  { %v1128_v27 = vmul.f32 %v1126_v20, %v1109_v21 }
 0xd94   :  { %1175 = vrot.lane.b32.xlu0 %v1090_v32, %s4045_s29 }
 0xd95   :  { %1130 = vrot.lane.b32.xlu1 %v1128_v27, %s4045_s29 }
 0xe06   :  { %v1176_v13 = vpop.permute.xlu0 %1175 }
 0xe07   :  { %v1131_v33 = vpop.permute.xlu1 %1130  ;;  %3432 = vmatmul.msk.f32.vlgmr.msra.gmra.mxu2 %vm153_vm0, %v1176_v13  ;;  %3433 = vmatmul.msk.f32.vlgmr.msra.gmra.mxu3 %vm153_vm0, %v1176_v13 }
 0xe08   :  { %3430 = vmatmul.msk.f32.vlgmr.msrb.gmra.mxu0 %vm153_vm0, %v1131_v33  ;;  %3431 = vmatmul.msk.f32.vlgmr.msra.gmra.mxu1 %vm153_vm0, %v1131_v33 }
 0xe09   :  { %1480 = vmatpush.msrb.mxu0 %v4370_v62  ;;  %1500 = vmatpush.msra.mxu1 %v4420_v19 }
 0xe0a   :  { %1525 = vmatpush.msra.mxu2 %v4388_v50  ;;  %1545 = vmatpush.msra.mxu3 %v4424_v34 }
 0xe0b   :  { %1481 = vmatpush.msrb.mxu0 %v4374_v35  ;;  %1501 = vmatpush.msra.mxu1 %v4428_v37 }
 0xe0c   :  { %1526 = vmatpush.msra.mxu2 %v4431_v51  ;;  %1546 = vmatpush.msra.mxu3 %v4434_v52 }
 0xe0d   :  { %1482 = vmatpush.msrb.mxu0 %v4378_v36  ;;  %1502 = vmatpush.msra.mxu1 %v4438_v53 }
 0xe0e   :  { %1527 = vmatpush.msra.mxu2 %v4441_v38  ;;  %1547 = vmatpush.msra.mxu3 %v4444_v7 }
 0xe0f   :  { %1483 = vmatpush.msrb.mxu0 %v4382_v4  ;;  %1503 = vmatpush.msra.mxu1 %v4448_v39 }
 0xe10   :  { %1528 = vmatpush.msra.mxu2 %v4451_v8  ;;  %1548 = vmatpush.msra.mxu3 %v4454_v54 }
 0xe85   :  { %v1151_v15 = vpop.f32.mrf.mxu0  ;;  %v1171_v55 = vpop.f32.mrf.mxu1 }
 0xe8a   :  { %v1196_v17 = vpop.f32.mrf.mxu2  ;;  %v1216_v18 = vpop.f32.mrf.mxu3 }
 0xe8b   :  { %v1197_v56 = vadd.f32 %v1196_v17, %v1151_v15  ;;  %v1217_v57 = vadd.f32 %v1216_v18, %v1171_v55 }
 0xe8d   :  { %v1220_v40 = vadd.f32 %v1219_v14, %v1197_v56  ;;  %v1258_v41 = vadd.f32 %v4237_v5, %v1217_v57 }
 0xe8f   :  { %3612 = vtanh.f32 %v1220_v40  ;;  %v3434_v44 = vmul.f32 -1.442695, %v1220_v40  ;;  %v3435_v49 = vmul.f32 -1.442695, %v1258_v41 }
 0xe90   :  { %3614 = vtanh.f32 %v1258_v41  ;;  %v1386_v41 = vld [vmem:[#allocation2 + $0x7] sm:$0x1] }
 0xe91   :  { %3616 = vpow2.f32 %v3434_v44 }
 0xe95   :  { %v3613_v42 = vpop.eup %3612 }
 0xe96   :  { %v3615_v43 = vpop.eup %3614  ;;  %1243 = vrot.lane.b32.xlu2 %v3613_v42, %s4044_s28 }
 0xe97   :  { %1281 = vrot.lane.b32.xlu0 %v3615_v43, %s4044_s28  ;;  %v3617_v45 = vpop.eup %3616 }
 0xe98   :  { %v1224_v46 = vadd.f32 1.0, %v3617_v45 }
 0xe9a   :  { %3618 = vrcp.f32 %v1224_v46  ;;  %v1236_v1 = vand.u32 2147483648, %v1224_v46  ;;  %vm1230_vm1 = vweird.f32 %v1224_v46  ;;  %v1234_v48 = vand.u32 2147483647, %v1224_v46 }
 0xe9b   :  { %3620 = vpow2.f32 %v3435_v49 }
 0xe9c   :  { %v1237_v3 = vor.u32 1.1754944e-38, %v1236_v1  ;;  %vm1235_vm3 = vcmp.eq.f32.partialorder %v1234_v48, 8.507059e+37 }
 0xea0   :  { %v3619_v47 = vpop.eup %3618 }
 0xea1   :  { %v1226_v59 = vmul.f32 %v3619_v47, %v1224_v46  ;;  %v3621_v5 = vpop.eup %3620  ;;  %vm1231_vm15 = vweird.f32 %v3619_v47 }
 0xea2   :  { %v1262_v63 = vadd.f32 1.0, %v3621_v5  ;;  %vm1232_vm2 = vmor %vm1230_vm1, %vm1231_vm15 }
 0xea3   :  { %v1227_v60 = vsub.f32 1.0, %v1226_v59 }
 0xea4   :  { %3622 = vrcp.f32 %v1262_v63  ;;  %v1274_v23 = vand.u32 2147483648, %v1262_v63  ;;  %vm1268_vm5 = vweird.f32 %v1262_v63  ;;  %v1272_v24 = vand.u32 2147483647, %v1262_v63 }
 0xea5   :  { %v1228_v61 = vmul.f32 %v3619_v47, %v1227_v60 }
 0xea6   :  { %v1275_v28 = vor.u32 1.1754944e-38, %v1274_v23  ;;  %vm1273_vm7 = vcmp.eq.f32.partialorder %v1272_v24, 8.507059e+37 }
 0xea7   :  { %v1229_v0 = vadd.f32 %v3619_v47, %v1228_v61 }
 0xea9   :  { %v1233_v2 = vsel %vm1232_vm2, %v3619_v47, %v1229_v0 }
 0xeaa   :  { %v1238_v9 = vsel %vm1235_vm3, %v1237_v3, %v1233_v2  ;;  %v3623_v12 = vpop.eup %3622 }
 0xeab   :  { %v1264_v16 = vmul.f32 %v3623_v12, %v1262_v63  ;;  %vm1269_vm4 = vweird.f32 %v3623_v12  ;;  %v1241_v20 = vmul.f32 %v1238_v9, %v4404_v25 }
 0xeac   :  { %vm1270_vm6 = vmor %vm1268_vm5, %vm1269_vm4 }
 0xead   :  { %v1265_v21 = vsub.f32 1.0, %v1264_v16 }
 0xeaf   :  { %v1266_v22 = vmul.f32 %v3623_v12, %v1265_v21 }
 0xeb1   :  { %v1267_v58 = vadd.f32 %v3623_v12, %v1266_v22 }
 0xeb3   :  { %v1271_v26 = vsel %vm1270_vm6, %v3623_v12, %v1267_v58 }
 0xeb4   :  { %v1276_v30 = vsel %vm1273_vm7, %v1275_v28, %v1271_v26 }
 0xeb5   :  { %v1279_v32 = vmul.f32 %v1276_v30, %v4409_v10 }
 0xef0   :  { %v1244_v6 = vpop.permute.xlu2 %1243 }
 0xef1   :  { %v1246_v11 = vmul.f32 %v1244_v6, %v1238_v9 }
 0xef3   :  { %1248 = vrot.lane.b32.xlu1 %v1246_v11, %s4045_s29 }
 0xf09   :  { %v1282_v29 = vpop.permute.xlu0 %1281 }
 0xf0a   :  { %v1284_v31 = vmul.f32 %v1282_v29, %v1276_v30 }
 0xf0c   :  { %1286 = vrot.lane.b32.xlu2 %v1284_v31, %s4045_s29 }
 0xf65   :  { %v1249_v27 = vpop.permute.xlu1 %1248 }
 0xf66   :  { %v1287_v13 = vpop.permute.xlu2 %1286  ;;  %v4464_v33 = vadd.f32 %v1249_v27, %v1241_v20 }
 0xf67   :  { %v4466_v15 = vadd.f32 %v1287_v13, %v1279_v32 }
 0xf68   :  { %3624 = vtanh.f32 %v4464_v33 }
 0xf69   :  { %3626 = vtanh.f32 %v4466_v15 }
 0xf6e   :  { %v3625_v55 = vpop.eup %3624 }
 0xf6f   :  { %v3627_v17 = vpop.eup %3626  ;;  %1254 = vrot.lane.b32.xlu0 %v3625_v55, %s4044_s28 }
 0xf70   :  { %1292 = vrot.lane.b32.xlu1 %v3627_v17, %s4044_s28 }
 0xfe1   :  { %v1255_v18 = vpop.permute.xlu0 %1254 }
 0xfe2   :  { %v1293_v25 = vpop.permute.xlu1 %1292  ;;  %v1257_v56 = vmul.f32 %v1255_v18, %v1238_v9 }
 0xfe3   :  { %v1295_v10 = vmul.f32 %v1293_v25, %v1276_v30 }
 0xfe4   :  { %1342 = vrot.lane.b32.xlu2 %v1257_v56, %s4045_s29 }
 0xfe5   :  { %1297 = vrot.lane.b32.xlu0 %v1295_v10, %s4045_s29 }
0x103e   :  { %v1343_v57 = vpop.permute.xlu2 %1342 }
0x103f   :  { %3438 = vmatmul.msk.f32.vlgmr.msrb.gmra.mxu2 %vm153_vm0, %v1343_v57  ;;  %3439 = vmatmul.msk.f32.vlgmr.msrb.gmra.mxu3 %vm153_vm0, %v1343_v57 }
0x1040   :  { %1692 = vmatpush.msrb.mxu2 %v4388_v50  ;;  %1712 = vmatpush.msrb.mxu3 %v4424_v34 }
0x1042   :  { %1693 = vmatpush.msrb.mxu2 %v4431_v51  ;;  %1713 = vmatpush.msrb.mxu3 %v4434_v52 }
0x1044   :  { %1694 = vmatpush.msrb.mxu2 %v4441_v38  ;;  %1714 = vmatpush.msrb.mxu3 %v4444_v7 }
0x1046   :  { %1695 = vmatpush.msrb.mxu2 %v4451_v8  ;;  %1715 = vmatpush.msrb.mxu3 %v4454_v54 }
0x1057   :  { %v1298_v14 = vpop.permute.xlu0 %1297 }
0x1058   :  { %3436 = vmatmul.msk.f32.vlgmr.msra.gmra.mxu0 %vm153_vm0, %v1298_v14  ;;  %3437 = vmatmul.msk.f32.vlgmr.msrb.gmra.mxu1 %vm153_vm0, %v1298_v14 }
0x1059   :  { %1647 = vmatpush.msra.mxu0 %v4370_v62  ;;  %1667 = vmatpush.msrb.mxu1 %v4420_v19 }
0x105b   :  { %1648 = vmatpush.msra.mxu0 %v4374_v35  ;;  %1668 = vmatpush.msrb.mxu1 %v4428_v37  ;;  %v4497_v35 = vld [vmem:[%s4875_s4 + $0x1] sm:$0x1] }
0x105d   :  { %1649 = vmatpush.msra.mxu0 %v4378_v36  ;;  %1669 = vmatpush.msrb.mxu1 %v4438_v53 }
0x105f   :  { %1650 = vmatpush.msra.mxu0 %v4382_v4  ;;  %1670 = vmatpush.msrb.mxu1 %v4448_v39 }
0x10c2   :  { %v1363_v50 = vpop.f32.mrf.mxu2  ;;  %v1383_v51 = vpop.f32.mrf.mxu3 }
0x10d5   :  { %v1318_v38 = vpop.f32.mrf.mxu0  ;;  %v1338_v8 = vpop.f32.mrf.mxu1 }
0x10d6   :  { %v1364_v40 = vadd.f32 %v1363_v50, %v1318_v38  ;;  %v1384_v62 = vadd.f32 %v1383_v51, %v1338_v8 }
0x10d8   :  { %v1387_v42 = vadd.f32 %v1386_v41, %v1364_v40  ;;  %v1425_v36 = vadd.f32 %v4497_v35, %v1384_v62 }
0x10da   :  { %3628 = vtanh.f32 %v1387_v42  ;;  %v3441_v44 = vmul.f32 -1.442695, %v1425_v36  ;;  %v3440_v49 = vmul.f32 -1.442695, %v1387_v42 }
0x10db   :  { %3630 = vtanh.f32 %v1425_v36 }
0x10dc   :  { %3632 = vpow2.f32 %v3441_v44 }
0x10e0   :  { %v3629_v4 = vpop.eup %3628 }
0x10e1   :  { %v3631_v43 = vpop.eup %3630  ;;  %1410 = vrot.lane.b32.xlu1 %v3629_v4, %s4044_s28 }
0x10e2   :  { %1448 = vrot.lane.b32.xlu2 %v3631_v43, %s4044_s28  ;;  %v3633_v45 = vpop.eup %3632 }
0x10e3   :  { %v1429_v46 = vadd.f32 1.0, %v3633_v45 }
0x10e5   :  { %3634 = vrcp.f32 %v1429_v46  ;;  %v1441_v1 = vand.u32 2147483648, %v1429_v46  ;;  %vm1435_vm9 = vweird.f32 %v1429_v46  ;;  %v1439_v48 = vand.u32 2147483647, %v1429_v46 }
0x10e6   :  { %3636 = vpow2.f32 %v3440_v49 }
0x10e7   :  { %v1442_v3 = vor.u32 1.1754944e-38, %v1441_v1  ;;  %vm1440_vm11 = vcmp.eq.f32.partialorder %v1439_v48, 8.507059e+37 }
0x10eb   :  { %v3635_v47 = vpop.eup %3634 }
0x10ec   :  { %v1431_v59 = vmul.f32 %v3635_v47, %v1429_v46  ;;  %v3637_v61 = vpop.eup %3636  ;;  %vm1436_vm8 = vweird.f32 %v3635_v47 }
0x10ed   :  { %v1391_v63 = vadd.f32 1.0, %v3637_v61  ;;  %vm1437_vm10 = vmor %vm1435_vm9, %vm1436_vm8 }
0x10ee   :  { %v1432_v60 = vsub.f32 1.0, %v1431_v59 }
0x10ef   :  { %3638 = vrcp.f32 %v1391_v63  ;;  %v1403_v23 = vand.u32 2147483648, %v1391_v63  ;;  %vm1397_vm13 = vweird.f32 %v1391_v63  ;;  %v1401_v24 = vand.u32 2147483647, %v1391_v63 }
0x10f0   :  { %v1433_v5 = vmul.f32 %v3635_v47, %v1432_v60 }
0x10f1   :  { %v1404_v28 = vor.u32 1.1754944e-38, %v1403_v23  ;;  %vm1402_vm15 = vcmp.eq.f32.partialorder %v1401_v24, 8.507059e+37 }
0x10f2   :  { %v1434_v0 = vadd.f32 %v3635_v47, %v1433_v5 }
0x10f4   :  { %v1438_v2 = vsel %vm1437_vm10, %v3635_v47, %v1434_v0 }
0x10f5   :  { %v1443_v9 = vsel %vm1440_vm11, %v1442_v3, %v1438_v2  ;;  %v3639_v11 = vpop.eup %3638 }
0x10f6   :  { %v1393_v16 = vmul.f32 %v3639_v11, %v1391_v63  ;;  %vm1398_vm12 = vweird.f32 %v3639_v11  ;;  %v1446_v20 = vmul.f32 %v1443_v9, %v4466_v15 }
0x10f7   :  { %vm1399_vm14 = vmor %vm1397_vm13, %vm1398_vm12 }
0x10f8   :  { %v1394_v21 = vsub.f32 1.0, %v1393_v16 }
0x10fa   :  { %v1395_v22 = vmul.f32 %v3639_v11, %v1394_v21 }
0x10fc   :  { %v1396_v58 = vadd.f32 %v3639_v11, %v1395_v22 }
0x10fe   :  { %v1400_v26 = vsel %vm1399_vm14, %v3639_v11, %v1396_v58 }
0x10ff   :  { %v1405_v30 = vsel %vm1402_vm15, %v1404_v28, %v1400_v26 }
0x1100   :  { %v1408_v55 = vmul.f32 %v1405_v30, %v4464_v33 }
0x113c   :  { %v1449_v6 = vpop.permute.xlu2 %1448 }
0x113d   :  { %v1451_v12 = vmul.f32 %v1449_v6, %v1443_v9 }
0x113f   :  { %1453 = vrot.lane.b32.xlu1 %v1451_v12, %s4045_s29 }
0x1153   :  { %v1411_v29 = vpop.permute.xlu1 %1410 }
0x1154   :  { %v1413_v31 = vmul.f32 %v1411_v29, %v1405_v30 }
0x1156   :  { %1415 = vrot.lane.b32.xlu0 %v1413_v31, %s4045_s29 }
0x11b1   :  { %v1454_v32 = vpop.permute.xlu1 %1453 }
0x11b2   :  { %v4505_v27 = vadd.f32 %v1454_v32, %v1446_v20 }
0x11b4   :  { %3640 = vtanh.f32 %v4505_v27 }
0x11ba   :  { %v3641_v13 = vpop.eup %3640 }
0x11bb   :  { %1459 = vrot.lane.b32.xlu0 %v3641_v13, %s4044_s28 }
0x11c8   :  { %v1416_v17 = vpop.permute.xlu0 %1415 }
0x11c9   :  { %v4510_v18 = vadd.f32 %v1416_v17, %v1408_v55 }
0x11cb   :  { %3642 = vtanh.f32 %v4510_v18 }
0x11d1   :  { %v3643_v25 = vpop.eup %3642 }
0x11d2   :  { %1421 = vrot.lane.b32.xlu2 %v3643_v25, %s4044_s28 }
0x122c   :  { %v1422_v56 = vpop.permute.xlu2 %1421 }
0x122d   :  { %v1460_v15 = vpop.permute.xlu0 %1459  ;;  %v1424_v10 = vmul.f32 %v1422_v56, %v1405_v30 }
0x122e   :  { %v1462_v57 = vmul.f32 %v1460_v15, %v1443_v9 }
0x122f   :  { %1509 = vrot.lane.b32.xlu1 %v1424_v10, %s4045_s29 }
0x1230   :  { %1464 = vrot.lane.b32.xlu2 %v1462_v57, %s4045_s29 }
0x128a   :  { %v1465_v14 = vpop.permute.xlu2 %1464 }
0x128b   :  { %3442 = vmatmul.msk.f32.vlgmr.msrb.gmra.mxu0 %vm153_vm0, %v1465_v14  ;;  %3443 = vmatmul.msk.f32.vlgmr.msra.gmra.mxu1 %vm153_vm0, %v1465_v14  ;;  %v1720_v14 = vld [vmem:[#allocation2 + $0x9] sm:$0x1] }
0x128c   :  { %1814 = vmatpush.msrb.mxu0 %v4420_v19  ;;  %1839 = vmatpush.msra.mxu1 %v4424_v34 }
0x128e   :  { %1815 = vmatpush.msrb.mxu0 %v4428_v37  ;;  %1840 = vmatpush.msra.mxu1 %v4434_v52  ;;  %v1553_v52 = vld [vmem:[#allocation2 + $0x8] sm:$0x1] }
0x1290   :  { %1816 = vmatpush.msrb.mxu0 %v4438_v53  ;;  %1841 = vmatpush.msra.mxu1 %v4444_v7 }
0x1292   :  { %1817 = vmatpush.msrb.mxu0 %v4448_v39  ;;  %1842 = vmatpush.msra.mxu1 %v4454_v54 }
0x12a1   :  { %v1510_v33 = vpop.permute.xlu1 %1509 }
0x12a2   :  { %3444 = vmatmul.msk.f32.vlgmr.msra.gmra.mxu2 %vm153_vm0, %v1510_v33  ;;  %3445 = vmatmul.msk.f32.vlgmr.msra.gmra.mxu3 %vm153_vm0, %v1510_v33 }
0x1308   :  { %v1485_v19 = vpop.f32.mrf.mxu0  ;;  %v1505_v50 = vpop.f32.mrf.mxu1 }
0x1325   :  { %v1530_v34 = vpop.f32.mrf.mxu2  ;;  %v1550_v51 = vpop.f32.mrf.mxu3 }
0x1326   :  { %v1531_v37 = vadd.f32 %v1530_v34, %v1485_v19  ;;  %v1551_v38 = vadd.f32 %v1550_v51, %v1505_v50 }
0x1328   :  { %v1554_v8 = vadd.f32 %v1553_v52, %v1531_v37  ;;  %v1592_v53 = vadd.f32 %v4497_v35, %v1551_v38 }
0x132a   :  { %3644 = vtanh.f32 %v1554_v8  ;;  %v3446_v54 = vmul.f32 -1.442695, %v1554_v8  ;;  %v3447_v40 = vmul.f32 -1.442695, %v1592_v53 }
0x132b   :  { %3646 = vtanh.f32 %v1592_v53 }
0x132c   :  { %3648 = vpow2.f32 %v3446_v54 }
0x132d   :  { %3650 = vpow2.f32 %v3447_v40 }
0x1330   :  { %v3645_v7 = vpop.eup %3644 }
0x1331   :  { %v3647_v39 = vpop.eup %3646  ;;  %1577 = vrot.lane.b32.xlu0 %v3645_v7, %s4044_s28 }
0x1332   :  { %1615 = vrot.lane.b32.xlu1 %v3647_v39, %s4044_s28  ;;  %v3649_v62 = vpop.eup %3648 }
0x1333   :  { %v3651_v41 = vpop.eup %3650  ;;  %v1558_v42 = vadd.f32 1.0, %v3649_v62 }
0x1334   :  { %v1596_v36 = vadd.f32 1.0, %v3651_v41 }
0x1335   :  { %3652 = vrcp.f32 %v1558_v42  ;;  %v1570_v5 = vand.u32 2147483648, %v1558_v42  ;;  %vm1564_vm3 = vweird.f32 %v1558_v42  ;;  %v1568_v0 = vand.u32 2147483647, %v1558_v42 }
0x1336   :  { %3654 = vrcp.f32 %v1596_v36  ;;  %v1608_v63 = vand.u32 2147483648, %v1596_v36  ;;  %vm1602_vm4 = vweird.f32 %v1596_v36  ;;  %v1606_v1 = vand.u32 2147483647, %v1596_v36 }
0x1337   :  { %v1571_v3 = vor.u32 1.1754944e-38, %v1570_v5  ;;  %vm1569_vm7 = vcmp.eq.f32.partialorder %v1568_v0, 8.507059e+37 }
0x1338   :  { %v1609_v6 = vor.u32 1.1754944e-38, %v1608_v63  ;;  %vm1607_vm8 = vcmp.eq.f32.partialorder %v1606_v1, 8.507059e+37 }
0x133b   :  { %v3653_v4 = vpop.eup %3652 }
0x133c   :  { %v3655_v43 = vpop.eup %3654  ;;  %v1560_v44 = vmul.f32 %v3653_v4, %v1558_v42  ;;  %vm1565_vm1 = vweird.f32 %v3653_v4 }
0x133d   :  { %v1598_v45 = vmul.f32 %v3655_v43, %v1596_v36  ;;  %vm1603_vm2 = vweird.f32 %v3655_v43  ;;  %vm1566_vm5 = vmor %vm1564_vm3, %vm1565_vm1 }
0x133e   :  { %v1561_v46 = vsub.f32 1.0, %v1560_v44  ;;  %vm1604_vm6 = vmor %vm1602_vm4, %vm1603_vm2 }
0x133f   :  { %v1599_v47 = vsub.f32 1.0, %v1598_v45 }
0x1340   :  { %v1562_v49 = vmul.f32 %v3653_v4, %v1561_v46 }
0x1341   :  { %v1600_v59 = vmul.f32 %v3655_v43, %v1599_v47 }
0x1342   :  { %v1563_v60 = vadd.f32 %v3653_v4, %v1562_v49 }
0x1343   :  { %v1601_v61 = vadd.f32 %v3655_v43, %v1600_v59 }
0x1344   :  { %v1567_v48 = vsel %vm1566_vm5, %v3653_v4, %v1563_v60 }
0x1345   :  { %v1605_v2 = vsel %vm1604_vm6, %v3655_v43, %v1601_v61  ;;  %v1572_v11 = vsel %vm1569_vm7, %v1571_v3, %v1567_v48 }
0x1346   :  { %v1610_v16 = vsel %vm1607_vm8, %v1609_v6, %v1605_v2  ;;  %v1575_v58 = vmul.f32 %v1572_v11, %v4510_v18 }
0x1347   :  { %v1613_v28 = vmul.f32 %v1610_v16, %v4505_v27 }
0x13a3   :  { %v1578_v9 = vpop.permute.xlu0 %1577 }
0x13a4   :  { %v1616_v12 = vpop.permute.xlu1 %1615  ;;  %v1580_v21 = vmul.f32 %v1578_v9, %v1572_v11 }
0x13a5   :  { %v1618_v22 = vmul.f32 %v1616_v12, %v1610_v16 }
0x13a6   :  { %1582 = vrot.lane.b32.xlu2 %v1580_v21, %s4045_s29 }
0x13a7   :  { %1620 = vrot.lane.b32.xlu0 %v1618_v22, %s4045_s29 }
0x1400   :  { %v1583_v23 = vpop.permute.xlu2 %1582 }
0x1401   :  { %v4534_v24 = vadd.f32 %v1583_v23, %v1575_v58 }
0x1403   :  { %3656 = vtanh.f32 %v4534_v24 }
0x1409   :  { %v3657_v26 = vpop.eup %3656 }
0x140a   :  { %1588 = vrot.lane.b32.xlu1 %v3657_v26, %s4044_s28 }
0x1419   :  { %v1621_v29 = vpop.permute.xlu0 %1620 }
0x141a   :  { %v4539_v30 = vadd.f32 %v1621_v29, %v1613_v28  ;;  %v4566_v28 = vld [vmem:[#allocation14 + $0x30] sm:$0xff]  ;;  %v4568_v29 = vld [vmem:[#allocation14 + $0x20] sm:$0xff] }
0x141c   :  { %3658 = vtanh.f32 %v4539_v30 }
0x1422   :  { %v3659_v31 = vpop.eup %3658 }
0x1423   :  { %1626 = vrot.lane.b32.xlu2 %v3659_v31, %s4044_s28  ;;  %v4576_v31 = vld [vmem:[#allocation14] sm:$0xff] }
0x147c   :  { %v1589_v20 = vpop.permute.xlu1 %1588 }
0x147d   :  { %v1627_v32 = vpop.permute.xlu2 %1626  ;;  %v1591_v13 = vmul.f32 %v1589_v20, %v1572_v11 }
0x147e   :  { %v1629_v55 = vmul.f32 %v1627_v32, %v1610_v16 }
0x147f   :  { %1676 = vrot.lane.b32.xlu0 %v1591_v13, %s4045_s29 }
0x1480   :  { %1631 = vrot.lane.b32.xlu1 %v1629_v55, %s4045_s29 }
0x14f1   :  { %v1677_v17 = vpop.permute.xlu0 %1676 }
0x14f2   :  { %v1632_v18 = vpop.permute.xlu1 %1631  ;;  %3450 = vmatmul.msk.f32.vlgmr.msrb.gmra.mxu2 %vm153_vm0, %v1677_v17  ;;  %3451 = vmatmul.msk.f32.vlgmr.msrb.gmra.mxu3 %vm153_vm0, %v1677_v17 }
0x14f3   :  { %3448 = vmatmul.msk.f32.vlgmr.msra.gmra.mxu0 %vm153_vm0, %v1632_v18  ;;  %3449 = vmatmul.msk.f32.vlgmr.msrb.gmra.mxu1 %vm153_vm0, %v1632_v18 }
0x14f4   :  { %1961 = vmatpush.msra.mxu0 %v4566_v28  ;;  %2025 = vmatpush.msrb.mxu1 %v4566_v28 }
0x14f6   :  { %1962 = vmatpush.msra.mxu0 %v4568_v29  ;;  %2026 = vmatpush.msrb.mxu1 %v4568_v29 }
0x1570   :  { %v1652_v27 = vpop.f32.mrf.mxu0  ;;  %v1672_v25 = vpop.f32.mrf.mxu1 }
0x1575   :  { %v1697_v56 = vpop.f32.mrf.mxu2  ;;  %v1717_v15 = vpop.f32.mrf.mxu3 }
0x1576   :  { %v1698_v10 = vadd.f32 %v1697_v56, %v1652_v27  ;;  %v1718_v57 = vadd.f32 %v1717_v15, %v1672_v25 }
0x1578   :  { %v1721_v33 = vadd.f32 %v1720_v14, %v1698_v10  ;;  %v1759_v19 = vadd.f32 %v4497_v35, %v1718_v57 }
0x157a   :  { %3660 = vtanh.f32 %v1721_v33  ;;  %v3452_v51 = vmul.f32 -1.442695, %v1721_v33  ;;  %v3453_v8 = vmul.f32 -1.442695, %v1759_v19 }
0x157b   :  { %3662 = vtanh.f32 %v1759_v19 }
0x157c   :  { %3664 = vpow2.f32 %v3452_v51 }
0x1580   :  { %v3661_v50 = vpop.eup %3660 }
0x1581   :  { %v3663_v34 = vpop.eup %3662  ;;  %1744 = vrot.lane.b32.xlu2 %v3661_v50, %s4044_s28 }
0x1582   :  { %1782 = vrot.lane.b32.xlu0 %v3663_v34, %s4044_s28  ;;  %v3665_v37 = vpop.eup %3664 }
0x1583   :  { %v1725_v38 = vadd.f32 1.0, %v3665_v37 }
0x1585   :  { %3666 = vrcp.f32 %v1725_v38  ;;  %v1737_v41 = vand.u32 2147483648, %v1725_v38  ;;  %vm1731_vm10 = vweird.f32 %v1725_v38  ;;  %v1735_v42 = vand.u32 2147483647, %v1725_v38 }
0x1586   :  { %3668 = vpow2.f32 %v3453_v8 }
0x1587   :  { %v1738_v4 = vor.u32 1.1754944e-38, %v1737_v41  ;;  %vm1736_vm12 = vcmp.eq.f32.partialorder %v1735_v42, 8.507059e+37  ;;  %v4605_v41 = vld [vmem:[#allocation14 + $0x68] sm:$0xff]  ;;  %v4607_v42 = vld [vmem:[#allocation14 + $0x50] sm:$0xff] }
0x158b   :  { %v3667_v52 = vpop.eup %3666 }
0x158c   :  { %v1727_v53 = vmul.f32 %v3667_v52, %v1725_v38  ;;  %v3669_v54 = vpop.eup %3668  ;;  %vm1732_vm9 = vweird.f32 %v3667_v52 }
0x158d   :  { %v1763_v40 = vadd.f32 1.0, %v3669_v54  ;;  %vm1733_vm11 = vmor %vm1731_vm10, %vm1732_vm9  ;;  %v4597_v54 = vld [vmem:[#allocation14 + $0x70] sm:$0xff] }
0x158e   :  { %v1728_v7 = vsub.f32 1.0, %v1727_v53  ;;  %1921 = vmatpush.msra.mxu2 %v4597_v54 }
0x158f   :  { %3670 = vrcp.f32 %v1763_v40  ;;  %v1775_v61 = vand.u32 2147483648, %v1763_v40  ;;  %vm1769_vm14 = vweird.f32 %v1763_v40  ;;  %v1773_v5 = vand.u32 2147483647, %v1763_v40 }
0x1590   :  { %v1729_v39 = vmul.f32 %v3667_v52, %v1728_v7 }
0x1591   :  { %v1776_v0 = vor.u32 1.1754944e-38, %v1775_v61  ;;  %vm1774_vm1 = vcmp.eq.f32.partialorder %v1773_v5, 8.507059e+37 }
0x1592   :  { %v1730_v62 = vadd.f32 %v3667_v52, %v1729_v39 }
0x1594   :  { %v1734_v36 = vsel %vm1733_vm11, %v3667_v52, %v1730_v62  ;;  %v4601_v62 = vld [vmem:[#allocation14 + $0x60] sm:$0xff] }
0x1595   :  { %v1739_v44 = vsel %vm1736_vm12, %v1738_v4, %v1734_v36  ;;  %v3671_v46 = vpop.eup %3670  ;;  %v4609_v36 = vld [vmem:[#allocation14 + $0x58] sm:$0xff]  ;;  %1922 = vmatpush.msra.mxu2 %v4601_v62  ;;  %v4614_v4 = vld [vmem:[#allocation14 + $0x40] sm:$0xff] }
0x1596   :  { %v1765_v47 = vmul.f32 %v3671_v46, %v1763_v40  ;;  %vm1770_vm13 = vweird.f32 %v3671_v46  ;;  %v1742_v3 = vmul.f32 %v1739_v44, %v4534_v24  ;;  %v4599_v40 = vld [vmem:[#allocation14 + $0x78] sm:$0xff] }
0x1597   :  { %vm1771_vm15 = vmor %vm1769_vm14, %vm1770_vm13  ;;  %1941 = vmatpush.msra.mxu3 %v4599_v40  ;;  %1923 = vmatpush.msra.mxu2 %v4607_v42 }
0x1598   :  { %v1766_v49 = vsub.f32 1.0, %v1765_v47 }
0x1599   :  { %1942 = vmatpush.msra.mxu3 %v4605_v41  ;;  %1924 = vmatpush.msra.mxu2 %v4614_v4 }
0x159a   :  { %v1767_v59 = vmul.f32 %v3671_v46, %v1766_v49 }
0x159b   :  { %1943 = vmatpush.msra.mxu3 %v4609_v36 }
0x159c   :  { %v1768_v60 = vadd.f32 %v3671_v46, %v1767_v59 }
0x159e   :  { %v1772_v63 = vsel %vm1771_vm15, %v3671_v46, %v1768_v60  ;;  %v1969_v60 = vld [vmem:[#allocation3] sm:$0x1] }
0x159f   :  { %v1777_v48 = vsel %vm1774_vm1, %v1776_v0, %v1772_v63 }
0x15a0   :  { %v1780_v6 = vmul.f32 %v1777_v48, %v4539_v30  ;;  %v4572_v30 = vld [vmem:[#allocation14 + $0x10] sm:$0xff] }
0x15a1   :  { %1963 = vmatpush.msra.mxu0 %v4572_v30  ;;  %2027 = vmatpush.msrb.mxu1 %v4572_v30 }
0x15a3   :  { %1964 = vmatpush.msra.mxu0 %v4576_v31  ;;  %2028 = vmatpush.msrb.mxu1 %v4576_v31 }
0x15db   :  { %v1745_v43 = vpop.permute.xlu2 %1744 }
0x15dc   :  { %v1747_v45 = vmul.f32 %v1745_v43, %v1739_v44  ;;  %v4616_v43 = vld [vmem:[#allocation14 + $0x48] sm:$0xff] }
0x15dd   :  { %1944 = vmatpush.msra.mxu3 %v4616_v43 }
0x15de   :  { %1749 = vrot.lane.b32.xlu1 %v1747_v45, %s4045_s29 }
0x15df   :  { %2166 = vmatpush.msrb.mxu3 %v4597_v54 }
0x15e1   :  { %2167 = vmatpush.msrb.mxu3 %v4601_v62 }
0x15e3   :  { %2168 = vmatpush.msrb.mxu3 %v4607_v42 }
0x15e5   :  { %2169 = vmatpush.msrb.mxu3 %v4614_v4 }
0x15f4   :  { %v1783_v1 = vpop.permute.xlu0 %1782 }
0x15f5   :  { %v1785_v2 = vmul.f32 %v1783_v1, %v1777_v48 }
0x15f7   :  { %1787 = vrot.lane.b32.xlu2 %v1785_v2, %s4045_s29 }
0x1650   :  { %v1750_v9 = vpop.permute.xlu1 %1749 }
0x1651   :  { %v1788_v11 = vpop.permute.xlu2 %1787  ;;  %v4556_v12 = vadd.f32 %v1750_v9, %v1742_v3 }
0x1652   :  { %v4558_v16 = vadd.f32 %v1788_v11, %v1780_v6 }
0x1653   :  { %3672 = vtanh.f32 %v4556_v12 }
0x1654   :  { %3674 = vtanh.f32 %v4558_v16 }
0x1659   :  { %v3673_v21 = vpop.eup %3672 }
0x165a   :  { %v3675_v22 = vpop.eup %3674  ;;  %1755 = vrot.lane.b32.xlu0 %v3673_v21, %s4044_s28 }
0x165b   :  { %1793 = vrot.lane.b32.xlu1 %v3675_v22, %s4044_s28 }
0x16cc   :  { %v1756_v58 = vpop.permute.xlu0 %1755 }
0x16cd   :  { %v1794_v23 = vpop.permute.xlu1 %1793  ;;  %v1758_v24 = vmul.f32 %v1756_v58, %v1739_v44 }
0x16ce   :  { %v1796_v26 = vmul.f32 %v1794_v23, %v1777_v48 }
0x16cf   :  { %1823 = vrot.lane.b32.xlu0 %v1758_v24, %s4045_s29 }
0x16d0   :  { %1798 = vrot.lane.b32.xlu2 %v1796_v26, %s4045_s29 }
0x172a   :  { %v1799_v20 = vpop.permute.xlu2 %1798 }
0x172b   :  { %3454 = vmatmul.msk.f32.vlgmr.msrb.gmra.mxu0 %vm153_vm0, %v1799_v20 }
0x172c   :  { %2186 = vmatpush.msrb.mxu0 %v4599_v40 }
0x172e   :  { %2187 = vmatpush.msrb.mxu0 %v4605_v41 }
0x1730   :  { %2188 = vmatpush.msrb.mxu0 %v4609_v36 }
0x1732   :  { %2189 = vmatpush.msrb.mxu0 %v4616_v43 }
0x1741   :  { %v1824_v32 = vpop.permute.xlu0 %1823 }
0x1742   :  { %3455 = vmatmul.msk.f32.vlgmr.msra.gmra.mxu1 %vm153_vm0, %v1824_v32  ;;  %3460 = vmatmul.msk.f32.vlgmr.msra.gmra.mxu0 %vm153_vm0, %v1824_v32 }
0x1743   :  { %2211 = vmatpush.msra.mxu1 %v4566_v28  ;;  %2371 = vmatpush.msra.mxu0 %v4599_v40 }
0x1745   :  { %2212 = vmatpush.msra.mxu1 %v4568_v29  ;;  %2372 = vmatpush.msra.mxu0 %v4605_v41 }
0x1747   :  { %2213 = vmatpush.msra.mxu1 %v4572_v30  ;;  %2373 = vmatpush.msra.mxu0 %v4609_v36 }
0x1749   :  { %2214 = vmatpush.msra.mxu1 %v4576_v31  ;;  %2374 = vmatpush.msra.mxu0 %v4616_v43 }
0x17a8   :  { %v1819_v13 = vpop.f32.mrf.mxu0 }
0x17bf   :  { %v1844_v55 = vpop.f32.mrf.mxu1  ;;  %v1966_v47 = vpop.f32.mrf.mxu0 }
0x17c0   :  { %v1845_v17 = vadd.f32 %v1844_v55, %v1819_v13  ;;  %v4647_v55 = vld [vmem:[#allocation14 + $0x38] sm:$0xff] }
0x17c1   :  { %2045 = vmatpush.msrb.mxu2 %v4647_v55 }
0x17c2   :  { %v1847_v18 = vadd.f32 %v4497_v35, %v1845_v17  ;;  %v4649_v17 = vld [vmem:[#allocation14 + $0x28] sm:$0xff] }
0x17c3   :  { %2046 = vmatpush.msrb.mxu2 %v4649_v17 }
0x17c4   :  { %3676 = vtanh.f32 %v1847_v18  ;;  %v3456_v25 = vmul.f32 -1.442695, %v1847_v18  ;;  %v4652_v18 = vld [vmem:[#allocation14 + $0x18] sm:$0xff] }
0x17c5   :  { %2047 = vmatpush.msrb.mxu2 %v4652_v18 }
0x17c6   :  { %3678 = vpow2.f32 %v3456_v25 }
0x17ca   :  { %v3677_v27 = vpop.eup %3676 }
0x17cb   :  { %1870 = vrot.lane.b32.xlu1 %v3677_v27, %s4044_s28  ;;  %v4655_v27 = vld [vmem:[#allocation14 + $0x8] sm:$0xff] }
0x17cc   :  { %v3679_v56 = vpop.eup %3678  ;;  %2048 = vmatpush.msrb.mxu2 %v4655_v27 }
0x17cd   :  { %v1851_v15 = vadd.f32 1.0, %v3679_v56 }
0x17cf   :  { %3680 = vrcp.f32 %v1851_v15  ;;  %v1863_v50 = vand.u32 2147483648, %v1851_v15  ;;  %vm1857_vm3 = vweird.f32 %v1851_v15  ;;  %v1861_v34 = vand.u32 2147483647, %v1851_v15 }
0x17d1   :  { %v1864_v51 = vor.u32 1.1754944e-38, %v1863_v50  ;;  %vm1862_vm5 = vcmp.eq.f32.partialorder %v1861_v34, 8.507059e+37 }
0x17d5   :  { %v3681_v10 = vpop.eup %3680 }
0x17d6   :  { %v1853_v57 = vmul.f32 %v3681_v10, %v1851_v15  ;;  %vm1858_vm2 = vweird.f32 %v3681_v10 }
0x17d7   :  { %vm1859_vm4 = vmor %vm1857_vm3, %vm1858_vm2  ;;  %vm2134_vm3 = vcmask 253952  }
0x17d8   :  { %v1854_v14 = vsub.f32 1.0, %v1853_v57  ;;  %v2053_v57 = vld [vmem:[#allocation3 + $0x1] sm:$0x1] }
0x17da   :  { %v1855_v33 = vmul.f32 %v3681_v10, %v1854_v14 }
0x17dc   :  { %v1856_v19 = vadd.f32 %v3681_v10, %v1855_v33 }
0x17de   :  { %v1860_v35 = vsel %vm1859_vm4, %v3681_v10, %v1856_v19  ;;  %v4677_v19 = vld [vmem:[%s4878_s7 + $0x1] sm:$0x1] }
0x17df   :  { %v1865_v38 = vsel %vm1862_vm5, %v1864_v51, %v1860_v35 }
0x17e0   :  { %v1868_v8 = vmul.f32 %v1865_v38, %v4558_v16 }
0x183d   :  { %v1871_v37 = vpop.permute.xlu1 %1870 }
0x183e   :  { %v1873_v52 = vmul.f32 %v1871_v37, %v1865_v38 }
0x1840   :  { %1875 = vrot.lane.b32.xlu2 %v1873_v52, %s4045_s29 }
0x189a   :  { %v1876_v53 = vpop.permute.xlu2 %1875 }
0x189b   :  { %v4593_v7 = vadd.f32 %v1876_v53, %v1868_v8 }
0x189d   :  { %3682 = vtanh.f32 %v4593_v7 }
0x18a3   :  { %v3683_v39 = vpop.eup %3682 }
0x18a4   :  { %1881 = vrot.lane.b32.xlu0 %v3683_v39, %s4044_s28 }
0x1916   :  { %v1882_v44 = vpop.permute.xlu0 %1881 }
0x1917   :  { %v1884_v45 = vmul.f32 %v1882_v44, %v1865_v38 }
0x1919   :  { %1905 = vrot.lane.b32.xlu1 %v1884_v45, %s4045_s29 }
0x198b   :  { %v1906_v46 = vpop.permute.xlu1 %1905 }
0x198c   :  { %3458 = vmatmul.msk.f32.vlgmr.msra.gmra.mxu2 %vm153_vm0, %v1906_v46  ;;  %3459 = vmatmul.msk.f32.vlgmr.msra.gmra.mxu3 %vm153_vm0, %v1906_v46 }
0x198d   :  { %2351 = vmatpush.msra.mxu3 %v4597_v54  ;;  %2231 = vmatpush.msra.mxu2 %v4647_v55 }
0x198f   :  { %2352 = vmatpush.msra.mxu3 %v4601_v62  ;;  %2232 = vmatpush.msra.mxu2 %v4649_v17 }
0x1991   :  { %2353 = vmatpush.msra.mxu3 %v4607_v42  ;;  %2233 = vmatpush.msra.mxu2 %v4652_v18 }
0x1993   :  { %2354 = vmatpush.msra.mxu3 %v4614_v4  ;;  %2234 = vmatpush.msra.mxu2 %v4655_v27 }
0x1a0f   :  { %v1926_v49 = vpop.f32.mrf.mxu2  ;;  %v1946_v33 = vpop.f32.mrf.mxu3 }
0x1a10   :  { %v1967_v59 = vadd.f32 %v1966_v47, %v1926_v49 }
0x1a12   :  { %v1970_v61 = vadd.f32 %v1969_v60, %v1967_v59 }
0x1a14   :  { %3684 = vtanh.f32 %v1970_v61  ;;  %v3461_v63 = vmul.f32 -1.442695, %v1970_v61 }
0x1a16   :  { %3686 = vpow2.f32 %v3461_v63 }
0x1a1a   :  { %v3685_v5 = vpop.eup %3684 }
0x1a1b   :  { %1993 = vrot.lane.b32.xlu2 %v3685_v5, %s4044_s28 }
0x1a1c   :  { %v3687_v0 = vpop.eup %3686 }
0x1a1d   :  { %v1974_v1 = vadd.f32 1.0, %v3687_v0 }
0x1a1f   :  { %3688 = vrcp.f32 %v1974_v1  ;;  %v1986_v11 = vand.u32 2147483648, %v1974_v1  ;;  %vm1980_vm7 = vweird.f32 %v1974_v1  ;;  %v1984_v16 = vand.u32 2147483647, %v1974_v1 }
0x1a21   :  { %v1987_v22 = vor.u32 1.1754944e-38, %v1986_v11  ;;  %vm1985_vm9 = vcmp.eq.f32.partialorder %v1984_v16, 8.507059e+37 }
0x1a25   :  { %v3689_v48 = vpop.eup %3688 }
0x1a26   :  { %v1976_v2 = vmul.f32 %v3689_v48, %v1974_v1  ;;  %vm1981_vm6 = vweird.f32 %v3689_v48 }
0x1a27   :  { %vm1982_vm8 = vmor %vm1980_vm7, %vm1981_vm6 }
0x1a28   :  { %v1977_v3 = vsub.f32 1.0, %v1976_v2 }
0x1a2a   :  { %v1978_v6 = vmul.f32 %v3689_v48, %v1977_v3 }
0x1a2c   :  { %v1979_v9 = vadd.f32 %v3689_v48, %v1978_v6 }
0x1a2e   :  { %v1983_v21 = vsel %vm1982_vm8, %v3689_v48, %v1979_v9 }
0x1a2f   :  { %v1988_v23 = vsel %vm1985_vm9, %v1987_v22, %v1983_v21 }
0x1a30   :  { %v1991_v26 = vmul.f32 %v1988_v23, %v4556_v12 }
0x1a75   :  { %v1994_v58 = vpop.permute.xlu2 %1993 }
0x1a76   :  { %v1996_v24 = vmul.f32 %v1994_v58, %v1988_v23 }
0x1a78   :  { %1998 = vrot.lane.b32.xlu0 %v1996_v24, %s4045_s29 }
0x1aea   :  { %v1999_v20 = vpop.permute.xlu0 %1998 }
0x1aeb   :  { %v4643_v32 = vadd.f32 %v1999_v20, %v1991_v26 }
0x1aed   :  { %3690 = vtanh.f32 %v4643_v32 }
0x1af3   :  { %v3691_v13 = vpop.eup %3690 }
0x1af4   :  { %2004 = vrot.lane.b32.xlu1 %v3691_v13, %s4044_s28 }
0x1b66   :  { %v2005_v12 = vpop.permute.xlu1 %2004 }
0x1b67   :  { %v2007_v25 = vmul.f32 %v2005_v12, %v1988_v23 }
0x1b69   :  { %2009 = vrot.lane.b32.xlu2 %v2007_v25, %s4045_s29 }
0x1bc3   :  { %v2010_v56 = vpop.permute.xlu2 %2009 }
0x1bc4   :  { %3462 = vmatmul.msk.f32.vlgmr.msrb.gmra.mxu1 %vm153_vm0, %v2010_v56  ;;  %3463 = vmatmul.msk.f32.vlgmr.msrb.gmra.mxu2 %vm153_vm0, %v2010_v56 }
0x1bc5   :  { %2396 = vmatpush.msrb.mxu1 %v4566_v28  ;;  %2416 = vmatpush.msrb.mxu2 %v4647_v55 }
0x1bc7   :  { %2397 = vmatpush.msrb.mxu1 %v4568_v29  ;;  %2417 = vmatpush.msrb.mxu2 %v4649_v17 }
0x1bc9   :  { %2398 = vmatpush.msrb.mxu1 %v4572_v30  ;;  %2418 = vmatpush.msrb.mxu2 %v4652_v18 }
0x1bcb   :  { %2399 = vmatpush.msrb.mxu1 %v4576_v31  ;;  %2419 = vmatpush.msrb.mxu2 %v4655_v27 }
0x1c41   :  { %v2030_v15 = vpop.f32.mrf.mxu1 }
0x1c42   :  { %v2031_v10 = vadd.f32 %v2030_v15, %v1926_v49 }
0x1c44   :  { %v2054_v14 = vadd.f32 %v2053_v57, %v2031_v10 }
0x1c46   :  { %3692 = vtanh.f32 %v2054_v14  ;;  %v3464_v38 = vmul.f32 -1.442695, %v2054_v14 }
0x1c47   :  { %v2050_v50 = vpop.f32.mrf.mxu2 }
0x1c48   :  { %v2051_v34 = vadd.f32 %v2050_v50, %v1946_v33 }
0x1c4a   :  { %v2092_v35 = vadd.f32 %v4677_v19, %v2051_v34 }
0x1c4c   :  { %v3693_v51 = vpop.eup %3692  ;;  %3694 = vtanh.f32 %v2092_v35  ;;  %v3465_v52 = vmul.f32 -1.442695, %v2092_v35 }
0x1c4d   :  { %2077 = vrot.lane.b32.xlu1 %v3693_v51, %s4044_s28  ;;  %3696 = vpow2.f32 %v3464_v38  ;;  %v2239_v38 = vld [vmem:[#allocation3 + $0x2] sm:$0x1] }
0x1c4e   :  { %3698 = vpow2.f32 %v3465_v52 }
0x1c52   :  { %v3695_v37 = vpop.eup %3694 }
0x1c53   :  { %2115 = vrot.lane.b32.xlu0 %v3695_v37, %s4044_s28  ;;  %v3697_v8 = vpop.eup %3696 }
0x1c54   :  { %v2058_v53 = vadd.f32 1.0, %v3697_v8  ;;  %v3699_v39 = vpop.eup %3698 }
0x1c55   :  { %v2096_v44 = vadd.f32 1.0, %v3699_v39 }
0x1c56   :  { %3700 = vrcp.f32 %v2058_v53  ;;  %v2070_v63 = vand.u32 2147483648, %v2058_v53  ;;  %vm2064_vm11 = vweird.f32 %v2058_v53  ;;  %v2068_v0 = vand.u32 2147483647, %v2058_v53 }
0x1c57   :  { %3702 = vrcp.f32 %v2096_v44  ;;  %v2108_v11 = vand.u32 2147483648, %v2096_v44  ;;  %vm2102_vm15 = vweird.f32 %v2096_v44  ;;  %v2106_v21 = vand.u32 2147483647, %v2096_v44 }
0x1c58   :  { %v2071_v2 = vor.u32 1.1754944e-38, %v2070_v63  ;;  %vm2069_vm13 = vcmp.eq.f32.partialorder %v2068_v0, 8.507059e+37 }
0x1c59   :  { %v2109_v58 = vor.u32 1.1754944e-38, %v2108_v11  ;;  %vm2107_vm2 = vcmp.eq.f32.partialorder %v2106_v21, 8.507059e+37 }
0x1c5c   :  { %v3701_v45 = vpop.eup %3700 }
0x1c5d   :  { %v2060_v46 = vmul.f32 %v3701_v45, %v2058_v53  ;;  %v3703_v47 = vpop.eup %3702  ;;  %vm2065_vm10 = vweird.f32 %v3701_v45 }
0x1c5e   :  { %v2098_v59 = vmul.f32 %v3703_v47, %v2096_v44  ;;  %vm2066_vm12 = vmor %vm2064_vm11, %vm2065_vm10  ;;  %vm2103_vm14 = vweird.f32 %v3703_v47 }
0x1c5f   :  { %v2061_v49 = vsub.f32 1.0, %v2060_v46  ;;  %vm2104_vm1 = vmor %vm2102_vm15, %vm2103_vm14 }
0x1c60   :  { %v2099_v61 = vsub.f32 1.0, %v2098_v59 }
0x1c61   :  { %v2062_v60 = vmul.f32 %v3701_v45, %v2061_v49 }
0x1c62   :  { %v2100_v1 = vmul.f32 %v3703_v47, %v2099_v61 }
0x1c63   :  { %v2063_v5 = vadd.f32 %v3701_v45, %v2062_v60 }
0x1c64   :  { %v2101_v3 = vadd.f32 %v3703_v47, %v2100_v1 }
0x1c65   :  { %v2067_v48 = vsel %vm2066_vm12, %v3701_v45, %v2063_v5 }
0x1c66   :  { %v2072_v9 = vsel %vm2069_vm13, %v2071_v2, %v2067_v48  ;;  %v2105_v22 = vsel %vm2104_vm1, %v3703_v47, %v2101_v3 }
0x1c67   :  { %v2110_v24 = vsel %vm2107_vm2, %v2109_v58, %v2105_v22  ;;  %v2075_v56 = vmul.f32 %v2072_v9, %v4643_v32 }
0x1c68   :  { %v2113_v20 = vmul.f32 %v2110_v24, %v4593_v7 }
0x1cbf   :  { %v2078_v6 = vpop.permute.xlu1 %2077 }
0x1cc0   :  { %v2080_v16 = vmul.f32 %v2078_v6, %v2072_v9 }
0x1cc2   :  { %2082 = vrot.lane.b32.xlu0 %v2080_v16, %s4045_s29 }
0x1cc5   :  { %v2116_v23 = vpop.permute.xlu0 %2115 }
0x1cc6   :  { %v2118_v26 = vmul.f32 %v2116_v23, %v2110_v24 }
0x1cc8   :  { %2120 = vrot.lane.b32.xlu2 %v2118_v26, %s4045_s29 }
0x1d22   :  { %v2121_v13 = vpop.permute.xlu2 %2120 }
0x1d23   :  { %v4685_v12 = vadd.f32 %v2121_v13, %v2113_v20 }
0x1d25   :  { %3704 = vtanh.f32 %v4685_v12 }
0x1d2b   :  { %v3705_v25 = vpop.eup %3704 }
0x1d2c   :  { %2126 = vrot.lane.b32.xlu1 %v3705_v25, %s4044_s28 }
0x1d34   :  { %v2083_v15 = vpop.permute.xlu0 %2082 }
0x1d35   :  { %v4690_v10 = vadd.f32 %v2083_v15, %v2075_v56 }
0x1d37   :  { %3706 = vtanh.f32 %v4690_v10 }
0x1d3d   :  { %v3707_v57 = vpop.eup %3706 }
0x1d3e   :  { %2088 = vrot.lane.b32.xlu2 %v3707_v57, %s4044_s28 }
0x1d98   :  { %v2089_v14 = vpop.permute.xlu2 %2088 }
0x1d99   :  { %v2091_v7 = vmul.f32 %v2089_v14, %v2072_v9 }
0x1d9b   :  { %2195 = vrot.lane.b32.xlu1 %v2091_v7, %s4045_s29 }
0x1d9e   :  { %v2127_v33 = vpop.permute.xlu1 %2126 }
0x1d9f   :  { %v2129_v50 = vmul.f32 %v2127_v33, %v2110_v24 }
0x1da1   :  { %2131 = vrot.lane.b32.xlu0 %v2129_v50, %s4045_s29 }
0x1e0d   :  { %v2196_v34 = vpop.permute.xlu1 %2195 }
0x1e0e   :  { %3468 = vmatmul.msk.f32.vlgmr.msra.gmra.mxu1 %vm153_vm0, %v2196_v34  ;;  %3469 = vmatmul.msk.f32.vlgmr.msra.gmra.mxu2 %vm153_vm0, %v2196_v34 }
0x1e0f   :  { %2581 = vmatpush.msra.mxu1 %v4566_v28  ;;  %2601 = vmatpush.msra.mxu2 %v4647_v55 }
0x1e11   :  { %2582 = vmatpush.msra.mxu1 %v4568_v29  ;;  %2602 = vmatpush.msra.mxu2 %v4649_v17 }
0x1e13   :  { %v2132_v32 = vpop.permute.xlu0 %2131  ;;  %2583 = vmatpush.msra.mxu1 %v4572_v30  ;;  %2603 = vmatpush.msra.mxu2 %v4652_v18 }
0x1e14   :  { %2135 = vst.msk [vmem:[#allocation4] sm:$0x1] %vm2134_vm3, %v2132_v32  ;;  %3466 = vmatmul.msk.f32.vlgmr.msrb.gmra.mxu3 %vm153_vm0, %v2132_v32  ;;  %3467 = vmatmul.msk.f32.vlgmr.msrb.gmra.mxu0 %vm153_vm0, %v2132_v32 }
0x1e15   :  { %2584 = vmatpush.msra.mxu1 %v4576_v31  ;;  %2604 = vmatpush.msra.mxu2 %v4655_v27 }
0x1e16   :  { %2536 = vmatpush.msrb.mxu3 %v4597_v54  ;;  %2556 = vmatpush.msrb.mxu0 %v4599_v40 }
0x1e18   :  { %2537 = vmatpush.msrb.mxu3 %v4601_v62  ;;  %2557 = vmatpush.msrb.mxu0 %v4605_v41 }
0x1e1a   :  { %2538 = vmatpush.msrb.mxu3 %v4607_v42  ;;  %2558 = vmatpush.msrb.mxu0 %v4609_v36 }
0x1e1c   :  { %2539 = vmatpush.msrb.mxu3 %v4614_v4  ;;  %2559 = vmatpush.msrb.mxu0 %v4616_v43 }
0x1e8b   :  { %v2216_v35 = vpop.f32.mrf.mxu1 }
0x1e91   :  { %v2191_v28 = vpop.f32.mrf.mxu0  ;;  %v2236_v29 = vpop.f32.mrf.mxu2 }
0x1e92   :  { %v2237_v30 = vadd.f32 %v2236_v29, %v2191_v28 }
0x1e94   :  { %v2278_v31 = vadd.f32 %v4677_v19, %v2237_v30 }
0x1e96   :  { %3708 = vtanh.f32 %v2278_v31  ;;  %v3471_v46 = vmul.f32 -1.442695, %v2278_v31 }
0x1e97   :  { %v2171_v51 = vpop.f32.mrf.mxu3 }
0x1e98   :  { %v2217_v37 = vadd.f32 %v2216_v35, %v2171_v51 }
0x1e9a   :  { %v2240_v52 = vadd.f32 %v2239_v38, %v2217_v37 }
0x1e9c   :  { %v3709_v8 = vpop.eup %3708  ;;  %3710 = vtanh.f32 %v2240_v52  ;;  %v3470_v39 = vmul.f32 -1.442695, %v2240_v52 }
0x1e9d   :  { %2301 = vrot.lane.b32.xlu0 %v3709_v8, %s4044_s28 }
0x1e9e   :  { %3712 = vpow2.f32 %v3470_v39 }
0x1ea2   :  { %v3711_v53 = vpop.eup %3710 }
0x1ea3   :  { %2263 = vrot.lane.b32.xlu2 %v3711_v53, %s4044_s28 }
0x1ea4   :  { %v3713_v44 = vpop.eup %3712 }
0x1ea5   :  { %v2244_v45 = vadd.f32 1.0, %v3713_v44 }
0x1ea7   :  { %3714 = vrcp.f32 %v2244_v45  ;;  %v2256_v0 = vand.u32 2147483648, %v2244_v45  ;;  %vm2250_vm5 = vweird.f32 %v2244_v45  ;;  %v2254_v1 = vand.u32 2147483647, %v2244_v45 }
0x1ea8   :  { %3716 = vpow2.f32 %v3471_v46 }
0x1ea9   :  { %v2257_v3 = vor.u32 1.1754944e-38, %v2256_v0  ;;  %vm2255_vm7 = vcmp.eq.f32.partialorder %v2254_v1, 8.507059e+37 }
0x1ead   :  { %v3715_v47 = vpop.eup %3714 }
0x1eae   :  { %v2246_v49 = vmul.f32 %v3715_v47, %v2244_v45  ;;  %v3717_v59 = vpop.eup %3716  ;;  %vm2251_vm4 = vweird.f32 %v3715_v47 }
0x1eaf   :  { %v2282_v61 = vadd.f32 1.0, %v3717_v59  ;;  %vm2252_vm6 = vmor %vm2250_vm5, %vm2251_vm4 }
0x1eb0   :  { %v2247_v60 = vsub.f32 1.0, %v2246_v49 }
0x1eb1   :  { %3718 = vrcp.f32 %v2282_v61  ;;  %v2294_v23 = vand.u32 2147483648, %v2282_v61  ;;  %vm2288_vm9 = vweird.f32 %v2282_v61  ;;  %v2292_v24 = vand.u32 2147483647, %v2282_v61 }
0x1eb2   :  { %v2248_v5 = vmul.f32 %v3715_v47, %v2247_v60 }
0x1eb3   :  { %v2295_v20 = vor.u32 1.1754944e-38, %v2294_v23  ;;  %vm2293_vm11 = vcmp.eq.f32.partialorder %v2292_v24, 8.507059e+37 }
0x1eb4   :  { %v2249_v63 = vadd.f32 %v3715_v47, %v2248_v5 }
0x1eb6   :  { %v2253_v2 = vsel %vm2252_vm6, %v3715_v47, %v2249_v63 }
0x1eb7   :  { %v3719_v48 = vpop.eup %3718  ;;  %v2258_v11 = vsel %vm2255_vm7, %v2257_v3, %v2253_v2 }
0x1eb8   :  { %v2284_v6 = vmul.f32 %v3719_v48, %v2282_v61  ;;  %vm2289_vm8 = vweird.f32 %v3719_v48  ;;  %v2261_v7 = vmul.f32 %v2258_v11, %v4690_v10 }
0x1eb9   :  { %vm2290_vm10 = vmor %vm2288_vm9, %vm2289_vm8 }
0x1eba   :  { %v2285_v21 = vsub.f32 1.0, %v2284_v6 }
0x1ebc   :  { %v2286_v22 = vmul.f32 %v3719_v48, %v2285_v21 }
0x1ebe   :  { %v2287_v58 = vadd.f32 %v3719_v48, %v2286_v22 }
0x1ec0   :  { %v2291_v26 = vsel %vm2290_vm10, %v3719_v48, %v2287_v58 }
0x1ec1   :  { %v2296_v25 = vsel %vm2293_vm11, %v2295_v20, %v2291_v26 }
0x1ec2   :  { %v2299_v15 = vmul.f32 %v2296_v25, %v4685_v12 }
0x1efd   :  { %v2264_v9 = vpop.permute.xlu2 %2263 }
0x1efe   :  { %v2266_v16 = vmul.f32 %v2264_v9, %v2258_v11 }
0x1f00   :  { %2268 = vrot.lane.b32.xlu1 %v2266_v16, %s4045_s29 }
0x1f0f   :  { %v2302_v13 = vpop.permute.xlu0 %2301 }
0x1f10   :  { %v2304_v56 = vmul.f32 %v2302_v13, %v2296_v25 }
0x1f12   :  { %2306 = vrot.lane.b32.xlu2 %v2304_v56, %s4045_s29 }
0x1f6c   :  { %v2307_v57 = vpop.permute.xlu2 %2306 }
0x1f6d   :  { %v4723_v14 = vadd.f32 %v2307_v57, %v2299_v15 }
0x1f6f   :  { %3720 = vtanh.f32 %v4723_v14 }
0x1f72   :  { %v2269_v33 = vpop.permute.xlu1 %2268 }
0x1f73   :  { %v4727_v50 = vadd.f32 %v2269_v33, %v2261_v7 }
0x1f75   :  { %v3721_v34 = vpop.eup %3720  ;;  %3722 = vtanh.f32 %v4727_v50 }
0x1f76   :  { %2312 = vrot.lane.b32.xlu1 %v3721_v34, %s4044_s28 }
0x1f7b   :  { %v3723_v32 = vpop.eup %3722 }
0x1f7c   :  { %2274 = vrot.lane.b32.xlu0 %v3723_v32, %s4044_s28 }
0x1fe8   :  { %v2313_v28 = vpop.permute.xlu1 %2312 }
0x1fe9   :  { %v2315_v12 = vmul.f32 %v2313_v28, %v2296_v25 }
0x1feb   :  { %2317 = vrot.lane.b32.xlu0 %v2315_v12, %s4045_s29 }
0x1fee   :  { %v2275_v29 = vpop.permute.xlu0 %2274 }
0x1fef   :  { %v2277_v30 = vmul.f32 %v2275_v29, %v2258_v11 }
0x1ff1   :  { %2380 = vrot.lane.b32.xlu2 %v2277_v30, %s4045_s29 }
0x204b   :  { %v2381_v10 = vpop.permute.xlu2 %2380 }
0x204c   :  { %3474 = vmatmul.msk.f32.vlgmr.msrb.gmra.mxu1 %vm153_vm0, %v2381_v10  ;;  %3475 = vmatmul.msk.f32.vlgmr.msrb.gmra.mxu2 %vm153_vm0, %v2381_v10 }
0x204d   :  { %2786 = vmatpush.msrb.mxu2 %v4647_v55 }
0x204f   :  { %2787 = vmatpush.msrb.mxu2 %v4649_v17 }
0x2051   :  { %2788 = vmatpush.msrb.mxu2 %v4652_v18 }
0x2053   :  { %2789 = vmatpush.msrb.mxu2 %v4655_v27 }
0x205d   :  { %v2318_v31 = vpop.permute.xlu0 %2317 }
0x205e   :  { %2320 = vst.msk [vmem:[#allocation4 + $0x1] sm:$0x1] %vm2134_vm3, %v2318_v31  ;;  %3472 = vmatmul.msk.f32.vlgmr.msra.gmra.mxu3 %vm153_vm0, %v2318_v31  ;;  %3473 = vmatmul.msk.f32.vlgmr.msra.gmra.mxu0 %vm153_vm0, %v2318_v31  ;;  %v2609_v31 = vld [vmem:[#allocation3 + $0x4] sm:$0x1] }
0x205f   :  { %2721 = vmatpush.msra.mxu3 %v4597_v54  ;;  %2741 = vmatpush.msra.mxu0 %v4599_v40 }
0x2061   :  { %2722 = vmatpush.msra.mxu3 %v4601_v62  ;;  %2742 = vmatpush.msra.mxu0 %v4605_v41  ;;  %v2424_v62 = vld [vmem:[#allocation3 + $0x3] sm:$0x1] }
0x2063   :  { %2723 = vmatpush.msra.mxu3 %v4607_v42  ;;  %2743 = vmatpush.msra.mxu0 %v4609_v36 }
0x2065   :  { %2724 = vmatpush.msra.mxu3 %v4614_v4  ;;  %2744 = vmatpush.msra.mxu0 %v4616_v43 }
0x20c9   :  { %v2401_v54 = vpop.f32.mrf.mxu1 }
0x20cf   :  { %v2421_v55 = vpop.f32.mrf.mxu2 }
0x20db   :  { %v2376_v17 = vpop.f32.mrf.mxu0 }
0x20dc   :  { %v2422_v18 = vadd.f32 %v2421_v55, %v2376_v17 }
0x20de   :  { %v2463_v27 = vadd.f32 %v4677_v19, %v2422_v18 }
0x20e0   :  { %3724 = vtanh.f32 %v2463_v27  ;;  %v3477_v37 = vmul.f32 -1.442695, %v2463_v27 }
0x20e1   :  { %v2356_v40 = vpop.f32.mrf.mxu3 }
0x20e2   :  { %v2402_v35 = vadd.f32 %v2401_v54, %v2356_v40 }
0x20e4   :  { %v2425_v51 = vadd.f32 %v2424_v62, %v2402_v35 }
0x20e6   :  { %v3725_v41 = vpop.eup %3724  ;;  %3726 = vtanh.f32 %v2425_v51  ;;  %v3476_v36 = vmul.f32 -1.442695, %v2425_v51 }
0x20e7   :  { %2486 = vrot.lane.b32.xlu1 %v3725_v41, %s4044_s28 }
0x20e8   :  { %3728 = vpow2.f32 %v3476_v36 }
0x20ec   :  { %v3727_v42 = vpop.eup %3726 }
0x20ed   :  { %2448 = vrot.lane.b32.xlu2 %v3727_v42, %s4044_s28 }
0x20ee   :  { %v3729_v4 = vpop.eup %3728 }
0x20ef   :  { %v2429_v43 = vadd.f32 1.0, %v3729_v4 }
0x20f1   :  { %3730 = vrcp.f32 %v2429_v43  ;;  %v2441_v46 = vand.u32 2147483648, %v2429_v43  ;;  %vm2435_vm13 = vweird.f32 %v2429_v43  ;;  %v2439_v47 = vand.u32 2147483647, %v2429_v43 }
0x20f2   :  { %3732 = vpow2.f32 %v3477_v37 }
0x20f3   :  { %v2442_v60 = vor.u32 1.1754944e-38, %v2441_v46  ;;  %vm2440_vm15 = vcmp.eq.f32.partialorder %v2439_v47, 8.507059e+37 }
0x20f7   :  { %v3731_v38 = vpop.eup %3730 }
0x20f8   :  { %v2431_v52 = vmul.f32 %v3731_v38, %v2429_v43  ;;  %v3733_v8 = vpop.eup %3732  ;;  %vm2436_vm12 = vweird.f32 %v3731_v38 }
0x20f9   :  { %v2467_v39 = vadd.f32 1.0, %v3733_v8  ;;  %vm2437_vm14 = vmor %vm2435_vm13, %vm2436_vm12 }
0x20fa   :  { %v2432_v53 = vsub.f32 1.0, %v2431_v52 }
0x20fb   :  { %3734 = vrcp.f32 %v2467_v39  ;;  %v2479_v3 = vand.u32 2147483648, %v2467_v39  ;;  %vm2473_vm2 = vweird.f32 %v2467_v39  ;;  %v2477_v6 = vand.u32 2147483647, %v2467_v39 }
0x20fc   :  { %v2433_v44 = vmul.f32 %v3731_v38, %v2432_v53 }
0x20fd   :  { %v2480_v11 = vor.u32 1.1754944e-38, %v2479_v3  ;;  %vm2478_vm5 = vcmp.eq.f32.partialorder %v2477_v6, 8.507059e+37 }
0x20fe   :  { %v2434_v45 = vadd.f32 %v3731_v38, %v2433_v44 }
0x2100   :  { %v2438_v59 = vsel %vm2437_vm14, %v3731_v38, %v2434_v45 }
0x2101   :  { %v3735_v49 = vpop.eup %3734  ;;  %v2443_v63 = vsel %vm2440_vm15, %v2442_v60, %v2438_v59 }
0x2102   :  { %v2469_v61 = vmul.f32 %v3735_v49, %v2467_v39  ;;  %vm2474_vm1 = vweird.f32 %v3735_v49  ;;  %v2446_v58 = vmul.f32 %v2443_v63, %v4727_v50 }
0x2103   :  { %vm2475_vm4 = vmor %vm2473_vm2, %vm2474_vm1 }
0x2104   :  { %v2470_v1 = vsub.f32 1.0, %v2469_v61 }
0x2106   :  { %v2471_v48 = vmul.f32 %v3735_v49, %v2470_v1 }
0x2108   :  { %v2472_v2 = vadd.f32 %v3735_v49, %v2471_v48 }
0x210a   :  { %v2476_v9 = vsel %vm2475_vm4, %v3735_v49, %v2472_v2 }
0x210b   :  { %v2481_v21 = vsel %vm2478_vm5, %v2480_v11, %v2476_v9 }
0x210c   :  { %v2484_v20 = vmul.f32 %v2481_v21, %v4723_v14 }
0x2147   :  { %v2449_v5 = vpop.permute.xlu2 %2448 }
0x2148   :  { %v2451_v0 = vmul.f32 %v2449_v5, %v2443_v63 }
0x214a   :  { %2453 = vrot.lane.b32.xlu1 %v2451_v0, %s4045_s29 }
0x2159   :  { %v2487_v16 = vpop.permute.xlu1 %2486 }
0x215a   :  { %v2489_v22 = vmul.f32 %v2487_v16, %v2481_v21 }
0x215c   :  { %2491 = vrot.lane.b32.xlu0 %v2489_v22, %s4045_s29 }
0x21bc   :  { %v2454_v23 = vpop.permute.xlu1 %2453 }
0x21bd   :  { %v4757_v24 = vadd.f32 %v2454_v23, %v2446_v58  ;;  %v2697_v58 = vld [vmem:[#allocation14 + $0x30] sm:$0xff] }
0x21be   :  { %2766 = vmatpush.msrb.mxu1 %v2697_v58 }
0x21bf   :  { %3736 = vtanh.f32 %v4757_v24 }
0x21c5   :  { %v3737_v26 = vpop.eup %3736 }
0x21c6   :  { %2459 = vrot.lane.b32.xlu0 %v3737_v26, %s4044_s28 }
0x21ce   :  { %v2492_v13 = vpop.permute.xlu0 %2491 }
0x21cf   :  { %v4762_v25 = vadd.f32 %v2492_v13, %v2484_v20  ;;  %v2695_v13 = vld [vmem:[#allocation14 + $0x20] sm:$0xff] }
0x21d0   :  { %2767 = vmatpush.msrb.mxu1 %v2695_v13 }
0x21d1   :  { %3738 = vtanh.f32 %v4762_v25 }
0x21d7   :  { %v3739_v56 = vpop.eup %3738 }
0x21d8   :  { %2497 = vrot.lane.b32.xlu2 %v3739_v56, %s4044_s28  ;;  %v2691_v56 = vld [vmem:[#allocation14] sm:$0xff] }
0x2232   :  { %v2498_v15 = vpop.permute.xlu2 %2497 }
0x2233   :  { %v2500_v57 = vmul.f32 %v2498_v15, %v2481_v21 }
0x2235   :  { %2502 = vrot.lane.b32.xlu1 %v2500_v57, %s4045_s29 }
0x2238   :  { %v2460_v7 = vpop.permute.xlu0 %2459 }
0x2239   :  { %v2462_v33 = vmul.f32 %v2460_v7, %v2443_v63 }
0x223b   :  { %2565 = vrot.lane.b32.xlu2 %v2462_v33, %s4045_s29 }
0x2295   :  { %v2566_v50 = vpop.permute.xlu2 %2565 }
0x2296   :  { %3480 = vmatmul.msk.f32.vlgmr.msra.gmra.mxu1 %vm153_vm0, %v2566_v50  ;;  %3481 = vmatmul.msk.f32.vlgmr.msra.gmra.mxu2 %vm153_vm0, %v2566_v50 }
0x22a7   :  { %v2503_v14 = vpop.permute.xlu1 %2502 }
0x22a8   :  { %2505 = vst.msk [vmem:[#allocation4 + $0x2] sm:$0x1] %vm2134_vm3, %v2503_v14  ;;  %3478 = vmatmul.msk.f32.vlgmr.msrb.gmra.mxu3 %vm153_vm0, %v2503_v14  ;;  %3479 = vmatmul.msk.f32.vlgmr.msrb.gmra.mxu0 %vm153_vm0, %v2503_v14  ;;  %v2794_v14 = vld [vmem:[#allocation3 + $0x5] sm:$0x1] }
0x2313   :  { %v2586_v29 = vpop.f32.mrf.mxu1 }
0x2319   :  { %v2606_v34 = vpop.f32.mrf.mxu2 }
0x2325   :  { %v2561_v32 = vpop.f32.mrf.mxu0 }
0x2326   :  { %v2607_v28 = vadd.f32 %v2606_v34, %v2561_v32 }
0x2328   :  { %v2648_v12 = vadd.f32 %v4677_v19, %v2607_v28 }
0x232a   :  { %3740 = vtanh.f32 %v2648_v12  ;;  %v3483_v27 = vmul.f32 -1.442695, %v2648_v12 }
0x232b   :  { %v2541_v30 = vpop.f32.mrf.mxu3 }
0x232c   :  { %v2587_v10 = vadd.f32 %v2586_v29, %v2541_v30 }
0x232e   :  { %v2610_v55 = vadd.f32 %v2609_v31, %v2587_v10 }
0x2330   :  { %v3741_v17 = vpop.eup %3740  ;;  %3742 = vtanh.f32 %v2610_v55  ;;  %v3482_v54 = vmul.f32 -1.442695, %v2610_v55 }
0x2331   :  { %2671 = vrot.lane.b32.xlu1 %v3741_v17, %s4044_s28  ;;  %3744 = vpow2.f32 %v3483_v27 }
0x2332   :  { %3746 = vpow2.f32 %v3482_v54 }
0x2336   :  { %v3743_v18 = vpop.eup %3742 }
0x2337   :  { %2633 = vrot.lane.b32.xlu0 %v3743_v18, %s4044_s28  ;;  %v3745_v40 = vpop.eup %3744 }
0x2338   :  { %v2652_v35 = vadd.f32 1.0, %v3745_v40  ;;  %v3747_v62 = vpop.eup %3746 }
0x2339   :  { %v2614_v51 = vadd.f32 1.0, %v3747_v62 }
0x233a   :  { %3748 = vrcp.f32 %v2652_v35  ;;  %v2664_v8 = vand.u32 2147483648, %v2652_v35  ;;  %vm2658_vm7 = vweird.f32 %v2652_v35  ;;  %v2662_v53 = vand.u32 2147483647, %v2652_v35 }
0x233b   :  { %3750 = vrcp.f32 %v2614_v51  ;;  %v2626_v59 = vand.u32 2147483648, %v2614_v51  ;;  %vm2620_vm11 = vweird.f32 %v2614_v51  ;;  %v2624_v61 = vand.u32 2147483647, %v2614_v51 }
0x233c   :  { %v2665_v45 = vor.u32 1.1754944e-38, %v2664_v8  ;;  %vm2663_vm9 = vcmp.eq.f32.partialorder %v2662_v53, 8.507059e+37 }
0x233d   :  { %v2627_v63 = vor.u32 1.1754944e-38, %v2626_v59  ;;  %vm2625_vm13 = vcmp.eq.f32.partialorder %v2624_v61, 8.507059e+37 }
0x2340   :  { %v3749_v41 = vpop.eup %3748 }
0x2341   :  { %v2654_v42 = vmul.f32 %v3749_v41, %v2652_v35  ;;  %v3751_v36 = vpop.eup %3750  ;;  %vm2659_vm6 = vweird.f32 %v3749_v41 }
0x2342   :  { %v2616_v43 = vmul.f32 %v3751_v36, %v2614_v51  ;;  %vm2660_vm8 = vmor %vm2658_vm7, %vm2659_vm6  ;;  %vm2621_vm10 = vweird.f32 %v3751_v36 }
0x2343   :  { %v2655_v4 = vsub.f32 1.0, %v2654_v42  ;;  %vm2622_vm12 = vmor %vm2620_vm11, %vm2621_vm10 }
0x2344   :  { %v2617_v38 = vsub.f32 1.0, %v2616_v43 }
0x2345   :  { %v2656_v37 = vmul.f32 %v3749_v41, %v2655_v4 }
0x2346   :  { %v2618_v39 = vmul.f32 %v3751_v36, %v2617_v38 }
0x2347   :  { %v2657_v52 = vadd.f32 %v3749_v41, %v2656_v37 }
0x2348   :  { %v2619_v46 = vadd.f32 %v3751_v36, %v2618_v39 }
0x2349   :  { %v2661_v44 = vsel %vm2660_vm8, %v3749_v41, %v2657_v52 }
0x234a   :  { %v2666_v49 = vsel %vm2663_vm9, %v2665_v45, %v2661_v44  ;;  %v2623_v5 = vsel %vm2622_vm12, %v3751_v36, %v2619_v46 }
0x234b   :  { %v2628_v1 = vsel %vm2625_vm13, %v2627_v63, %v2623_v5  ;;  %v2669_v11 = vmul.f32 %v2666_v49, %v4762_v25  ;;  %v2693_v25 = vld [vmem:[#allocation14 + $0x10] sm:$0xff] }
0x234c   :  { %v2631_v2 = vmul.f32 %v2628_v1, %v4757_v24  ;;  %2768 = vmatpush.msrb.mxu1 %v2693_v25 }
0x234e   :  { %2769 = vmatpush.msrb.mxu1 %v2691_v56 }
0x2350   :  { %2951 = vmatpush.msra.mxu1 %v2697_v58 }
0x2352   :  { %2952 = vmatpush.msra.mxu1 %v2695_v13 }
0x2354   :  { %2953 = vmatpush.msra.mxu1 %v2693_v25 }
0x2356   :  { %2954 = vmatpush.msra.mxu1 %v2691_v56 }
0x23a3   :  { %v2672_v47 = vpop.permute.xlu1 %2671 }
0x23a4   :  { %v2674_v60 = vmul.f32 %v2672_v47, %v2666_v49 }
0x23a6   :  { %2676 = vrot.lane.b32.xlu0 %v2674_v60, %s4045_s29 }
0x23a9   :  { %v2634_v0 = vpop.permute.xlu0 %2633 }
0x23aa   :  { %v2636_v48 = vmul.f32 %v2634_v0, %v2628_v1 }
0x23ac   :  { %2638 = vrot.lane.b32.xlu2 %v2636_v48, %s4045_s29 }
0x2406   :  { %v2639_v3 = vpop.permute.xlu2 %2638 }
0x2407   :  { %v4779_v6 = vadd.f32 %v2639_v3, %v2631_v2 }
0x2409   :  { %3752 = vtanh.f32 %v4779_v6 }
0x240f   :  { %v3753_v9 = vpop.eup %3752 }
0x2410   :  { %2644 = vrot.lane.b32.xlu1 %v3753_v9, %s4044_s28 }
0x2418   :  { %v2677_v16 = vpop.permute.xlu0 %2676 }
0x2419   :  { %v4784_v21 = vadd.f32 %v2677_v16, %v2669_v11  ;;  %v2890_v11 = vld [vmem:[#allocation14 + $0x70] sm:$0xff]  ;;  %v2888_v16 = vld [vmem:[#allocation14 + $0x60] sm:$0xff] }
0x241a   :  { %2906 = vmatpush.msrb.mxu3 %v2890_v11 }
0x241b   :  { %3754 = vtanh.f32 %v4784_v21 }
0x241c   :  { %2907 = vmatpush.msrb.mxu3 %v2888_v16 }
0x2421   :  { %v3755_v22 = vpop.eup %3754 }
0x2422   :  { %2682 = vrot.lane.b32.xlu2 %v3755_v22, %s4044_s28  ;;  %v2889_v22 = vld [vmem:[#allocation14 + $0x68] sm:$0xff] }
0x247c   :  { %v2683_v23 = vpop.permute.xlu2 %2682 }
0x247d   :  { %v2685_v24 = vmul.f32 %v2683_v23, %v2666_v49  ;;  %v2887_v23 = vld [vmem:[#allocation14 + $0x58] sm:$0xff] }
0x247f   :  { %2687 = vrot.lane.b32.xlu1 %v2685_v24, %s4045_s29  ;;  %v2885_v24 = vld [vmem:[#allocation14 + $0x48] sm:$0xff] }
0x2482   :  { %v2645_v26 = vpop.permute.xlu1 %2644 }
0x2483   :  { %v2647_v20 = vmul.f32 %v2645_v26, %v2628_v1 }
0x2485   :  { %2750 = vrot.lane.b32.xlu0 %v2647_v20, %s4045_s29 }
0x24f1   :  { %v2688_v15 = vpop.permute.xlu1 %2687 }
0x24f2   :  { %2690 = vst.msk [vmem:[#allocation4 + $0x3] sm:$0x1] %vm2134_vm3, %v2688_v15  ;;  %3484 = vmatmul.msk.f32.vlgmr.msra.gmra.mxu3 %vm153_vm0, %v2688_v15  ;;  %3485 = vmatmul.msk.f32.vlgmr.msra.gmra.mxu0 %vm153_vm0, %v2688_v15  ;;  %v2881_v15 = vld [vmem:[#allocation14 + $0x28] sm:$0xff] }
0x24f7   :  { %v2751_v57 = vpop.permute.xlu0 %2750 }
0x24f8   :  { %3486 = vmatmul.msk.f32.vlgmr.msrb.gmra.mxu1 %vm153_vm0, %v2751_v57  ;;  %3487 = vmatmul.msk.f32.vlgmr.msrb.gmra.mxu2 %vm153_vm0, %v2751_v57  ;;  %v2879_v57 = vld [vmem:[#allocation14 + $0x18] sm:$0xff] }
0x24f9   :  { %3136 = vmatpush.msrb.mxu1 %v2697_v58  ;;  %v2886_v58 = vld [vmem:[#allocation14 + $0x50] sm:$0xff] }
0x24fa   :  { %2908 = vmatpush.msrb.mxu3 %v2886_v58 }
0x24fb   :  { %3137 = vmatpush.msrb.mxu1 %v2695_v13 }
0x24fd   :  { %3138 = vmatpush.msrb.mxu1 %v2693_v25 }
0x24ff   :  { %3139 = vmatpush.msrb.mxu1 %v2691_v56  ;;  %v2883_v56 = vld [vmem:[#allocation14 + $0x38] sm:$0xff] }
0x2500   :  { %2971 = vmatpush.msra.mxu2 %v2883_v56 }
0x2502   :  { %2972 = vmatpush.msra.mxu2 %v2881_v15 }
0x2504   :  { %2973 = vmatpush.msra.mxu2 %v2879_v57 }
0x256f   :  { %v2746_v32 = vpop.f32.mrf.mxu0 }
0x2575   :  { %v2726_v7 = vpop.f32.mrf.mxu3  ;;  %v2771_v33 = vpop.f32.mrf.mxu1 }
0x2576   :  { %v2772_v50 = vadd.f32 %v2771_v33, %v2726_v7  ;;  %v2877_v7 = vld [vmem:[#allocation14 + $0x8] sm:$0xff] }
0x2577   :  { %2974 = vmatpush.msra.mxu2 %v2877_v7 }
0x2578   :  { %v2795_v34 = vadd.f32 %v2794_v14, %v2772_v50 }
0x2579   :  { %3156 = vmatpush.msrb.mxu2 %v2883_v56 }
0x257a   :  { %3756 = vtanh.f32 %v2795_v34  ;;  %v3488_v18 = vmul.f32 -1.442695, %v2795_v34 }
0x257b   :  { %v2791_v28 = vpop.f32.mrf.mxu2  ;;  %3157 = vmatpush.msrb.mxu2 %v2881_v15 }
0x257c   :  { %v2792_v12 = vadd.f32 %v2791_v28, %v2746_v32  ;;  %v2979_v28 = vld [vmem:[#allocation3 + $0x6] sm:$0x1] }
0x257d   :  { %3158 = vmatpush.msrb.mxu2 %v2879_v57 }
0x257e   :  { %v2833_v29 = vadd.f32 %v4677_v19, %v2792_v12 }
0x257f   :  { %3159 = vmatpush.msrb.mxu2 %v2877_v7 }
0x2580   :  { %v3757_v30 = vpop.eup %3756  ;;  %3758 = vtanh.f32 %v2833_v29  ;;  %v3489_v31 = vmul.f32 -1.442695, %v2833_v29 }
0x2581   :  { %2818 = vrot.lane.b32.xlu0 %v3757_v30, %s4044_s28 }
0x2582   :  { %3760 = vpow2.f32 %v3489_v31  ;;  %v4820_v31 = vld [vmem:[%s4878_s7 + $0x1] sm:$0x1] }
0x2586   :  { %v3759_v10 = vpop.eup %3758 }
0x2587   :  { %2856 = vrot.lane.b32.xlu2 %v3759_v10, %s4044_s28 }
0x2588   :  { %v3761_v55 = vpop.eup %3760 }
0x2589   :  { %v2837_v17 = vadd.f32 1.0, %v3761_v55 }
0x258b   :  { %3762 = vrcp.f32 %v2837_v17  ;;  %v2849_v41 = vand.u32 2147483648, %v2837_v17  ;;  %vm2843_vm15 = vweird.f32 %v2837_v17  ;;  %v2847_v42 = vand.u32 2147483647, %v2837_v17 }
0x258c   :  { %3764 = vpow2.f32 %v3488_v18 }
0x258d   :  { %v2850_v43 = vor.u32 1.1754944e-38, %v2849_v41  ;;  %vm2848_vm2 = vcmp.eq.f32.partialorder %v2847_v42, 8.507059e+37 }
0x2591   :  { %v3763_v27 = vpop.eup %3762 }
0x2592   :  { %v2839_v54 = vmul.f32 %v3763_v27, %v2837_v17  ;;  %v3765_v40 = vpop.eup %3764  ;;  %vm2844_vm14 = vweird.f32 %v3763_v27 }
0x2593   :  { %v2799_v62 = vadd.f32 1.0, %v3765_v40  ;;  %vm2845_vm1 = vmor %vm2843_vm15, %vm2844_vm14 }
0x2594   :  { %v2840_v35 = vsub.f32 1.0, %v2839_v54 }
0x2595   :  { %3766 = vrcp.f32 %v2799_v62  ;;  %v2811_v45 = vand.u32 2147483648, %v2799_v62  ;;  %vm2805_vm5 = vweird.f32 %v2799_v62  ;;  %v2809_v46 = vand.u32 2147483647, %v2799_v62 }
0x2596   :  { %v2841_v19 = vmul.f32 %v3763_v27, %v2840_v35 }
0x2597   :  { %v2812_v49 = vor.u32 1.1754944e-38, %v2811_v45  ;;  %vm2810_vm7 = vcmp.eq.f32.partialorder %v2809_v46, 8.507059e+37 }
0x2598   :  { %v2842_v51 = vadd.f32 %v3763_v27, %v2841_v19 }
0x259a   :  { %v2846_v4 = vsel %vm2845_vm1, %v3763_v27, %v2842_v51 }
0x259b   :  { %v3767_v36 = vpop.eup %3766  ;;  %v2851_v52 = vsel %vm2848_vm2, %v2850_v43, %v2846_v4 }
0x259c   :  { %v2801_v37 = vmul.f32 %v3767_v36, %v2799_v62  ;;  %vm2806_vm4 = vweird.f32 %v3767_v36  ;;  %v2854_v1 = vmul.f32 %v2851_v52, %v4784_v21  ;;  %v2884_v21 = vld [vmem:[#allocation14 + $0x40] sm:$0xff] }
0x259d   :  { %vm2807_vm6 = vmor %vm2805_vm5, %vm2806_vm4  ;;  %2909 = vmatpush.msrb.mxu3 %v2884_v21 }
0x259e   :  { %v2802_v53 = vsub.f32 1.0, %v2801_v37 }
0x259f   :  { %3091 = vmatpush.msra.mxu3 %v2890_v11 }
0x25a0   :  { %v2803_v39 = vmul.f32 %v3767_v36, %v2802_v53 }
0x25a1   :  { %3092 = vmatpush.msra.mxu3 %v2888_v16 }
0x25a2   :  { %v2804_v44 = vadd.f32 %v3767_v36, %v2803_v39 }
0x25a3   :  { %3093 = vmatpush.msra.mxu3 %v2886_v58 }
0x25a4   :  { %v2808_v47 = vsel %vm2807_vm6, %v3767_v36, %v2804_v44 }
0x25a5   :  { %v2813_v60 = vsel %vm2810_vm7, %v2812_v49, %v2808_v47  ;;  %3094 = vmatpush.msra.mxu3 %v2884_v21 }
0x25a6   :  { %v2816_v5 = vmul.f32 %v2813_v60, %v4779_v6  ;;  %v2891_v6 = vld [vmem:[#allocation14 + $0x78] sm:$0xff] }
0x25a7   :  { %2926 = vmatpush.msrb.mxu0 %v2891_v6 }
0x25a9   :  { %2927 = vmatpush.msrb.mxu0 %v2889_v22 }
0x25ab   :  { %2928 = vmatpush.msrb.mxu0 %v2887_v23 }
0x25ad   :  { %2929 = vmatpush.msrb.mxu0 %v2885_v24 }
0x25af   :  { %3111 = vmatpush.msra.mxu0 %v2891_v6 }
0x25b1   :  { %3112 = vmatpush.msra.mxu0 %v2889_v22 }
0x25b3   :  { %3113 = vmatpush.msra.mxu0 %v2887_v23 }
0x25b5   :  { %3114 = vmatpush.msra.mxu0 %v2885_v24 }
0x25e1   :  { %v2857_v38 = vpop.permute.xlu2 %2856 }
0x25e2   :  { %v2859_v8 = vmul.f32 %v2857_v38, %v2851_v52 }
0x25e4   :  { %2861 = vrot.lane.b32.xlu1 %v2859_v8, %s4045_s29 }
0x25f3   :  { %v2819_v59 = vpop.permute.xlu0 %2818 }
0x25f4   :  { %v2821_v61 = vmul.f32 %v2819_v59, %v2813_v60 }
0x25f6   :  { %2823 = vrot.lane.b32.xlu2 %v2821_v61, %s4045_s29 }
0x2650   :  { %v2824_v63 = vpop.permute.xlu2 %2823 }
0x2651   :  { %v4801_v0 = vadd.f32 %v2824_v63, %v2816_v5 }
0x2653   :  { %3768 = vtanh.f32 %v4801_v0 }
0x2656   :  { %v2862_v48 = vpop.permute.xlu1 %2861 }
0x2657   :  { %v4805_v2 = vadd.f32 %v2862_v48, %v2854_v1 }
0x2659   :  { %v3769_v3 = vpop.eup %3768  ;;  %3770 = vtanh.f32 %v4805_v2 }
0x265a   :  { %2829 = vrot.lane.b32.xlu1 %v3769_v3, %s4044_s28 }
0x265f   :  { %v3771_v9 = vpop.eup %3770 }
0x2660   :  { %2867 = vrot.lane.b32.xlu0 %v3771_v9, %s4044_s28 }
0x26cc   :  { %v2830_v26 = vpop.permute.xlu1 %2829 }
0x26cd   :  { %v2832_v20 = vmul.f32 %v2830_v26, %v2813_v60 }
0x26cf   :  { %2935 = vrot.lane.b32.xlu0 %v2832_v20, %s4045_s29 }
0x26d2   :  { %v2868_v13 = vpop.permute.xlu0 %2867 }
0x26d3   :  { %v2870_v25 = vmul.f32 %v2868_v13, %v2851_v52 }
0x26d5   :  { %2872 = vrot.lane.b32.xlu2 %v2870_v25, %s4045_s29 }
0x272f   :  { %v2873_v33 = vpop.permute.xlu2 %2872 }
0x2730   :  { %2875 = vst.msk [vmem:[#allocation4 + $0x4] sm:$0x1] %vm2134_vm3, %v2873_v33  ;;  %3490 = vmatmul.msk.f32.vlgmr.msrb.gmra.mxu3 %vm153_vm0, %v2873_v33  ;;  %3491 = vmatmul.msk.f32.vlgmr.msrb.gmra.mxu0 %vm153_vm0, %v2873_v33 }
0x2731   :  { %3293 = vmatpush.msrb.mxu0 %v2883_v56  ;;  %3268 = vmatpush.msrb.mxu3 %v2891_v6 }
0x2733   :  { %3294 = vmatpush.msrb.mxu0 %v2881_v15  ;;  %3269 = vmatpush.msrb.mxu3 %v2889_v22  ;;  %v3164_v15 = vld [vmem:[#allocation3 + $0x7] sm:$0x1] }
0x2735   :  { %3295 = vmatpush.msrb.mxu0 %v2879_v57  ;;  %3270 = vmatpush.msrb.mxu3 %v2887_v23 }
0x2737   :  { %3296 = vmatpush.msrb.mxu0 %v2877_v7  ;;  %3271 = vmatpush.msrb.mxu3 %v2885_v24 }
0x2741   :  { %v2936_v50 = vpop.permute.xlu0 %2935 }
0x2742   :  { %3492 = vmatmul.msk.f32.vlgmr.msra.gmra.mxu1 %vm153_vm0, %v2936_v50  ;;  %3493 = vmatmul.msk.f32.vlgmr.msra.gmra.mxu2 %vm153_vm0, %v2936_v50 }
0x27ad   :  { %v2931_v29 = vpop.f32.mrf.mxu0 }
0x27b3   :  { %v2911_v14 = vpop.f32.mrf.mxu3 }
0x27bf   :  { %v2956_v34 = vpop.f32.mrf.mxu1 }
0x27c0   :  { %v2957_v32 = vadd.f32 %v2956_v34, %v2911_v14 }
0x27c2   :  { %v2980_v12 = vadd.f32 %v2979_v28, %v2957_v32 }
0x27c4   :  { %3772 = vtanh.f32 %v2980_v12  ;;  %v3494_v35 = vmul.f32 -1.442695, %v2980_v12 }
0x27c5   :  { %v2976_v30 = vpop.f32.mrf.mxu2 }
0x27c6   :  { %v2977_v10 = vadd.f32 %v2976_v30, %v2931_v29 }
0x27c8   :  { %v3018_v55 = vadd.f32 %v4820_v31, %v2977_v10 }
0x27ca   :  { %v3773_v17 = vpop.eup %3772  ;;  %3774 = vtanh.f32 %v3018_v55  ;;  %v3495_v27 = vmul.f32 -1.442695, %v3018_v55 }
0x27cb   :  { %3003 = vrot.lane.b32.xlu1 %v3773_v17, %s4044_s28 }
0x27cc   :  { %3776 = vpow2.f32 %v3495_v27 }
0x27d0   :  { %v3775_v18 = vpop.eup %3774 }
0x27d1   :  { %3041 = vrot.lane.b32.xlu2 %v3775_v18, %s4044_s28 }
0x27d2   :  { %v3777_v54 = vpop.eup %3776 }
0x27d3   :  { %v3022_v40 = vadd.f32 1.0, %v3777_v54 }
0x27d5   :  { %3778 = vrcp.f32 %v3022_v40  ;;  %v3034_v43 = vand.u32 2147483648, %v3022_v40  ;;  %vm3028_vm9 = vweird.f32 %v3022_v40  ;;  %v3032_v37 = vand.u32 2147483647, %v3022_v40 }
0x27d6   :  { %3780 = vpow2.f32 %v3494_v35 }
0x27d7   :  { %v3035_v8 = vor.u32 1.1754944e-38, %v3034_v43  ;;  %vm3033_vm11 = vcmp.eq.f32.partialorder %v3032_v37, 8.507059e+37 }
0x27db   :  { %v3779_v62 = vpop.eup %3778 }
0x27dc   :  { %v3024_v19 = vmul.f32 %v3779_v62, %v3022_v40  ;;  %v3781_v51 = vpop.eup %3780  ;;  %vm3029_vm8 = vweird.f32 %v3779_v62 }
0x27dd   :  { %v2984_v42 = vadd.f32 1.0, %v3781_v51  ;;  %vm3030_vm10 = vmor %vm3028_vm9, %vm3029_vm8 }
0x27de   :  { %v3025_v41 = vsub.f32 1.0, %v3024_v19 }
0x27df   :  { %3782 = vrcp.f32 %v2984_v42  ;;  %v2996_v59 = vand.u32 2147483648, %v2984_v42  ;;  %vm2990_vm13 = vweird.f32 %v2984_v42  ;;  %v2994_v60 = vand.u32 2147483647, %v2984_v42 }
0x27e0   :  { %v3026_v36 = vmul.f32 %v3779_v62, %v3025_v41 }
0x27e1   :  { %v2997_v5 = vor.u32 1.1754944e-38, %v2996_v59  ;;  %vm2995_vm15 = vcmp.eq.f32.partialorder %v2994_v60, 8.507059e+37 }
0x27e2   :  { %v3027_v4 = vadd.f32 %v3779_v62, %v3026_v36 }
0x27e4   :  { %v3031_v52 = vsel %vm3030_vm10, %v3779_v62, %v3027_v4 }
0x27e5   :  { %v3783_v38 = vpop.eup %3782  ;;  %v3036_v44 = vsel %vm3033_vm11, %v3035_v8, %v3031_v52 }
0x27e6   :  { %v2986_v53 = vmul.f32 %v3783_v38, %v2984_v42  ;;  %vm2991_vm12 = vweird.f32 %v3783_v38  ;;  %v3039_v3 = vmul.f32 %v3036_v44, %v4805_v2 }
0x27e7   :  { %vm2992_vm14 = vmor %vm2990_vm13, %vm2991_vm12 }
0x27e8   :  { %v2987_v46 = vsub.f32 1.0, %v2986_v53 }
0x27ea   :  { %v2988_v47 = vmul.f32 %v3783_v38, %v2987_v46 }
0x27ec   :  { %v2989_v49 = vadd.f32 %v3783_v38, %v2988_v47 }
0x27ee   :  { %v2993_v61 = vsel %vm2992_vm14, %v3783_v38, %v2989_v49 }
0x27ef   :  { %v2998_v1 = vsel %vm2995_vm15, %v2997_v5, %v2993_v61 }
0x27f0   :  { %v3001_v16 = vmul.f32 %v2998_v1, %v4801_v0 }
0x282b   :  { %v3042_v39 = vpop.permute.xlu2 %3041 }
0x282c   :  { %v3044_v45 = vmul.f32 %v3042_v39, %v3036_v44 }
0x282e   :  { %3046 = vrot.lane.b32.xlu1 %v3044_v45, %s4045_s29 }
0x283d   :  { %v3004_v63 = vpop.permute.xlu1 %3003 }
0x283e   :  { %v3006_v48 = vmul.f32 %v3004_v63, %v2998_v1 }
0x2840   :  { %3008 = vrot.lane.b32.xlu0 %v3006_v48, %s4045_s29 }
0x28a0   :  { %v3047_v9 = vpop.permute.xlu1 %3046 }
0x28a1   :  { %v4828_v11 = vadd.f32 %v3047_v9, %v3039_v3 }
0x28a3   :  { %3784 = vtanh.f32 %v4828_v11 }
0x28a9   :  { %v3785_v6 = vpop.eup %3784 }
0x28aa   :  { %3052 = vrot.lane.b32.xlu0 %v3785_v6, %s4044_s28 }
0x28b2   :  { %v3009_v22 = vpop.permute.xlu0 %3008 }
0x28b3   :  { %v4833_v58 = vadd.f32 %v3009_v22, %v3001_v16 }
0x28b5   :  { %3786 = vtanh.f32 %v4833_v58 }
0x28bb   :  { %v3787_v23 = vpop.eup %3786 }
0x28bc   :  { %3014 = vrot.lane.b32.xlu2 %v3787_v23, %s4044_s28 }
0x2916   :  { %v3015_v21 = vpop.permute.xlu2 %3014 }
0x2917   :  { %v3017_v2 = vmul.f32 %v3015_v21, %v2998_v1 }
0x2919   :  { %3120 = vrot.lane.b32.xlu1 %v3017_v2, %s4045_s29 }
0x291c   :  { %v3053_v24 = vpop.permute.xlu0 %3052 }
0x291d   :  { %v3055_v26 = vmul.f32 %v3053_v24, %v3036_v44 }
0x291f   :  { %3057 = vrot.lane.b32.xlu2 %v3055_v26, %s4045_s29 }
0x2979   :  { %v3058_v20 = vpop.permute.xlu2 %3057 }
0x297a   :  { %3060 = vst.msk [vmem:[#allocation4 + $0x5] sm:$0x1] %vm2134_vm3, %v3058_v20  ;;  %3496 = vmatmul.msk.f32.vlgmr.msra.gmra.mxu3 %vm153_vm0, %v3058_v20  ;;  %3497 = vmatmul.msk.f32.vlgmr.msra.gmra.mxu0 %vm153_vm0, %v3058_v20 }
0x298b   :  { %v3121_v0 = vpop.permute.xlu1 %3120 }
0x298c   :  { %3498 = vmatmul.msk.f32.vlgmr.msrb.gmra.mxu1 %vm153_vm0, %v3121_v0  ;;  %3499 = vmatmul.msk.f32.vlgmr.msrb.gmra.mxu2 %vm153_vm0, %v3121_v0 }
0x29f7   :  { %v3116_v7 = vpop.f32.mrf.mxu0 }
0x29fd   :  { %v3096_v13 = vpop.f32.mrf.mxu3 }
0x2a09   :  { %v3141_v25 = vpop.f32.mrf.mxu1 }
0x2a0a   :  { %v3142_v56 = vadd.f32 %v3141_v25, %v3096_v13 }
0x2a0c   :  { %v3165_v57 = vadd.f32 %v3164_v15, %v3142_v56 }
0x2a0e   :  { %3788 = vtanh.f32 %v3165_v57  ;;  %v3500_v28 = vmul.f32 -1.442695, %v3165_v57 }
0x2a0f   :  { %v3161_v33 = vpop.f32.mrf.mxu2 }
0x2a10   :  { %v3162_v50 = vadd.f32 %v3161_v33, %v3116_v7 }
0x2a12   :  { %v3203_v14 = vadd.f32 %v4820_v31, %v3162_v50 }
0x2a14   :  { %v3789_v34 = vpop.eup %3788  ;;  %3790 = vtanh.f32 %v3203_v14  ;;  %v3501_v12 = vmul.f32 -1.442695, %v3203_v14 }
0x2a15   :  { %3188 = vrot.lane.b32.xlu1 %v3789_v34, %s4044_s28  ;;  %3792 = vpow2.f32 %v3500_v28 }
0x2a16   :  { %3794 = vpow2.f32 %v3501_v12 }
0x2a1a   :  { %v3791_v32 = vpop.eup %3790 }
0x2a1b   :  { %3226 = vrot.lane.b32.xlu0 %v3791_v32, %s4044_s28  ;;  %v3793_v29 = vpop.eup %3792 }
0x2a1c   :  { %v3169_v30 = vadd.f32 1.0, %v3793_v29  ;;  %v3795_v10 = vpop.eup %3794 }
0x2a1d   :  { %v3207_v55 = vadd.f32 1.0, %v3795_v10 }
0x2a1e   :  { %3796 = vrcp.f32 %v3169_v30  ;;  %v3181_v51 = vand.u32 2147483648, %v3169_v30  ;;  %vm3175_vm2 = vweird.f32 %v3169_v30  ;;  %v3179_v41 = vand.u32 2147483647, %v3169_v30 }
0x2a1f   :  { %3798 = vrcp.f32 %v3207_v55  ;;  %v3219_v52 = vand.u32 2147483648, %v3207_v55  ;;  %vm3213_vm7 = vweird.f32 %v3207_v55  ;;  %v3217_v53 = vand.u32 2147483647, %v3207_v55 }
0x2a20   :  { %v3182_v4 = vor.u32 1.1754944e-38, %v3181_v51  ;;  %vm3180_vm5 = vcmp.eq.f32.partialorder %v3179_v41, 8.507059e+37 }
0x2a21   :  { %v3220_v44 = vor.u32 1.1754944e-38, %v3219_v52  ;;  %vm3218_vm9 = vcmp.eq.f32.partialorder %v3217_v53, 8.507059e+37 }
0x2a24   :  { %v3797_v17 = vpop.eup %3796 }
0x2a25   :  { %v3171_v18 = vmul.f32 %v3797_v17, %v3169_v30  ;;  %v3799_v27 = vpop.eup %3798  ;;  %vm3176_vm1 = vweird.f32 %v3797_v17 }
0x2a26   :  { %v3209_v40 = vmul.f32 %v3799_v27, %v3207_v55  ;;  %vm3177_vm4 = vmor %vm3175_vm2, %vm3176_vm1  ;;  %vm3214_vm6 = vweird.f32 %v3799_v27 }
0x2a27   :  { %v3172_v54 = vsub.f32 1.0, %v3171_v18  ;;  %vm3215_vm8 = vmor %vm3213_vm7, %vm3214_vm6  ;;  %v3347_v18 = vld [vmem:[#allocation16 + $0x10] sm:$0xff] }
0x2a28   :  { %v3210_v62 = vsub.f32 1.0, %v3209_v40 }
0x2a29   :  { %v3173_v35 = vmul.f32 %v3797_v17, %v3172_v54  ;;  %v3345_v54 = vld [vmem:[#allocation16] sm:$0xff] }
0x2a2a   :  { %v3211_v42 = vmul.f32 %v3799_v27, %v3210_v62  ;;  %v3523_v62 = vld [vmem:[%s4880_s9] ss:$0 sm:$0xff] }
0x2a2b   :  { %v3174_v19 = vadd.f32 %v3797_v17, %v3173_v35 }
0x2a2c   :  { %v3212_v43 = vadd.f32 %v3799_v27, %v3211_v42 }
0x2a2d   :  { %v3178_v36 = vsel %vm3177_vm4, %v3797_v17, %v3174_v19  ;;  %v3348_v17 = vld [vmem:[#allocation16 + $0x18] sm:$0xff] }
0x2a2e   :  { %v3183_v38 = vsel %vm3180_vm5, %v3182_v4, %v3178_v36  ;;  %v3216_v39 = vsel %vm3215_vm8, %v3799_v27, %v3212_v43  ;;  %3368 = vmatpush.msra.mxu1 %v3348_v17  ;;  %v3346_v27 = vld [vmem:[#allocation16 + $0x8] sm:$0xff] }
0x2a2f   :  { %v3221_v46 = vsel %vm3218_vm9, %v3220_v44, %v3216_v39  ;;  %v3186_v5 = vmul.f32 %v3183_v38, %v4833_v58 }
0x2a30   :  { %v3224_v49 = vmul.f32 %v3221_v46, %v4828_v11  ;;  %3369 = vmatpush.msra.mxu1 %v3347_v18 }
0x2a32   :  { %3370 = vmatpush.msra.mxu1 %v3346_v27 }
0x2a34   :  { %3371 = vmatpush.msra.mxu1 %v3345_v54 }
0x2a87   :  { %v3189_v37 = vpop.permute.xlu1 %3188 }
0x2a88   :  { %v3191_v8 = vmul.f32 %v3189_v37, %v3183_v38 }
0x2a8a   :  { %3193 = vrot.lane.b32.xlu0 %v3191_v8, %s4045_s29 }
0x2a8d   :  { %v3227_v45 = vpop.permute.xlu0 %3226 }
0x2a8e   :  { %v3229_v47 = vmul.f32 %v3227_v45, %v3221_v46 }
0x2a90   :  { %3231 = vrot.lane.b32.xlu2 %v3229_v47, %s4045_s29 }
0x2aea   :  { %v3232_v59 = vpop.permute.xlu2 %3231 }
0x2aeb   :  { %v3234_v60 = vadd.f32 %v3232_v59, %v3224_v49 }
0x2aed   :  { %3800 = vtanh.f32 %v3234_v60 }
0x2af3   :  { %v3801_v61 = vpop.eup %3800 }
0x2af4   :  { %3237 = vrot.lane.b32.xlu1 %v3801_v61, %s4044_s28 }
0x2afc   :  { %v3194_v63 = vpop.permute.xlu0 %3193 }
0x2afd   :  { %v3196_v1 = vadd.f32 %v3194_v63, %v3186_v5 }
0x2aff   :  { %3802 = vtanh.f32 %v3196_v1 }
0x2b05   :  { %v3803_v48 = vpop.eup %3802 }
0x2b06   :  { %3199 = vrot.lane.b32.xlu2 %v3803_v48, %s4044_s28 }
0x2b60   :  { %v3200_v3 = vpop.permute.xlu2 %3199 }
0x2b61   :  { %v3202_v9 = vmul.f32 %v3200_v3, %v3183_v38 }
0x2b63   :  { %3277 = vrot.lane.b32.xlu1 %v3202_v9, %s4045_s29 }
0x2b66   :  { %v3238_v6 = vpop.permute.xlu1 %3237 }
0x2b67   :  { %v3240_v11 = vmul.f32 %v3238_v6, %v3221_v46 }
0x2b69   :  { %3242 = vrot.lane.b32.xlu0 %v3240_v11, %s4045_s29 }
0x2bd5   :  { %v3278_v16 = vpop.permute.xlu1 %3277 }
0x2bd6   :  { %3503 = vmatmul.msk.f32.vlgmr.msrb.gmra.mxu0 %vm153_vm0, %v3278_v16 }
0x2bdb   :  { %v3243_v22 = vpop.permute.xlu0 %3242 }
0x2bdc   :  { %3245 = vst.msk [vmem:[#allocation4 + $0x6] sm:$0x1] %vm2134_vm3, %v3243_v22  ;;  %3502 = vmatmul.msk.f32.vlgmr.msrb.gmra.mxu3 %vm153_vm0, %v3243_v22 }
0x2c53   :  { %v3298_v58 = vpop.f32.mrf.mxu0 }
0x2c5f   :  { %v3273_v23 = vpop.f32.mrf.mxu3 }
0x2c60   :  { %v3299_v21 = vadd.f32 %v3298_v58, %v3273_v23 }
0x2c62   :  { %v3301_v2 = vadd.f32 %v4820_v31, %v3299_v21 }
0x2c64   :  { %3804 = vtanh.f32 %v3301_v2  ;;  %v3504_v26 = vmul.f32 -1.442695, %v3301_v2 }
0x2c66   :  { %3806 = vpow2.f32 %v3504_v26 }
0x2c6a   :  { %v3805_v24 = vpop.eup %3804 }
0x2c6b   :  { %3324 = vrot.lane.b32.xlu2 %v3805_v24, %s4044_s28 }
0x2c6c   :  { %v3807_v20 = vpop.eup %3806 }
0x2c6d   :  { %v3305_v0 = vadd.f32 1.0, %v3807_v20 }
0x2c6f   :  { %3808 = vrcp.f32 %v3305_v0  ;;  %v3317_v7 = vand.u32 2147483648, %v3305_v0  ;;  %vm3311_vm11 = vweird.f32 %v3305_v0  ;;  %v3315_v33 = vand.u32 2147483647, %v3305_v0 }
0x2c71   :  { %v3318_v50 = vor.u32 1.1754944e-38, %v3317_v7  ;;  %vm3316_vm13 = vcmp.eq.f32.partialorder %v3315_v33, 8.507059e+37 }
0x2c75   :  { %v3809_v13 = vpop.eup %3808 }
0x2c76   :  { %v3307_v25 = vmul.f32 %v3809_v13, %v3305_v0  ;;  %vm3312_vm10 = vweird.f32 %v3809_v13 }
0x2c77   :  { %vm3313_vm12 = vmor %vm3311_vm11, %vm3312_vm10 }
0x2c78   :  { %v3308_v56 = vsub.f32 1.0, %v3307_v25 }
0x2c7a   :  { %v3309_v15 = vmul.f32 %v3809_v13, %v3308_v56 }
0x2c7c   :  { %v3310_v57 = vadd.f32 %v3809_v13, %v3309_v15 }
0x2c7e   :  { %v3314_v31 = vsel %vm3313_vm12, %v3809_v13, %v3310_v57 }
0x2c7f   :  { %v3319_v34 = vsel %vm3316_vm13, %v3318_v50, %v3314_v31 }
0x2c80   :  { %v3322_v28 = vmul.f32 %v3319_v34, %v3234_v60 }
0x2cc5   :  { %v3325_v14 = vpop.permute.xlu2 %3324 }
0x2cc6   :  { %v3327_v32 = vmul.f32 %v3325_v14, %v3319_v34 }
0x2cc8   :  { %3329 = vrot.lane.b32.xlu0 %v3327_v32, %s4045_s29 }
0x2d3a   :  { %v3330_v12 = vpop.permute.xlu0 %3329 }
0x2d3b   :  { %v3332_v29 = vadd.f32 %v3330_v12, %v3322_v28 }
0x2d3d   :  { %3810 = vtanh.f32 %v3332_v29 }
0x2d43   :  { %v3811_v30 = vpop.eup %3810 }
0x2d44   :  { %3335 = vrot.lane.b32.xlu1 %v3811_v30, %s4044_s28 }
0x2db6   :  { %v3336_v10 = vpop.permute.xlu1 %3335 }
0x2db7   :  { %v3338_v55 = vmul.f32 %v3336_v10, %v3319_v34 }
0x2db9   :  { %3340 = vrot.lane.b32.xlu2 %v3338_v55, %s4045_s29 }
0x2e13   :  { %v3341_v40 = vpop.permute.xlu2 %3340 }
0x2e14   :  { %3343 = vst.msk [vmem:[#allocation4 + $0x7] sm:$0x1] %vm2134_vm3, %v3341_v40 }
0x2e1b   :  { %v3344_v35 = vld [vmem:[#allocation4] sm:$0xff] }
0x2e1c   :  { %3505 = vmatmul.msk.f32.vlgmr.msra.gmra.mxu1 %vm153_vm0, %v3344_v35 }
0x2e99   :  { %v3373_v19 = vpop.f32.mrf.mxu1 }
0x2e9a   :  { %v3374_v51 = vadd.f32 %v3523_v62, %v3373_v19 }
0x2e9c   :  { %3376 = vst [vmem:[#allocation17] sm:$0xff] %v3374_v51 }
0x2e9d   :  { %3387 = dma.vmem_to_hbm [thread:$0]  %s3383_s17, 128, %s3385_s20, [#allocation7]  }
0x2e9e   :  { %4030 = dma.done.wait [#allocation7], 128  }
0x2e9f   :  { %4031 = vsyncadd [#allocation7], 4294967168 }
0x2ea0   :  { %3392 = vsyncpa [#allocation6], 1 }
0x2ea1   :  { %3393 = vsyncpa [#allocation9], 1 }
0x2ea2   :  { %3394 = vsyncpa [#allocation12], 1 }
0x2ea3   :  { %3395 = vsyncpa [#allocation15], 1 }
0x2ea4   :  { %3396 = vsyncpa [#allocation7], 1 }

</bundles_post_ra>
